<compile_context>
chip_gen: v7x
topology: tpu7x:2x2x1
jax: 0.10.0
libtpu: 0.0.40
codegen_flags: <defaults>
</compile_context>

<pallas_src>
import numpy as np
import jax
import jax.numpy as jnp
from jax import lax
from jax.experimental import pallas as pl
from jax.experimental.pallas import tpu as pltpu

START_TAG = '<START>'
STOP_TAG = '<STOP>'


def _sigmoid(x):
    # exact: sigmoid(x) = 0.5 * (1 + tanh(x/2)); tanh lives on the EUP slot.
    return 0.5 * jnp.tanh(0.5 * x) + 0.5


def build_kernel(start_id, stop_id):
    """Fused BiLSTM + emission + CRF forward kernel (single invocation, no grid)."""

    def kernel(tags_ref, trans_s_ref,                # SMEM: tags (seq,), trans (T,T)
               emb_ref,                              # VMEM: (seq, E)
               wih_f_ref, whh_f_ref, bg_f_ref,       # (E,4H2), (H2,4H2), (1,4H2)
               wih_b_ref, whh_b_ref, bg_b_ref,
               h0_ref, c0_ref,                       # (2,1,H2)
               we_f_ref, we_b_ref, be_ref,           # (H2,T), (H2,T), (1,T)
               trans_ref,                            # (T,T)  trans[next, prev]
               logz_ref, gt_ref,                     # outputs (1,1)
               hf_buf, hb_buf):                      # scratch (seq, H2)
        seq = emb_ref.shape[0]
        H2 = whh_f_ref.shape[0]
        T = trans_ref.shape[0]

        # ---- batched input projections (off the recurrent critical path) ----
        emb = emb_ref[...]                                           # (seq, E)
        gates_f = (jnp.dot(emb, wih_f_ref[...],
                           preferred_element_type=jnp.float32) + bg_f_ref[...])
        gates_b = (jnp.dot(emb, wih_b_ref[...],
                           preferred_element_type=jnp.float32) + bg_b_ref[...])

        whh_f = whh_f_ref[...]                                       # (H2, 4H2)
        whh_b = whh_b_ref[...]

        def cell(pre, c):
            # pre: (1, 4H2), static lane slices into i|f|g|o
            i = _sigmoid(pre[:, 0:H2])
            f = _sigmoid(pre[:, H2:2 * H2])
            g = jnp.tanh(pre[:, 2 * H2:3 * H2])
            o = _sigmoid(pre[:, 3 * H2:4 * H2])
            c_new = f * c + i * g
            h_new = o * jnp.tanh(c_new)
            return h_new, c_new

        # ---- interleaved bidirectional LSTM, fully unrolled (seq is static) ----
        hf, cf = h0_ref[0], c0_ref[0]                                # (1, H2)
        hb, cb = h0_ref[1], c0_ref[1]
        for s in range(seq):
            tb = seq - 1 - s
            pre_f = gates_f[s:s + 1, :] + jnp.dot(
                hf, whh_f, preferred_element_type=jnp.float32)
            pre_b = gates_b[tb:tb + 1, :] + jnp.dot(
                hb, whh_b, preferred_element_type=jnp.float32)
            hf, cf = cell(pre_f, cf)
            hb, cb = cell(pre_b, cb)
            hf_buf[s:s + 1, :] = hf                                  # static row stores
            hb_buf[tb:tb + 1, :] = hb

        # ---- batched emission projection ----
        feats = (jnp.dot(hf_buf[...], we_f_ref[...],
                         preferred_element_type=jnp.float32)
                 + jnp.dot(hb_buf[...], we_b_ref[...],
                           preferred_element_type=jnp.float32)
                 + be_ref[...])                                      # (seq, T)

        # ---- fused CRF forward recursion + gold-path score ----
        trans = trans_ref[...]                                       # (T, T)
        i0 = lax.broadcasted_iota(jnp.int32, (T, T), 0)
        i1 = lax.broadcasted_iota(jnp.int32, (T, T), 1)
        row_iota = lax.broadcasted_iota(jnp.int32, (1, T), 1)

        def col_to_row(col):
            # (T,1) -> (1,T) without a transpose relayout
            return jnp.sum(jnp.where(i0 == i1, col, 0.0), axis=0, keepdims=True)

        fv = jnp.full((1, T), -10000.0, dtype=jnp.float32)
        fv = jnp.where(row_iota == start_id, jnp.float32(0.0), fv)

        gt_emit = jnp.zeros((1, 1), jnp.float32)
        gt_trans = jnp.float32(0.0)
        prev = jnp.int32(start_id)

        for t in range(seq):
            feat = feats[t:t + 1, :]                                 # (1, T)
            # CRF log-sum-exp recursion: M[next, prev] = trans + fv[prev]
            M = trans + fv
            m = jnp.max(M, axis=1, keepdims=True)                    # (T, 1)
            lse = m + jnp.log(jnp.sum(jnp.exp(M - m), axis=1, keepdims=True))
            fv = col_to_row(lse) + feat
            # gold path: scalar SMEM lookup for trans[nxt, prev], masked lane
            # reduce (slack filler) for feat[nxt]
            nxt = tags_ref[t]
            gt_trans = gt_trans + trans_s_ref[nxt, prev]
            gt_emit = gt_emit + jnp.sum(jnp.where(row_iota == nxt, feat, 0.0),
                                        axis=1, keepdims=True)
            prev = nxt

        term = fv + trans[stop_id:stop_id + 1, :]                    # (1, T)
        mt = jnp.max(term, axis=1, keepdims=True)
        logz_ref[...] = mt + jnp.log(jnp.sum(jnp.exp(term - mt),
                                             axis=1, keepdims=True))

        gt_trans = gt_trans + trans_s_ref[stop_id, prev]
        gt_ref[...] = gt_emit + gt_trans

    return kernel


def init_params(key, vocab_size, embedding_size, hidden_dim, T, start_id, stop_id):
    H2 = hidden_dim // 2
    ks = jax.random.split(key, 16)
    f32 = jnp.float32

    W_emb = (jax.random.normal(ks[0], (vocab_size, embedding_size)) * 0.1).astype(f32)

    bound = 1.0 / np.sqrt(H2)

    def u(k, shape):
        return jax.random.uniform(k, shape, minval=-bound, maxval=bound).astype(f32)

    wih_f = u(ks[1], (4 * H2, embedding_size)); whh_f = u(ks[2], (4 * H2, H2))
    bih_f = u(ks[3], (4 * H2,)); bhh_f = u(ks[4], (4 * H2,))
    wih_b = u(ks[5], (4 * H2, embedding_size)); whh_b = u(ks[6], (4 * H2, H2))
    bih_b = u(ks[7], (4 * H2,)); bhh_b = u(ks[8], (4 * H2,))

    W_e = u(ks[9], (T, hidden_dim)); b_e = u(ks[10], (T,))

    trans = jax.random.normal(ks[11], (T, T)).astype(f32)
    trans = trans.at[start_id, :].set(-10000.0)
    trans = trans.at[:, stop_id].set(-10000.0)

    h0 = jax.random.normal(ks[12], (2, 1, H2)).astype(f32)   # init_hidden()
    c0 = jax.random.normal(ks[13], (2, 1, H2)).astype(f32)

    raw = dict(W_emb=W_emb, wih_f=wih_f, whh_f=whh_f, bih_f=bih_f, bhh_f=bhh_f,
               wih_b=wih_b, whh_b=whh_b, bih_b=bih_b, bhh_b=bhh_b,
               W_e=W_e, b_e=b_e, trans=trans, h0=h0, c0=c0)

    # gate-stacked layouts: (4*H2, in) -> (in, 4*H2); columns grouped i|f|g|o
    def cat_ih(w):
        return w.T

    def cat_b(bi, bh):
        return (bi + bh).reshape(1, 4 * H2)

    kparams = dict(
        W_emb=W_emb,
        wih_f=cat_ih(wih_f), whh_f=cat_ih(whh_f), bg_f=cat_b(bih_f, bhh_f),
        wih_b=cat_ih(wih_b), whh_b=cat_ih(whh_b), bg_b=cat_b(bih_b, bhh_b),
        h0=h0, c0=c0,
        we_f=W_e[:, :H2].T, we_b=W_e[:, H2:].T, be=b_e.reshape(1, T),
        trans=trans,
    )
    return raw, kparams


def bilstm_crf_forward(sentence, tags, kparams, tag2id):
    start_id, stop_id = tag2id[START_TAG], tag2id[STOP_TAG]
    seq = int(sentence.shape[0])
    T = int(kparams['trans'].shape[0])
    H2 = int(kparams['whh_f'].shape[0])
    E = int(kparams['wih_f'].shape[0])

    # Glue: embedding gather outside the kernel, flattened to (seq, E).
    emb = jnp.take(kparams['W_emb'], sentence, axis=0).astype(jnp.float32)
    emb = emb.reshape(seq, E)

    dense_inputs = (emb,
                    kparams['wih_f'], kparams['whh_f'], kparams['bg_f'],
                    kparams['wih_b'], kparams['whh_b'], kparams['bg_b'],
                    kparams['h0'], kparams['c0'],
                    kparams['we_f'], kparams['we_b'], kparams['be'],
                    kparams['trans'])

    kernel = build_kernel(start_id, stop_id)

    logz, gt = pl.pallas_call(
        kernel,
        out_shape=(jax.ShapeDtypeStruct((1, 1), jnp.float32),
                   jax.ShapeDtypeStruct((1, 1), jnp.float32)),
        in_specs=[pl.BlockSpec(memory_space=pltpu.MemorySpace.SMEM),   # tags
                  pl.BlockSpec(memory_space=pltpu.MemorySpace.SMEM)]   # trans (scalar reads)
                 + [pl.BlockSpec(memory_space=pltpu.MemorySpace.VMEM)] * len(dense_inputs),
        out_specs=(pl.BlockSpec(memory_space=pltpu.MemorySpace.VMEM),
                   pl.BlockSpec(memory_space=pltpu.MemorySpace.VMEM)),
        scratch_shapes=[pltpu.VMEM((seq, H2), jnp.float32),   # forward-dir hiddens
                        pltpu.VMEM((seq, H2), jnp.float32)],  # reverse-dir hiddens
    )(tags.astype(jnp.int32), kparams['trans'], *dense_inputs)

    return logz[0, 0], gt[0, 0]


def reference_forward(sentence, tags, raw, start_id, stop_id):
    """Pure numpy re-implementation of the PyTorch forward() for verification."""
    sig = lambda x: 1.0 / (1.0 + np.exp(-x))
    sentence = np.asarray(sentence)
    tags = np.asarray(tags)
    W_emb = np.asarray(raw['W_emb'])
    emb = W_emb[sentence]
    H2 = np.asarray(raw['whh_f']).shape[1]
    seq = emb.shape[0]

    def run_dir(order, wih, whh, bih, bhh, h, c):
        wih = np.asarray(wih); whh = np.asarray(whh)
        b = np.asarray(bih) + np.asarray(bhh)
        hs = np.zeros((seq, H2), np.float32)
        for t in order:
            g = emb[t] @ wih.T + h @ whh.T + b
            i = sig(g[0:H2]); f = sig(g[H2:2 * H2])
            gg = np.tanh(g[2 * H2:3 * H2]); o = sig(g[3 * H2:4 * H2])
            c = f * c + i * gg
            h = o * np.tanh(c)
            hs[t] = h
        return hs

    h0 = np.asarray(raw['h0']); c0 = np.asarray(raw['c0'])
    hs_f = run_dir(range(seq), raw['wih_f'], raw['whh_f'], raw['bih_f'],
                   raw['bhh_f'], h0[0, 0], c0[0, 0])
    hs_b = run_dir(range(seq - 1, -1, -1), raw['wih_b'], raw['whh_b'], raw['bih_b'],
                   raw['bhh_b'], h0[1, 0], c0[1, 0])
    lstm_feat = np.concatenate([hs_f, hs_b], axis=1)
    feats = lstm_feat @ np.asarray(raw['W_e']).T + np.asarray(raw['b_e'])
    trans = np.asarray(raw['trans'])
    T = trans.shape[0]

    def lse(v):
        m = v.max()
        return m + np.log(np.sum(np.exp(v - m)))

    fv = np.full(T, -10000.0, np.float32)
    fv[start_id] = 0.0
    for t in range(seq):
        new = np.zeros(T, np.float32)
        for n in range(T):
            new[n] = lse(fv + feats[t, n] + trans[n])
        fv = new
    logz = lse(fv + trans[stop_id])

    g = 0.0
    prev = start_id
    for t in range(seq):
        n = int(tags[t])
        g += trans[n, prev] + feats[t, n]
        prev = n
    g += trans[stop_id, prev]
    return float(logz), float(g)


if __name__ == "__main__":
    vocab_size, embedding_size, hidden_dim, seq_len = 50, 16, 32, 8
    tag2id = {'B': 0, 'M': 1, 'E': 2, 'S': 3, START_TAG: 4, STOP_TAG: 5}
    T = len(tag2id)
    start_id, stop_id = tag2id[START_TAG], tag2id[STOP_TAG]

    key = jax.random.PRNGKey(0)
    kparam, kdata = jax.random.split(key)
    raw, kparams = init_params(kparam, vocab_size, embedding_size, hidden_dim,
                               T, start_id, stop_id)

    k1, k2 = jax.random.split(kdata)
    sentence = jax.random.randint(k1, (seq_len,), 0, vocab_size, dtype=jnp.int32)
    tags = jax.random.randint(k2, (seq_len,), 0, 4, dtype=jnp.int32)  # real tags only

    logz, gt = bilstm_crf_forward(sentence, tags, kparams, tag2id)
    logz, gt = jax.block_until_ready((logz, gt))

    ref_logz, ref_gt = reference_forward(sentence, tags, raw, start_id, stop_id)
    assert np.allclose(float(logz), ref_logz, rtol=1e-3, atol=1e-3), (float(logz), ref_logz)
    assert np.allclose(float(gt), ref_gt, rtol=1e-3, atol=1e-3), (float(gt), ref_gt)

    print("KERNEL_OK")
</pallas_src>

<mosaic_0001>
module attributes {stable_mosaic.version = 11 : i64} {
  func.func @kernel(%arg0: memref<8xi32, #tpu.memory_space<smem>>, %arg1: memref<6x6xf32, #tpu.memory_space<smem>>, %arg2: memref<8x16xf32, #tpu.memory_space<vmem>>, %arg3: memref<16x64xf32, #tpu.memory_space<vmem>>, %arg4: memref<16x64xf32, #tpu.memory_space<vmem>>, %arg5: memref<1x64xf32, #tpu.memory_space<vmem>>, %arg6: memref<16x64xf32, #tpu.memory_space<vmem>>, %arg7: memref<16x64xf32, #tpu.memory_space<vmem>>, %arg8: memref<1x64xf32, #tpu.memory_space<vmem>>, %arg9: memref<2x1x16xf32, #tpu.memory_space<vmem>>, %arg10: memref<2x1x16xf32, #tpu.memory_space<vmem>>, %arg11: memref<16x6xf32, #tpu.memory_space<vmem>>, %arg12: memref<16x6xf32, #tpu.memory_space<vmem>>, %arg13: memref<1x6xf32, #tpu.memory_space<vmem>>, %arg14: memref<6x6xf32, #tpu.memory_space<vmem>>, %arg15: memref<1x1xf32, #tpu.memory_space<vmem>>, %arg16: memref<1x1xf32, #tpu.memory_space<vmem>>, %arg17: memref<8x16xf32, #tpu.memory_space<vmem>>, %arg18: memref<8x16xf32, #tpu.memory_space<vmem>>) attributes {dimension_semantics = [], scalar_prefetch = 0 : i64, scratch_operands = 2 : i64, tpu.core_type = #tpu.core_type<tc>} {
    %c0 = arith.constant 0 : index
    %c0_0 = arith.constant 0 : index
    %0 = vector.load %arg2[%c0, %c0_0] : memref<8x16xf32, #tpu.memory_space<vmem>>, vector<8x16xf32>
    %c0_1 = arith.constant 0 : index
    %c0_2 = arith.constant 0 : index
    %1 = vector.load %arg3[%c0_1, %c0_2] : memref<16x64xf32, #tpu.memory_space<vmem>>, vector<16x64xf32>
    %cst = arith.constant dense<0.000000e+00> : vector<8x64xf32>
    %2 = tpu.matmul %0, %1, %cst {dimension_numbers = #tpu.dot_dimension_numbers<[1], [0], [0], [1], [0, 0, 1, 1], [], []>} : vector<8x16xf32>, vector<16x64xf32>, vector<8x64xf32> -> vector<8x64xf32>
    %c0_3 = arith.constant 0 : index
    %c0_4 = arith.constant 0 : index
    %3 = vector.load %arg5[%c0_3, %c0_4] : memref<1x64xf32, #tpu.memory_space<vmem>>, vector<1x64xf32>
    %4 = vector.broadcast %3 : vector<1x64xf32> to vector<8x64xf32>
    %5 = arith.addf %2, %4 : vector<8x64xf32>
    %c0_5 = arith.constant 0 : index
    %c0_6 = arith.constant 0 : index
    %6 = vector.load %arg6[%c0_5, %c0_6] : memref<16x64xf32, #tpu.memory_space<vmem>>, vector<16x64xf32>
    %cst_7 = arith.constant dense<0.000000e+00> : vector<8x64xf32>
    %7 = tpu.matmul %0, %6, %cst_7 {dimension_numbers = #tpu.dot_dimension_numbers<[1], [0], [0], [1], [0, 0, 1, 1], [], []>} : vector<8x16xf32>, vector<16x64xf32>, vector<8x64xf32> -> vector<8x64xf32>
    %c0_8 = arith.constant 0 : index
    %c0_9 = arith.constant 0 : index
    %8 = vector.load %arg8[%c0_8, %c0_9] : memref<1x64xf32, #tpu.memory_space<vmem>>, vector<1x64xf32>
    %9 = vector.broadcast %8 : vector<1x64xf32> to vector<8x64xf32>
    %10 = arith.addf %7, %9 : vector<8x64xf32>
    %c0_10 = arith.constant 0 : index
    %c0_11 = arith.constant 0 : index
    %11 = vector.load %arg4[%c0_10, %c0_11] : memref<16x64xf32, #tpu.memory_space<vmem>>, vector<16x64xf32>
    %c0_12 = arith.constant 0 : index
    %c0_13 = arith.constant 0 : index
    %12 = vector.load %arg7[%c0_12, %c0_13] : memref<16x64xf32, #tpu.memory_space<vmem>>, vector<16x64xf32>
    %c0_14 = arith.constant 0 : index
    %c0_15 = arith.constant 0 : index
    %c0_16 = arith.constant 0 : index
    %13 = vector.load %arg9[%c0_14, %c0_15, %c0_16] : memref<2x1x16xf32, #tpu.memory_space<vmem>>, vector<1x1x16xf32>
    %14 = vector.shape_cast %13 : vector<1x1x16xf32> to vector<1x16xf32>
    %c0_17 = arith.constant 0 : index
    %c0_18 = arith.constant 0 : index
    %c0_19 = arith.constant 0 : index
    %15 = vector.load %arg10[%c0_17, %c0_18, %c0_19] : memref<2x1x16xf32, #tpu.memory_space<vmem>>, vector<1x1x16xf32>
    %16 = vector.shape_cast %15 : vector<1x1x16xf32> to vector<1x16xf32>
    %c1 = arith.constant 1 : index
    %c0_20 = arith.constant 0 : index
    %c0_21 = arith.constant 0 : index
    %17 = vector.load %arg9[%c1, %c0_20, %c0_21] : memref<2x1x16xf32, #tpu.memory_space<vmem>>, vector<1x1x16xf32>
    %18 = vector.shape_cast %17 : vector<1x1x16xf32> to vector<1x16xf32>
    %c1_22 = arith.constant 1 : index
    %c0_23 = arith.constant 0 : index
    %c0_24 = arith.constant 0 : index
    %19 = vector.load %arg10[%c1_22, %c0_23, %c0_24] : memref<2x1x16xf32, #tpu.memory_space<vmem>>, vector<1x1x16xf32>
    %20 = vector.shape_cast %19 : vector<1x1x16xf32> to vector<1x16xf32>
    %21 = vector.extract_strided_slice %5 {offsets = [0, 0], sizes = [1, 64], strides = [1, 1]} : vector<8x64xf32> to vector<1x64xf32>
    %cst_25 = arith.constant dense<0.000000e+00> : vector<1x64xf32>
    %22 = tpu.matmul %14, %11, %cst_25 {dimension_numbers = #tpu.dot_dimension_numbers<[1], [0], [0], [1], [0, 0, 1, 1], [], []>} : vector<1x16xf32>, vector<16x64xf32>, vector<1x64xf32> -> vector<1x64xf32>
    %23 = arith.addf %21, %22 : vector<1x64xf32>
    %24 = vector.extract_strided_slice %10 {offsets = [7, 0], sizes = [1, 64], strides = [1, 1]} : vector<8x64xf32> to vector<1x64xf32>
    %cst_26 = arith.constant dense<0.000000e+00> : vector<1x64xf32>
    %25 = tpu.matmul %18, %12, %cst_26 {dimension_numbers = #tpu.dot_dimension_numbers<[1], [0], [0], [1], [0, 0, 1, 1], [], []>} : vector<1x16xf32>, vector<16x64xf32>, vector<1x64xf32> -> vector<1x64xf32>
    %26 = arith.addf %24, %25 : vector<1x64xf32>
    %27 = vector.extract_strided_slice %23 {offsets = [0, 0], sizes = [1, 16], strides = [1, 1]} : vector<1x64xf32> to vector<1x16xf32>
    %cst_27 = arith.constant 5.000000e-01 : f32
    %28 = vector.broadcast %cst_27 : f32 to vector<1x16xf32>
    %29 = arith.mulf %28, %27 : vector<1x16xf32>
    %30 = math.tanh %29 : vector<1x16xf32>
    %cst_28 = arith.constant 5.000000e-01 : f32
    %31 = vector.broadcast %cst_28 : f32 to vector<1x16xf32>
    %32 = arith.mulf %31, %30 : vector<1x16xf32>
    %cst_29 = arith.constant 5.000000e-01 : f32
    %33 = vector.broadcast %cst_29 : f32 to vector<1x16xf32>
    %34 = arith.addf %32, %33 : vector<1x16xf32>
    %35 = vector.extract_strided_slice %23 {offsets = [0, 16], sizes = [1, 16], strides = [1, 1]} : vector<1x64xf32> to vector<1x16xf32>
    %cst_30 = arith.constant 5.000000e-01 : f32
    %36 = vector.broadcast %cst_30 : f32 to vector<1x16xf32>
    %37 = arith.mulf %36, %35 : vector<1x16xf32>
    %38 = math.tanh %37 : vector<1x16xf32>
    %cst_31 = arith.constant 5.000000e-01 : f32
    %39 = vector.broadcast %cst_31 : f32 to vector<1x16xf32>
    %40 = arith.mulf %39, %38 : vector<1x16xf32>
    %cst_32 = arith.constant 5.000000e-01 : f32
    %41 = vector.broadcast %cst_32 : f32 to vector<1x16xf32>
    %42 = arith.addf %40, %41 : vector<1x16xf32>
    %43 = vector.extract_strided_slice %23 {offsets = [0, 32], sizes = [1, 16], strides = [1, 1]} : vector<1x64xf32> to vector<1x16xf32>
    %44 = math.tanh %43 : vector<1x16xf32>
    %45 = vector.extract_strided_slice %23 {offsets = [0, 48], sizes = [1, 16], strides = [1, 1]} : vector<1x64xf32> to vector<1x16xf32>
    %cst_33 = arith.constant 5.000000e-01 : f32
    %46 = vector.broadcast %cst_33 : f32 to vector<1x16xf32>
    %47 = arith.mulf %46, %45 : vector<1x16xf32>
    %48 = math.tanh %47 : vector<1x16xf32>
    %cst_34 = arith.constant 5.000000e-01 : f32
    %49 = vector.broadcast %cst_34 : f32 to vector<1x16xf32>
    %50 = arith.mulf %49, %48 : vector<1x16xf32>
    %cst_35 = arith.constant 5.000000e-01 : f32
    %51 = vector.broadcast %cst_35 : f32 to vector<1x16xf32>
    %52 = arith.addf %50, %51 : vector<1x16xf32>
    %53 = arith.mulf %42, %16 : vector<1x16xf32>
    %54 = arith.mulf %34, %44 : vector<1x16xf32>
    %55 = arith.addf %53, %54 : vector<1x16xf32>
    %56 = math.tanh %55 : vector<1x16xf32>
    %57 = arith.mulf %52, %56 : vector<1x16xf32>
    %58 = vector.extract_strided_slice %26 {offsets = [0, 0], sizes = [1, 16], strides = [1, 1]} : vector<1x64xf32> to vector<1x16xf32>
    %cst_36 = arith.constant 5.000000e-01 : f32
    %59 = vector.broadcast %cst_36 : f32 to vector<1x16xf32>
    %60 = arith.mulf %59, %58 : vector<1x16xf32>
    %61 = math.tanh %60 : vector<1x16xf32>
    %cst_37 = arith.constant 5.000000e-01 : f32
    %62 = vector.broadcast %cst_37 : f32 to vector<1x16xf32>
    %63 = arith.mulf %62, %61 : vector<1x16xf32>
    %cst_38 = arith.constant 5.000000e-01 : f32
    %64 = vector.broadcast %cst_38 : f32 to vector<1x16xf32>
    %65 = arith.addf %63, %64 : vector<1x16xf32>
    %66 = vector.extract_strided_slice %26 {offsets = [0, 16], sizes = [1, 16], strides = [1, 1]} : vector<1x64xf32> to vector<1x16xf32>
    %cst_39 = arith.constant 5.000000e-01 : f32
    %67 = vector.broadcast %cst_39 : f32 to vector<1x16xf32>
    %68 = arith.mulf %67, %66 : vector<1x16xf32>
    %69 = math.tanh %68 : vector<1x16xf32>
    %cst_40 = arith.constant 5.000000e-01 : f32
    %70 = vector.broadcast %cst_40 : f32 to vector<1x16xf32>
    %71 = arith.mulf %70, %69 : vector<1x16xf32>
    %cst_41 = arith.constant 5.000000e-01 : f32
    %72 = vector.broadcast %cst_41 : f32 to vector<1x16xf32>
    %73 = arith.addf %71, %72 : vector<1x16xf32>
    %74 = vector.extract_strided_slice %26 {offsets = [0, 32], sizes = [1, 16], strides = [1, 1]} : vector<1x64xf32> to vector<1x16xf32>
    %75 = math.tanh %74 : vector<1x16xf32>
    %76 = vector.extract_strided_slice %26 {offsets = [0, 48], sizes = [1, 16], strides = [1, 1]} : vector<1x64xf32> to vector<1x16xf32>
    %cst_42 = arith.constant 5.000000e-01 : f32
    %77 = vector.broadcast %cst_42 : f32 to vector<1x16xf32>
    %78 = arith.mulf %77, %76 : vector<1x16xf32>
    %79 = math.tanh %78 : vector<1x16xf32>
    %cst_43 = arith.constant 5.000000e-01 : f32
    %80 = vector.broadcast %cst_43 : f32 to vector<1x16xf32>
    %81 = arith.mulf %80, %79 : vector<1x16xf32>
    %cst_44 = arith.constant 5.000000e-01 : f32
    %82 = vector.broadcast %cst_44 : f32 to vector<1x16xf32>
    %83 = arith.addf %81, %82 : vector<1x16xf32>
    %84 = arith.mulf %73, %20 : vector<1x16xf32>
    %85 = arith.mulf %65, %75 : vector<1x16xf32>
    %86 = arith.addf %84, %85 : vector<1x16xf32>
    %87 = math.tanh %86 : vector<1x16xf32>
    %88 = arith.mulf %83, %87 : vector<1x16xf32>
    %c0_45 = arith.constant 0 : index
    %c0_46 = arith.constant 0 : index
    %89 = vector.load %arg17[%c0_45, %c0_46] : memref<8x16xf32, #tpu.memory_space<vmem>>, vector<1x16xf32>
    tpu.vector_store %arg17[%c0_45, %c0_46], %57 {strides = array<i32>} : memref<8x16xf32, #tpu.memory_space<vmem>>, vector<1x16xf32>,
    %c7 = arith.constant 7 : index
    %c0_47 = arith.constant 0 : index
    %90 = vector.load %arg18[%c7, %c0_47] : memref<8x16xf32, #tpu.memory_space<vmem>>, vector<1x16xf32>
    tpu.vector_store %arg18[%c7, %c0_47], %88 {strides = array<i32>} : memref<8x16xf32, #tpu.memory_space<vmem>>, vector<1x16xf32>,
    %91 = vector.extract_strided_slice %5 {offsets = [1, 0], sizes = [1, 64], strides = [1, 1]} : vector<8x64xf32> to vector<1x64xf32>
    %cst_48 = arith.constant dense<0.000000e+00> : vector<1x64xf32>
    %92 = tpu.matmul %57, %11, %cst_48 {dimension_numbers = #tpu.dot_dimension_numbers<[1], [0], [0], [1], [0, 0, 1, 1], [], []>} : vector<1x16xf32>, vector<16x64xf32>, vector<1x64xf32> -> vector<1x64xf32>
    %93 = arith.addf %91, %92 : vector<1x64xf32>
    %94 = vector.extract_strided_slice %10 {offsets = [6, 0], sizes = [1, 64], strides = [1, 1]} : vector<8x64xf32> to vector<1x64xf32>
    %cst_49 = arith.constant dense<0.000000e+00> : vector<1x64xf32>
    %95 = tpu.matmul %88, %12, %cst_49 {dimension_numbers = #tpu.dot_dimension_numbers<[1], [0], [0], [1], [0, 0, 1, 1], [], []>} : vector<1x16xf32>, vector<16x64xf32>, vector<1x64xf32> -> vector<1x64xf32>
    %96 = arith.addf %94, %95 : vector<1x64xf32>
    %97 = vector.extract_strided_slice %93 {offsets = [0, 0], sizes = [1, 16], strides = [1, 1]} : vector<1x64xf32> to vector<1x16xf32>
    %cst_50 = arith.constant 5.000000e-01 : f32
    %98 = vector.broadcast %cst_50 : f32 to vector<1x16xf32>
    %99 = arith.mulf %98, %97 : vector<1x16xf32>
    %100 = math.tanh %99 : vector<1x16xf32>
    %cst_51 = arith.constant 5.000000e-01 : f32
    %101 = vector.broadcast %cst_51 : f32 to vector<1x16xf32>
    %102 = arith.mulf %101, %100 : vector<1x16xf32>
    %cst_52 = arith.constant 5.000000e-01 : f32
    %103 = vector.broadcast %cst_52 : f32 to vector<1x16xf32>
    %104 = arith.addf %102, %103 : vector<1x16xf32>
    %105 = vector.extract_strided_slice %93 {offsets = [0, 16], sizes = [1, 16], strides = [1, 1]} : vector<1x64xf32> to vector<1x16xf32>
    %cst_53 = arith.constant 5.000000e-01 : f32
    %106 = vector.broadcast %cst_53 : f32 to vector<1x16xf32>
    %107 = arith.mulf %106, %105 : vector<1x16xf32>
    %108 = math.tanh %107 : vector<1x16xf32>
    %cst_54 = arith.constant 5.000000e-01 : f32
    %109 = vector.broadcast %cst_54 : f32 to vector<1x16xf32>
    %110 = arith.mulf %109, %108 : vector<1x16xf32>
    %cst_55 = arith.constant 5.000000e-01 : f32
    %111 = vector.broadcast %cst_55 : f32 to vector<1x16xf32>
    %112 = arith.addf %110, %111 : vector<1x16xf32>
    %113 = vector.extract_strided_slice %93 {offsets = [0, 32], sizes = [1, 16], strides = [1, 1]} : vector<1x64xf32> to vector<1x16xf32>
    %114 = math.tanh %113 : vector<1x16xf32>
    %115 = vector.extract_strided_slice %93 {offsets = [0, 48], sizes = [1, 16], strides = [1, 1]} : vector<1x64xf32> to vector<1x16xf32>
    %cst_56 = arith.constant 5.000000e-01 : f32
    %116 = vector.broadcast %cst_56 : f32 to vector<1x16xf32>
    %117 = arith.mulf %116, %115 : vector<1x16xf32>
    %118 = math.tanh %117 : vector<1x16xf32>
    %cst_57 = arith.constant 5.000000e-01 : f32
    %119 = vector.broadcast %cst_57 : f32 to vector<1x16xf32>
    %120 = arith.mulf %119, %118 : vector<1x16xf32>
    %cst_58 = arith.constant 5.000000e-01 : f32
    %121 = vector.broadcast %cst_58 : f32 to vector<1x16xf32>
    %122 = arith.addf %120, %121 : vector<1x16xf32>
    %123 = arith.mulf %112, %55 : vector<1x16xf32>
    %124 = arith.mulf %104, %114 : vector<1x16xf32>
    %125 = arith.addf %123, %124 : vector<1x16xf32>
    %126 = math.tanh %125 : vector<1x16xf32>
    %127 = arith.mulf %122, %126 : vector<1x16xf32>
    %128 = vector.extract_strided_slice %96 {offsets = [0, 0], sizes = [1, 16], strides = [1, 1]} : vector<1x64xf32> to vector<1x16xf32>
    %cst_59 = arith.constant 5.000000e-01 : f32
    %129 = vector.broadcast %cst_59 : f32 to vector<1x16xf32>
    %130 = arith.mulf %129, %128 : vector<1x16xf32>
    %131 = math.tanh %130 : vector<1x16xf32>
    %cst_60 = arith.constant 5.000000e-01 : f32
    %132 = vector.broadcast %cst_60 : f32 to vector<1x16xf32>
    %133 = arith.mulf %132, %131 : vector<1x16xf32>
    %cst_61 = arith.constant 5.000000e-01 : f32
    %134 = vector.broadcast %cst_61 : f32 to vector<1x16xf32>
    %135 = arith.addf %133, %134 : vector<1x16xf32>
    %136 = vector.extract_strided_slice %96 {offsets = [0, 16], sizes = [1, 16], strides = [1, 1]} : vector<1x64xf32> to vector<1x16xf32>
    %cst_62 = arith.constant 5.000000e-01 : f32
    %137 = vector.broadcast %cst_62 : f32 to vector<1x16xf32>
    %138 = arith.mulf %137, %136 : vector<1x16xf32>
    %139 = math.tanh %138 : vector<1x16xf32>
    %cst_63 = arith.constant 5.000000e-01 : f32
    %140 = vector.broadcast %cst_63 : f32 to vector<1x16xf32>
    %141 = arith.mulf %140, %139 : vector<1x16xf32>
    %cst_64 = arith.constant 5.000000e-01 : f32
    %142 = vector.broadcast %cst_64 : f32 to vector<1x16xf32>
    %143 = arith.addf %141, %142 : vector<1x16xf32>
    %144 = vector.extract_strided_slice %96 {offsets = [0, 32], sizes = [1, 16], strides = [1, 1]} : vector<1x64xf32> to vector<1x16xf32>
    %145 = math.tanh %144 : vector<1x16xf32>
    %146 = vector.extract_strided_slice %96 {offsets = [0, 48], sizes = [1, 16], strides = [1, 1]} : vector<1x64xf32> to vector<1x16xf32>
    %cst_65 = arith.constant 5.000000e-01 : f32
    %147 = vector.broadcast %cst_65 : f32 to vector<1x16xf32>
    %148 = arith.mulf %147, %146 : vector<1x16xf32>
    %149 = math.tanh %148 : vector<1x16xf32>
    %cst_66 = arith.constant 5.000000e-01 : f32
    %150 = vector.broadcast %cst_66 : f32 to vector<1x16xf32>
    %151 = arith.mulf %150, %149 : vector<1x16xf32>
    %cst_67 = arith.constant 5.000000e-01 : f32
    %152 = vector.broadcast %cst_67 : f32 to vector<1x16xf32>
    %153 = arith.addf %151, %152 : vector<1x16xf32>
    %154 = arith.mulf %143, %86 : vector<1x16xf32>
    %155 = arith.mulf %135, %145 : vector<1x16xf32>
    %156 = arith.addf %154, %155 : vector<1x16xf32>
    %157 = math.tanh %156 : vector<1x16xf32>
    %158 = arith.mulf %153, %157 : vector<1x16xf32>
    %c1_68 = arith.constant 1 : index
    %c0_69 = arith.constant 0 : index
    %159 = vector.load %arg17[%c1_68, %c0_69] : memref<8x16xf32, #tpu.memory_space<vmem>>, vector<1x16xf32>
    tpu.vector_store %arg17[%c1_68, %c0_69], %127 {strides = array<i32>} : memref<8x16xf32, #tpu.memory_space<vmem>>, vector<1x16xf32>,
    %c6 = arith.constant 6 : index
    %c0_70 = arith.constant 0 : index
    %160 = vector.load %arg18[%c6, %c0_70] : memref<8x16xf32, #tpu.memory_space<vmem>>, vector<1x16xf32>
    tpu.vector_store %arg18[%c6, %c0_70], %158 {strides = array<i32>} : memref<8x16xf32, #tpu.memory_space<vmem>>, vector<1x16xf32>,
    %161 = vector.extract_strided_slice %5 {offsets = [2, 0], sizes = [1, 64], strides = [1, 1]} : vector<8x64xf32> to vector<1x64xf32>
    %cst_71 = arith.constant dense<0.000000e+00> : vector<1x64xf32>
    %162 = tpu.matmul %127, %11, %cst_71 {dimension_numbers = #tpu.dot_dimension_numbers<[1], [0], [0], [1], [0, 0, 1, 1], [], []>} : vector<1x16xf32>, vector<16x64xf32>, vector<1x64xf32> -> vector<1x64xf32>
    %163 = arith.addf %161, %162 : vector<1x64xf32>
    %164 = vector.extract_strided_slice %10 {offsets = [5, 0], sizes = [1, 64], strides = [1, 1]} : vector<8x64xf32> to vector<1x64xf32>
    %cst_72 = arith.constant dense<0.000000e+00> : vector<1x64xf32>
    %165 = tpu.matmul %158, %12, %cst_72 {dimension_numbers = #tpu.dot_dimension_numbers<[1], [0], [0], [1], [0, 0, 1, 1], [], []>} : vector<1x16xf32>, vector<16x64xf32>, vector<1x64xf32> -> vector<1x64xf32>
    %166 = arith.addf %164, %165 : vector<1x64xf32>
    %167 = vector.extract_strided_slice %163 {offsets = [0, 0], sizes = [1, 16], strides = [1, 1]} : vector<1x64xf32> to vector<1x16xf32>
    %cst_73 = arith.constant 5.000000e-01 : f32
    %168 = vector.broadcast %cst_73 : f32 to vector<1x16xf32>
    %169 = arith.mulf %168, %167 : vector<1x16xf32>
    %170 = math.tanh %169 : vector<1x16xf32>
    %cst_74 = arith.constant 5.000000e-01 : f32
    %171 = vector.broadcast %cst_74 : f32 to vector<1x16xf32>
    %172 = arith.mulf %171, %170 : vector<1x16xf32>
    %cst_75 = arith.constant 5.000000e-01 : f32
    %173 = vector.broadcast %cst_75 : f32 to vector<1x16xf32>
    %174 = arith.addf %172, %173 : vector<1x16xf32>
    %175 = vector.extract_strided_slice %163 {offsets = [0, 16], sizes = [1, 16], strides = [1, 1]} : vector<1x64xf32> to vector<1x16xf32>
    %cst_76 = arith.constant 5.000000e-01 : f32
    %176 = vector.broadcast %cst_76 : f32 to vector<1x16xf32>
    %177 = arith.mulf %176, %175 : vector<1x16xf32>
    %178 = math.tanh %177 : vector<1x16xf32>
    %cst_77 = arith.constant 5.000000e-01 : f32
    %179 = vector.broadcast %cst_77 : f32 to vector<1x16xf32>
    %180 = arith.mulf %179, %178 : vector<1x16xf32>
    %cst_78 = arith.constant 5.000000e-01 : f32
    %181 = vector.broadcast %cst_78 : f32 to vector<1x16xf32>
    %182 = arith.addf %180, %181 : vector<1x16xf32>
    %183 = vector.extract_strided_slice %163 {offsets = [0, 32], sizes = [1, 16], strides = [1, 1]} : vector<1x64xf32> to vector<1x16xf32>
    %184 = math.tanh %183 : vector<1x16xf32>
    %185 = vector.extract_strided_slice %163 {offsets = [0, 48], sizes = [1, 16], strides = [1, 1]} : vector<1x64xf32> to vector<1x16xf32>
    %cst_79 = arith.constant 5.000000e-01 : f32
    %186 = vector.broadcast %cst_79 : f32 to vector<1x16xf32>
    %187 = arith.mulf %186, %185 : vector<1x16xf32>
    %188 = math.tanh %187 : vector<1x16xf32>
    %cst_80 = arith.constant 5.000000e-01 : f32
    %189 = vector.broadcast %cst_80 : f32 to vector<1x16xf32>
    %190 = arith.mulf %189, %188 : vector<1x16xf32>
    %cst_81 = arith.constant 5.000000e-01 : f32
    %191 = vector.broadcast %cst_81 : f32 to vector<1x16xf32>
    %192 = arith.addf %190, %191 : vector<1x16xf32>
    %193 = arith.mulf %182, %125 : vector<1x16xf32>
    %194 = arith.mulf %174, %184 : vector<1x16xf32>
    %195 = arith.addf %193, %194 : vector<1x16xf32>
    %196 = math.tanh %195 : vector<1x16xf32>
    %197 = arith.mulf %192, %196 : vector<1x16xf32>
    %198 = vector.extract_strided_slice %166 {offsets = [0, 0], sizes = [1, 16], strides = [1, 1]} : vector<1x64xf32> to vector<1x16xf32>
    %cst_82 = arith.constant 5.000000e-01 : f32
    %199 = vector.broadcast %cst_82 : f32 to vector<1x16xf32>
    %200 = arith.mulf %199, %198 : vector<1x16xf32>
    %201 = math.tanh %200 : vector<1x16xf32>
    %cst_83 = arith.constant 5.000000e-01 : f32
    %202 = vector.broadcast %cst_83 : f32 to vector<1x16xf32>
    %203 = arith.mulf %202, %201 : vector<1x16xf32>
    %cst_84 = arith.constant 5.000000e-01 : f32
    %204 = vector.broadcast %cst_84 : f32 to vector<1x16xf32>
    %205 = arith.addf %203, %204 : vector<1x16xf32>
    %206 = vector.extract_strided_slice %166 {offsets = [0, 16], sizes = [1, 16], strides = [1, 1]} : vector<1x64xf32> to vector<1x16xf32>
    %cst_85 = arith.constant 5.000000e-01 : f32
    %207 = vector.broadcast %cst_85 : f32 to vector<1x16xf32>
    %208 = arith.mulf %207, %206 : vector<1x16xf32>
    %209 = math.tanh %208 : vector<1x16xf32>
    %cst_86 = arith.constant 5.000000e-01 : f32
    %210 = vector.broadcast %cst_86 : f32 to vector<1x16xf32>
    %211 = arith.mulf %210, %209 : vector<1x16xf32>
    %cst_87 = arith.constant 5.000000e-01 : f32
    %212 = vector.broadcast %cst_87 : f32 to vector<1x16xf32>
    %213 = arith.addf %211, %212 : vector<1x16xf32>
    %214 = vector.extract_strided_slice %166 {offsets = [0, 32], sizes = [1, 16], strides = [1, 1]} : vector<1x64xf32> to vector<1x16xf32>
    %215 = math.tanh %214 : vector<1x16xf32>
    %216 = vector.extract_strided_slice %166 {offsets = [0, 48], sizes = [1, 16], strides = [1, 1]} : vector<1x64xf32> to vector<1x16xf32>
    %cst_88 = arith.constant 5.000000e-01 : f32
    %217 = vector.broadcast %cst_88 : f32 to vector<1x16xf32>
    %218 = arith.mulf %217, %216 : vector<1x16xf32>
    %219 = math.tanh %218 : vector<1x16xf32>
    %cst_89 = arith.constant 5.000000e-01 : f32
    %220 = vector.broadcast %cst_89 : f32 to vector<1x16xf32>
    %221 = arith.mulf %220, %219 : vector<1x16xf32>
    %cst_90 = arith.constant 5.000000e-01 : f32
    %222 = vector.broadcast %cst_90 : f32 to vector<1x16xf32>
    %223 = arith.addf %221, %222 : vector<1x16xf32>
    %224 = arith.mulf %213, %156 : vector<1x16xf32>
    %225 = arith.mulf %205, %215 : vector<1x16xf32>
    %226 = arith.addf %224, %225 : vector<1x16xf32>
    %227 = math.tanh %226 : vector<1x16xf32>
    %228 = arith.mulf %223, %227 : vector<1x16xf32>
    %c2 = arith.constant 2 : index
    %c0_91 = arith.constant 0 : index
    %229 = vector.load %arg17[%c2, %c0_91] : memref<8x16xf32, #tpu.memory_space<vmem>>, vector<1x16xf32>
    tpu.vector_store %arg17[%c2, %c0_91], %197 {strides = array<i32>} : memref<8x16xf32, #tpu.memory_space<vmem>>, vector<1x16xf32>,
    %c5 = arith.constant 5 : index
    %c0_92 = arith.constant 0 : index
    %230 = vector.load %arg18[%c5, %c0_92] : memref<8x16xf32, #tpu.memory_space<vmem>>, vector<1x16xf32>
    tpu.vector_store %arg18[%c5, %c0_92], %228 {strides = array<i32>} : memref<8x16xf32, #tpu.memory_space<vmem>>, vector<1x16xf32>,
    %231 = vector.extract_strided_slice %5 {offsets = [3, 0], sizes = [1, 64], strides = [1, 1]} : vector<8x64xf32> to vector<1x64xf32>
    %cst_93 = arith.constant dense<0.000000e+00> : vector<1x64xf32>
    %232 = tpu.matmul %197, %11, %cst_93 {dimension_numbers = #tpu.dot_dimension_numbers<[1], [0], [0], [1], [0, 0, 1, 1], [], []>} : vector<1x16xf32>, vector<16x64xf32>, vector<1x64xf32> -> vector<1x64xf32>
    %233 = arith.addf %231, %232 : vector<1x64xf32>
    %234 = vector.extract_strided_slice %10 {offsets = [4, 0], sizes = [1, 64], strides = [1, 1]} : vector<8x64xf32> to vector<1x64xf32>
    %cst_94 = arith.constant dense<0.000000e+00> : vector<1x64xf32>
    %235 = tpu.matmul %228, %12, %cst_94 {dimension_numbers = #tpu.dot_dimension_numbers<[1], [0], [0], [1], [0, 0, 1, 1], [], []>} : vector<1x16xf32>, vector<16x64xf32>, vector<1x64xf32> -> vector<1x64xf32>
    %236 = arith.addf %234, %235 : vector<1x64xf32>
    %237 = vector.extract_strided_slice %233 {offsets = [0, 0], sizes = [1, 16], strides = [1, 1]} : vector<1x64xf32> to vector<1x16xf32>
    %cst_95 = arith.constant 5.000000e-01 : f32
    %238 = vector.broadcast %cst_95 : f32 to vector<1x16xf32>
    %239 = arith.mulf %238, %237 : vector<1x16xf32>
    %240 = math.tanh %239 : vector<1x16xf32>
    %cst_96 = arith.constant 5.000000e-01 : f32
    %241 = vector.broadcast %cst_96 : f32 to vector<1x16xf32>
    %242 = arith.mulf %241, %240 : vector<1x16xf32>
    %cst_97 = arith.constant 5.000000e-01 : f32
    %243 = vector.broadcast %cst_97 : f32 to vector<1x16xf32>
    %244 = arith.addf %242, %243 : vector<1x16xf32>
    %245 = vector.extract_strided_slice %233 {offsets = [0, 16], sizes = [1, 16], strides = [1, 1]} : vector<1x64xf32> to vector<1x16xf32>
    %cst_98 = arith.constant 5.000000e-01 : f32
    %246 = vector.broadcast %cst_98 : f32 to vector<1x16xf32>
    %247 = arith.mulf %246, %245 : vector<1x16xf32>
    %248 = math.tanh %247 : vector<1x16xf32>
    %cst_99 = arith.constant 5.000000e-01 : f32
    %249 = vector.broadcast %cst_99 : f32 to vector<1x16xf32>
    %250 = arith.mulf %249, %248 : vector<1x16xf32>
    %cst_100 = arith.constant 5.000000e-01 : f32
    %251 = vector.broadcast %cst_100 : f32 to vector<1x16xf32>
    %252 = arith.addf %250, %251 : vector<1x16xf32>
    %253 = vector.extract_strided_slice %233 {offsets = [0, 32], sizes = [1, 16], strides = [1, 1]} : vector<1x64xf32> to vector<1x16xf32>
    %254 = math.tanh %253 : vector<1x16xf32>
    %255 = vector.extract_strided_slice %233 {offsets = [0, 48], sizes = [1, 16], strides = [1, 1]} : vector<1x64xf32> to vector<1x16xf32>
    %cst_101 = arith.constant 5.000000e-01 : f32
    %256 = vector.broadcast %cst_101 : f32 to vector<1x16xf32>
    %257 = arith.mulf %256, %255 : vector<1x16xf32>
    %258 = math.tanh %257 : vector<1x16xf32>
    %cst_102 = arith.constant 5.000000e-01 : f32
    %259 = vector.broadcast %cst_102 : f32 to vector<1x16xf32>
    %260 = arith.mulf %259, %258 : vector<1x16xf32>
    %cst_103 = arith.constant 5.000000e-01 : f32
    %261 = vector.broadcast %cst_103 : f32 to vector<1x16xf32>
    %262 = arith.addf %260, %261 : vector<1x16xf32>
    %263 = arith.mulf %252, %195 : vector<1x16xf32>
    %264 = arith.mulf %244, %254 : vector<1x16xf32>
    %265 = arith.addf %263, %264 : vector<1x16xf32>
    %266 = math.tanh %265 : vector<1x16xf32>
    %267 = arith.mulf %262, %266 : vector<1x16xf32>
    %268 = vector.extract_strided_slice %236 {offsets = [0, 0], sizes = [1, 16], strides = [1, 1]} : vector<1x64xf32> to vector<1x16xf32>
    %cst_104 = arith.constant 5.000000e-01 : f32
    %269 = vector.broadcast %cst_104 : f32 to vector<1x16xf32>
    %270 = arith.mulf %269, %268 : vector<1x16xf32>
    %271 = math.tanh %270 : vector<1x16xf32>
    %cst_105 = arith.constant 5.000000e-01 : f32
    %272 = vector.broadcast %cst_105 : f32 to vector<1x16xf32>
    %273 = arith.mulf %272, %271 : vector<1x16xf32>
    %cst_106 = arith.constant 5.000000e-01 : f32
    %274 = vector.broadcast %cst_106 : f32 to vector<1x16xf32>
    %275 = arith.addf %273, %274 : vector<1x16xf32>
    %276 = vector.extract_strided_slice %236 {offsets = [0, 16], sizes = [1, 16], strides = [1, 1]} : vector<1x64xf32> to vector<1x16xf32>
    %cst_107 = arith.constant 5.000000e-01 : f32
    %277 = vector.broadcast %cst_107 : f32 to vector<1x16xf32>
    %278 = arith.mulf %277, %276 : vector<1x16xf32>
    %279 = math.tanh %278 : vector<1x16xf32>
    %cst_108 = arith.constant 5.000000e-01 : f32
    %280 = vector.broadcast %cst_108 : f32 to vector<1x16xf32>
    %281 = arith.mulf %280, %279 : vector<1x16xf32>
    %cst_109 = arith.constant 5.000000e-01 : f32
    %282 = vector.broadcast %cst_109 : f32 to vector<1x16xf32>
    %283 = arith.addf %281, %282 : vector<1x16xf32>
    %284 = vector.extract_strided_slice %236 {offsets = [0, 32], sizes = [1, 16], strides = [1, 1]} : vector<1x64xf32> to vector<1x16xf32>
    %285 = math.tanh %284 : vector<1x16xf32>
    %286 = vector.extract_strided_slice %236 {offsets = [0, 48], sizes = [1, 16], strides = [1, 1]} : vector<1x64xf32> to vector<1x16xf32>
    %cst_110 = arith.constant 5.000000e-01 : f32
    %287 = vector.broadcast %cst_110 : f32 to vector<1x16xf32>
    %288 = arith.mulf %287, %286 : vector<1x16xf32>
    %289 = math.tanh %288 : vector<1x16xf32>
    %cst_111 = arith.constant 5.000000e-01 : f32
    %290 = vector.broadcast %cst_111 : f32 to vector<1x16xf32>
    %291 = arith.mulf %290, %289 : vector<1x16xf32>
    %cst_112 = arith.constant 5.000000e-01 : f32
    %292 = vector.broadcast %cst_112 : f32 to vector<1x16xf32>
    %293 = arith.addf %291, %292 : vector<1x16xf32>
    %294 = arith.mulf %283, %226 : vector<1x16xf32>
    %295 = arith.mulf %275, %285 : vector<1x16xf32>
    %296 = arith.addf %294, %295 : vector<1x16xf32>
    %297 = math.tanh %296 : vector<1x16xf32>
    %298 = arith.mulf %293, %297 : vector<1x16xf32>
    %c3 = arith.constant 3 : index
    %c0_113 = arith.constant 0 : index
    %299 = vector.load %arg17[%c3, %c0_113] : memref<8x16xf32, #tpu.memory_space<vmem>>, vector<1x16xf32>
    tpu.vector_store %arg17[%c3, %c0_113], %267 {strides = array<i32>} : memref<8x16xf32, #tpu.memory_space<vmem>>, vector<1x16xf32>,
    %c4 = arith.constant 4 : index
    %c0_114 = arith.constant 0 : index
    %300 = vector.load %arg18[%c4, %c0_114] : memref<8x16xf32, #tpu.memory_space<vmem>>, vector<1x16xf32>
    tpu.vector_store %arg18[%c4, %c0_114], %298 {strides = array<i32>} : memref<8x16xf32, #tpu.memory_space<vmem>>, vector<1x16xf32>,
    %301 = vector.extract_strided_slice %5 {offsets = [4, 0], sizes = [1, 64], strides = [1, 1]} : vector<8x64xf32> to vector<1x64xf32>
    %cst_115 = arith.constant dense<0.000000e+00> : vector<1x64xf32>
    %302 = tpu.matmul %267, %11, %cst_115 {dimension_numbers = #tpu.dot_dimension_numbers<[1], [0], [0], [1], [0, 0, 1, 1], [], []>} : vector<1x16xf32>, vector<16x64xf32>, vector<1x64xf32> -> vector<1x64xf32>
    %303 = arith.addf %301, %302 : vector<1x64xf32>
    %304 = vector.extract_strided_slice %10 {offsets = [3, 0], sizes = [1, 64], strides = [1, 1]} : vector<8x64xf32> to vector<1x64xf32>
    %cst_116 = arith.constant dense<0.000000e+00> : vector<1x64xf32>
    %305 = tpu.matmul %298, %12, %cst_116 {dimension_numbers = #tpu.dot_dimension_numbers<[1], [0], [0], [1], [0, 0, 1, 1], [], []>} : vector<1x16xf32>, vector<16x64xf32>, vector<1x64xf32> -> vector<1x64xf32>
    %306 = arith.addf %304, %305 : vector<1x64xf32>
    %307 = vector.extract_strided_slice %303 {offsets = [0, 0], sizes = [1, 16], strides = [1, 1]} : vector<1x64xf32> to vector<1x16xf32>
    %cst_117 = arith.constant 5.000000e-01 : f32
    %308 = vector.broadcast %cst_117 : f32 to vector<1x16xf32>
    %309 = arith.mulf %308, %307 : vector<1x16xf32>
    %310 = math.tanh %309 : vector<1x16xf32>
    %cst_118 = arith.constant 5.000000e-01 : f32
    %311 = vector.broadcast %cst_118 : f32 to vector<1x16xf32>
    %312 = arith.mulf %311, %310 : vector<1x16xf32>
    %cst_119 = arith.constant 5.000000e-01 : f32
    %313 = vector.broadcast %cst_119 : f32 to vector<1x16xf32>
    %314 = arith.addf %312, %313 : vector<1x16xf32>
    %315 = vector.extract_strided_slice %303 {offsets = [0, 16], sizes = [1, 16], strides = [1, 1]} : vector<1x64xf32> to vector<1x16xf32>
    %cst_120 = arith.constant 5.000000e-01 : f32
    %316 = vector.broadcast %cst_120 : f32 to vector<1x16xf32>
    %317 = arith.mulf %316, %315 : vector<1x16xf32>
    %318 = math.tanh %317 : vector<1x16xf32>
    %cst_121 = arith.constant 5.000000e-01 : f32
    %319 = vector.broadcast %cst_121 : f32 to vector<1x16xf32>
    %320 = arith.mulf %319, %318 : vector<1x16xf32>
    %cst_122 = arith.constant 5.000000e-01 : f32
    %321 = vector.broadcast %cst_122 : f32 to vector<1x16xf32>
    %322 = arith.addf %320, %321 : vector<1x16xf32>
    %323 = vector.extract_strided_slice %303 {offsets = [0, 32], sizes = [1, 16], strides = [1, 1]} : vector<1x64xf32> to vector<1x16xf32>
    %324 = math.tanh %323 : vector<1x16xf32>
    %325 = vector.extract_strided_slice %303 {offsets = [0, 48], sizes = [1, 16], strides = [1, 1]} : vector<1x64xf32> to vector<1x16xf32>
    %cst_123 = arith.constant 5.000000e-01 : f32
    %326 = vector.broadcast %cst_123 : f32 to vector<1x16xf32>
    %327 = arith.mulf %326, %325 : vector<1x16xf32>
    %328 = math.tanh %327 : vector<1x16xf32>
    %cst_124 = arith.constant 5.000000e-01 : f32
    %329 = vector.broadcast %cst_124 : f32 to vector<1x16xf32>
    %330 = arith.mulf %329, %328 : vector<1x16xf32>
    %cst_125 = arith.constant 5.000000e-01 : f32
    %331 = vector.broadcast %cst_125 : f32 to vector<1x16xf32>
    %332 = arith.addf %330, %331 : vector<1x16xf32>
    %333 = arith.mulf %322, %265 : vector<1x16xf32>
    %334 = arith.mulf %314, %324 : vector<1x16xf32>
    %335 = arith.addf %333, %334 : vector<1x16xf32>
    %336 = math.tanh %335 : vector<1x16xf32>
    %337 = arith.mulf %332, %336 : vector<1x16xf32>
    %338 = vector.extract_strided_slice %306 {offsets = [0, 0], sizes = [1, 16], strides = [1, 1]} : vector<1x64xf32> to vector<1x16xf32>
    %cst_126 = arith.constant 5.000000e-01 : f32
    %339 = vector.broadcast %cst_126 : f32 to vector<1x16xf32>
    %340 = arith.mulf %339, %338 : vector<1x16xf32>
    %341 = math.tanh %340 : vector<1x16xf32>
    %cst_127 = arith.constant 5.000000e-01 : f32
    %342 = vector.broadcast %cst_127 : f32 to vector<1x16xf32>
    %343 = arith.mulf %342, %341 : vector<1x16xf32>
    %cst_128 = arith.constant 5.000000e-01 : f32
    %344 = vector.broadcast %cst_128 : f32 to vector<1x16xf32>
    %345 = arith.addf %343, %344 : vector<1x16xf32>
    %346 = vector.extract_strided_slice %306 {offsets = [0, 16], sizes = [1, 16], strides = [1, 1]} : vector<1x64xf32> to vector<1x16xf32>
    %cst_129 = arith.constant 5.000000e-01 : f32
    %347 = vector.broadcast %cst_129 : f32 to vector<1x16xf32>
    %348 = arith.mulf %347, %346 : vector<1x16xf32>
    %349 = math.tanh %348 : vector<1x16xf32>
    %cst_130 = arith.constant 5.000000e-01 : f32
    %350 = vector.broadcast %cst_130 : f32 to vector<1x16xf32>
    %351 = arith.mulf %350, %349 : vector<1x16xf32>
    %cst_131 = arith.constant 5.000000e-01 : f32
    %352 = vector.broadcast %cst_131 : f32 to vector<1x16xf32>
    %353 = arith.addf %351, %352 : vector<1x16xf32>
    %354 = vector.extract_strided_slice %306 {offsets = [0, 32], sizes = [1, 16], strides = [1, 1]} : vector<1x64xf32> to vector<1x16xf32>
    %355 = math.tanh %354 : vector<1x16xf32>
    %356 = vector.extract_strided_slice %306 {offsets = [0, 48], sizes = [1, 16], strides = [1, 1]} : vector<1x64xf32> to vector<1x16xf32>
    %cst_132 = arith.constant 5.000000e-01 : f32
    %357 = vector.broadcast %cst_132 : f32 to vector<1x16xf32>
    %358 = arith.mulf %357, %356 : vector<1x16xf32>
    %359 = math.tanh %358 : vector<1x16xf32>
    %cst_133 = arith.constant 5.000000e-01 : f32
    %360 = vector.broadcast %cst_133 : f32 to vector<1x16xf32>
    %361 = arith.mulf %360, %359 : vector<1x16xf32>
    %cst_134 = arith.constant 5.000000e-01 : f32
    %362 = vector.broadcast %cst_134 : f32 to vector<1x16xf32>
    %363 = arith.addf %361, %362 : vector<1x16xf32>
    %364 = arith.mulf %353, %296 : vector<1x16xf32>
    %365 = arith.mulf %345, %355 : vector<1x16xf32>
    %366 = arith.addf %364, %365 : vector<1x16xf32>
    %367 = math.tanh %366 : vector<1x16xf32>
    %368 = arith.mulf %363, %367 : vector<1x16xf32>
    %c4_135 = arith.constant 4 : index
    %c0_136 = arith.constant 0 : index
    %369 = vector.load %arg17[%c4_135, %c0_136] : memref<8x16xf32, #tpu.memory_space<vmem>>, vector<1x16xf32>
    tpu.vector_store %arg17[%c4_135, %c0_136], %337 {strides = array<i32>} : memref<8x16xf32, #tpu.memory_space<vmem>>, vector<1x16xf32>,
    %c3_137 = arith.constant 3 : index
    %c0_138 = arith.constant 0 : index
    %370 = vector.load %arg18[%c3_137, %c0_138] : memref<8x16xf32, #tpu.memory_space<vmem>>, vector<1x16xf32>
    tpu.vector_store %arg18[%c3_137, %c0_138], %368 {strides = array<i32>} : memref<8x16xf32, #tpu.memory_space<vmem>>, vector<1x16xf32>,
    %371 = vector.extract_strided_slice %5 {offsets = [5, 0], sizes = [1, 64], strides = [1, 1]} : vector<8x64xf32> to vector<1x64xf32>
    %cst_139 = arith.constant dense<0.000000e+00> : vector<1x64xf32>
    %372 = tpu.matmul %337, %11, %cst_139 {dimension_numbers = #tpu.dot_dimension_numbers<[1], [0], [0], [1], [0, 0, 1, 1], [], []>} : vector<1x16xf32>, vector<16x64xf32>, vector<1x64xf32> -> vector<1x64xf32>
    %373 = arith.addf %371, %372 : vector<1x64xf32>
    %374 = vector.extract_strided_slice %10 {offsets = [2, 0], sizes = [1, 64], strides = [1, 1]} : vector<8x64xf32> to vector<1x64xf32>
    %cst_140 = arith.constant dense<0.000000e+00> : vector<1x64xf32>
    %375 = tpu.matmul %368, %12, %cst_140 {dimension_numbers = #tpu.dot_dimension_numbers<[1], [0], [0], [1], [0, 0, 1, 1], [], []>} : vector<1x16xf32>, vector<16x64xf32>, vector<1x64xf32> -> vector<1x64xf32>
    %376 = arith.addf %374, %375 : vector<1x64xf32>
    %377 = vector.extract_strided_slice %373 {offsets = [0, 0], sizes = [1, 16], strides = [1, 1]} : vector<1x64xf32> to vector<1x16xf32>
    %cst_141 = arith.constant 5.000000e-01 : f32
    %378 = vector.broadcast %cst_141 : f32 to vector<1x16xf32>
    %379 = arith.mulf %378, %377 : vector<1x16xf32>
    %380 = math.tanh %379 : vector<1x16xf32>
    %cst_142 = arith.constant 5.000000e-01 : f32
    %381 = vector.broadcast %cst_142 : f32 to vector<1x16xf32>
    %382 = arith.mulf %381, %380 : vector<1x16xf32>
    %cst_143 = arith.constant 5.000000e-01 : f32
    %383 = vector.broadcast %cst_143 : f32 to vector<1x16xf32>
    %384 = arith.addf %382, %383 : vector<1x16xf32>
    %385 = vector.extract_strided_slice %373 {offsets = [0, 16], sizes = [1, 16], strides = [1, 1]} : vector<1x64xf32> to vector<1x16xf32>
    %cst_144 = arith.constant 5.000000e-01 : f32
    %386 = vector.broadcast %cst_144 : f32 to vector<1x16xf32>
    %387 = arith.mulf %386, %385 : vector<1x16xf32>
    %388 = math.tanh %387 : vector<1x16xf32>
    %cst_145 = arith.constant 5.000000e-01 : f32
    %389 = vector.broadcast %cst_145 : f32 to vector<1x16xf32>
    %390 = arith.mulf %389, %388 : vector<1x16xf32>
    %cst_146 = arith.constant 5.000000e-01 : f32
    %391 = vector.broadcast %cst_146 : f32 to vector<1x16xf32>
    %392 = arith.addf %390, %391 : vector<1x16xf32>
    %393 = vector.extract_strided_slice %373 {offsets = [0, 32], sizes = [1, 16], strides = [1, 1]} : vector<1x64xf32> to vector<1x16xf32>
    %394 = math.tanh %393 : vector<1x16xf32>
    %395 = vector.extract_strided_slice %373 {offsets = [0, 48], sizes = [1, 16], strides = [1, 1]} : vector<1x64xf32> to vector<1x16xf32>
    %cst_147 = arith.constant 5.000000e-01 : f32
    %396 = vector.broadcast %cst_147 : f32 to vector<1x16xf32>
    %397 = arith.mulf %396, %395 : vector<1x16xf32>
    %398 = math.tanh %397 : vector<1x16xf32>
    %cst_148 = arith.constant 5.000000e-01 : f32
    %399 = vector.broadcast %cst_148 : f32 to vector<1x16xf32>
    %400 = arith.mulf %399, %398 : vector<1x16xf32>
    %cst_149 = arith.constant 5.000000e-01 : f32
    %401 = vector.broadcast %cst_149 : f32 to vector<1x16xf32>
    %402 = arith.addf %400, %401 : vector<1x16xf32>
    %403 = arith.mulf %392, %335 : vector<1x16xf32>
    %404 = arith.mulf %384, %394 : vector<1x16xf32>
    %405 = arith.addf %403, %404 : vector<1x16xf32>
    %406 = math.tanh %405 : vector<1x16xf32>
    %407 = arith.mulf %402, %406 : vector<1x16xf32>
    %408 = vector.extract_strided_slice %376 {offsets = [0, 0], sizes = [1, 16], strides = [1, 1]} : vector<1x64xf32> to vector<1x16xf32>
    %cst_150 = arith.constant 5.000000e-01 : f32
    %409 = vector.broadcast %cst_150 : f32 to vector<1x16xf32>
    %410 = arith.mulf %409, %408 : vector<1x16xf32>
    %411 = math.tanh %410 : vector<1x16xf32>
    %cst_151 = arith.constant 5.000000e-01 : f32
    %412 = vector.broadcast %cst_151 : f32 to vector<1x16xf32>
    %413 = arith.mulf %412, %411 : vector<1x16xf32>
    %cst_152 = arith.constant 5.000000e-01 : f32
    %414 = vector.broadcast %cst_152 : f32 to vector<1x16xf32>
    %415 = arith.addf %413, %414 : vector<1x16xf32>
    %416 = vector.extract_strided_slice %376 {offsets = [0, 16], sizes = [1, 16], strides = [1, 1]} : vector<1x64xf32> to vector<1x16xf32>
    %cst_153 = arith.constant 5.000000e-01 : f32
    %417 = vector.broadcast %cst_153 : f32 to vector<1x16xf32>
    %418 = arith.mulf %417, %416 : vector<1x16xf32>
    %419 = math.tanh %418 : vector<1x16xf32>
    %cst_154 = arith.constant 5.000000e-01 : f32
    %420 = vector.broadcast %cst_154 : f32 to vector<1x16xf32>
    %421 = arith.mulf %420, %419 : vector<1x16xf32>
    %cst_155 = arith.constant 5.000000e-01 : f32
    %422 = vector.broadcast %cst_155 : f32 to vector<1x16xf32>
    %423 = arith.addf %421, %422 : vector<1x16xf32>
    %424 = vector.extract_strided_slice %376 {offsets = [0, 32], sizes = [1, 16], strides = [1, 1]} : vector<1x64xf32> to vector<1x16xf32>
    %425 = math.tanh %424 : vector<1x16xf32>
    %426 = vector.extract_strided_slice %376 {offsets = [0, 48], sizes = [1, 16], strides = [1, 1]} : vector<1x64xf32> to vector<1x16xf32>
    %cst_156 = arith.constant 5.000000e-01 : f32
    %427 = vector.broadcast %cst_156 : f32 to vector<1x16xf32>
    %428 = arith.mulf %427, %426 : vector<1x16xf32>
    %429 = math.tanh %428 : vector<1x16xf32>
    %cst_157 = arith.constant 5.000000e-01 : f32
    %430 = vector.broadcast %cst_157 : f32 to vector<1x16xf32>
    %431 = arith.mulf %430, %429 : vector<1x16xf32>
    %cst_158 = arith.constant 5.000000e-01 : f32
    %432 = vector.broadcast %cst_158 : f32 to vector<1x16xf32>
    %433 = arith.addf %431, %432 : vector<1x16xf32>
    %434 = arith.mulf %423, %366 : vector<1x16xf32>
    %435 = arith.mulf %415, %425 : vector<1x16xf32>
    %436 = arith.addf %434, %435 : vector<1x16xf32>
    %437 = math.tanh %436 : vector<1x16xf32>
    %438 = arith.mulf %433, %437 : vector<1x16xf32>
    %c5_159 = arith.constant 5 : index
    %c0_160 = arith.constant 0 : index
    %439 = vector.load %arg17[%c5_159, %c0_160] : memref<8x16xf32, #tpu.memory_space<vmem>>, vector<1x16xf32>
    tpu.vector_store %arg17[%c5_159, %c0_160], %407 {strides = array<i32>} : memref<8x16xf32, #tpu.memory_space<vmem>>, vector<1x16xf32>,
    %c2_161 = arith.constant 2 : index
    %c0_162 = arith.constant 0 : index
    %440 = vector.load %arg18[%c2_161, %c0_162] : memref<8x16xf32, #tpu.memory_space<vmem>>, vector<1x16xf32>
    tpu.vector_store %arg18[%c2_161, %c0_162], %438 {strides = array<i32>} : memref<8x16xf32, #tpu.memory_space<vmem>>, vector<1x16xf32>,
    %441 = vector.extract_strided_slice %5 {offsets = [6, 0], sizes = [1, 64], strides = [1, 1]} : vector<8x64xf32> to vector<1x64xf32>
    %cst_163 = arith.constant dense<0.000000e+00> : vector<1x64xf32>
    %442 = tpu.matmul %407, %11, %cst_163 {dimension_numbers = #tpu.dot_dimension_numbers<[1], [0], [0], [1], [0, 0, 1, 1], [], []>} : vector<1x16xf32>, vector<16x64xf32>, vector<1x64xf32> -> vector<1x64xf32>
    %443 = arith.addf %441, %442 : vector<1x64xf32>
    %444 = vector.extract_strided_slice %10 {offsets = [1, 0], sizes = [1, 64], strides = [1, 1]} : vector<8x64xf32> to vector<1x64xf32>
    %cst_164 = arith.constant dense<0.000000e+00> : vector<1x64xf32>
    %445 = tpu.matmul %438, %12, %cst_164 {dimension_numbers = #tpu.dot_dimension_numbers<[1], [0], [0], [1], [0, 0, 1, 1], [], []>} : vector<1x16xf32>, vector<16x64xf32>, vector<1x64xf32> -> vector<1x64xf32>
    %446 = arith.addf %444, %445 : vector<1x64xf32>
    %447 = vector.extract_strided_slice %443 {offsets = [0, 0], sizes = [1, 16], strides = [1, 1]} : vector<1x64xf32> to vector<1x16xf32>
    %cst_165 = arith.constant 5.000000e-01 : f32
    %448 = vector.broadcast %cst_165 : f32 to vector<1x16xf32>
    %449 = arith.mulf %448, %447 : vector<1x16xf32>
    %450 = math.tanh %449 : vector<1x16xf32>
    %cst_166 = arith.constant 5.000000e-01 : f32
    %451 = vector.broadcast %cst_166 : f32 to vector<1x16xf32>
    %452 = arith.mulf %451, %450 : vector<1x16xf32>
    %cst_167 = arith.constant 5.000000e-01 : f32
    %453 = vector.broadcast %cst_167 : f32 to vector<1x16xf32>
    %454 = arith.addf %452, %453 : vector<1x16xf32>
    %455 = vector.extract_strided_slice %443 {offsets = [0, 16], sizes = [1, 16], strides = [1, 1]} : vector<1x64xf32> to vector<1x16xf32>
    %cst_168 = arith.constant 5.000000e-01 : f32
    %456 = vector.broadcast %cst_168 : f32 to vector<1x16xf32>
    %457 = arith.mulf %456, %455 : vector<1x16xf32>
    %458 = math.tanh %457 : vector<1x16xf32>
    %cst_169 = arith.constant 5.000000e-01 : f32
    %459 = vector.broadcast %cst_169 : f32 to vector<1x16xf32>
    %460 = arith.mulf %459, %458 : vector<1x16xf32>
    %cst_170 = arith.constant 5.000000e-01 : f32
    %461 = vector.broadcast %cst_170 : f32 to vector<1x16xf32>
    %462 = arith.addf %460, %461 : vector<1x16xf32>
    %463 = vector.extract_strided_slice %443 {offsets = [0, 32], sizes = [1, 16], strides = [1, 1]} : vector<1x64xf32> to vector<1x16xf32>
    %464 = math.tanh %463 : vector<1x16xf32>
    %465 = vector.extract_strided_slice %443 {offsets = [0, 48], sizes = [1, 16], strides = [1, 1]} : vector<1x64xf32> to vector<1x16xf32>
    %cst_171 = arith.constant 5.000000e-01 : f32
    %466 = vector.broadcast %cst_171 : f32 to vector<1x16xf32>
    %467 = arith.mulf %466, %465 : vector<1x16xf32>
    %468 = math.tanh %467 : vector<1x16xf32>
    %cst_172 = arith.constant 5.000000e-01 : f32
    %469 = vector.broadcast %cst_172 : f32 to vector<1x16xf32>
    %470 = arith.mulf %469, %468 : vector<1x16xf32>
    %cst_173 = arith.constant 5.000000e-01 : f32
    %471 = vector.broadcast %cst_173 : f32 to vector<1x16xf32>
    %472 = arith.addf %470, %471 : vector<1x16xf32>
    %473 = arith.mulf %462, %405 : vector<1x16xf32>
    %474 = arith.mulf %454, %464 : vector<1x16xf32>
    %475 = arith.addf %473, %474 : vector<1x16xf32>
    %476 = math.tanh %475 : vector<1x16xf32>
    %477 = arith.mulf %472, %476 : vector<1x16xf32>
    %478 = vector.extract_strided_slice %446 {offsets = [0, 0], sizes = [1, 16], strides = [1, 1]} : vector<1x64xf32> to vector<1x16xf32>
    %cst_174 = arith.constant 5.000000e-01 : f32
    %479 = vector.broadcast %cst_174 : f32 to vector<1x16xf32>
    %480 = arith.mulf %479, %478 : vector<1x16xf32>
    %481 = math.tanh %480 : vector<1x16xf32>
    %cst_175 = arith.constant 5.000000e-01 : f32
    %482 = vector.broadcast %cst_175 : f32 to vector<1x16xf32>
    %483 = arith.mulf %482, %481 : vector<1x16xf32>
    %cst_176 = arith.constant 5.000000e-01 : f32
    %484 = vector.broadcast %cst_176 : f32 to vector<1x16xf32>
    %485 = arith.addf %483, %484 : vector<1x16xf32>
    %486 = vector.extract_strided_slice %446 {offsets = [0, 16], sizes = [1, 16], strides = [1, 1]} : vector<1x64xf32> to vector<1x16xf32>
    %cst_177 = arith.constant 5.000000e-01 : f32
    %487 = vector.broadcast %cst_177 : f32 to vector<1x16xf32>
    %488 = arith.mulf %487, %486 : vector<1x16xf32>
    %489 = math.tanh %488 : vector<1x16xf32>
    %cst_178 = arith.constant 5.000000e-01 : f32
    %490 = vector.broadcast %cst_178 : f32 to vector<1x16xf32>
    %491 = arith.mulf %490, %489 : vector<1x16xf32>
    %cst_179 = arith.constant 5.000000e-01 : f32
    %492 = vector.broadcast %cst_179 : f32 to vector<1x16xf32>
    %493 = arith.addf %491, %492 : vector<1x16xf32>
    %494 = vector.extract_strided_slice %446 {offsets = [0, 32], sizes = [1, 16], strides = [1, 1]} : vector<1x64xf32> to vector<1x16xf32>
    %495 = math.tanh %494 : vector<1x16xf32>
    %496 = vector.extract_strided_slice %446 {offsets = [0, 48], sizes = [1, 16], strides = [1, 1]} : vector<1x64xf32> to vector<1x16xf32>
    %cst_180 = arith.constant 5.000000e-01 : f32
    %497 = vector.broadcast %cst_180 : f32 to vector<1x16xf32>
    %498 = arith.mulf %497, %496 : vector<1x16xf32>
    %499 = math.tanh %498 : vector<1x16xf32>
    %cst_181 = arith.constant 5.000000e-01 : f32
    %500 = vector.broadcast %cst_181 : f32 to vector<1x16xf32>
    %501 = arith.mulf %500, %499 : vector<1x16xf32>
    %cst_182 = arith.constant 5.000000e-01 : f32
    %502 = vector.broadcast %cst_182 : f32 to vector<1x16xf32>
    %503 = arith.addf %501, %502 : vector<1x16xf32>
    %504 = arith.mulf %493, %436 : vector<1x16xf32>
    %505 = arith.mulf %485, %495 : vector<1x16xf32>
    %506 = arith.addf %504, %505 : vector<1x16xf32>
    %507 = math.tanh %506 : vector<1x16xf32>
    %508 = arith.mulf %503, %507 : vector<1x16xf32>
    %c6_183 = arith.constant 6 : index
    %c0_184 = arith.constant 0 : index
    %509 = vector.load %arg17[%c6_183, %c0_184] : memref<8x16xf32, #tpu.memory_space<vmem>>, vector<1x16xf32>
    tpu.vector_store %arg17[%c6_183, %c0_184], %477 {strides = array<i32>} : memref<8x16xf32, #tpu.memory_space<vmem>>, vector<1x16xf32>,
    %c1_185 = arith.constant 1 : index
    %c0_186 = arith.constant 0 : index
    %510 = vector.load %arg18[%c1_185, %c0_186] : memref<8x16xf32, #tpu.memory_space<vmem>>, vector<1x16xf32>
    tpu.vector_store %arg18[%c1_185, %c0_186], %508 {strides = array<i32>} : memref<8x16xf32, #tpu.memory_space<vmem>>, vector<1x16xf32>,
    %511 = vector.extract_strided_slice %5 {offsets = [7, 0], sizes = [1, 64], strides = [1, 1]} : vector<8x64xf32> to vector<1x64xf32>
    %cst_187 = arith.constant dense<0.000000e+00> : vector<1x64xf32>
    %512 = tpu.matmul %477, %11, %cst_187 {dimension_numbers = #tpu.dot_dimension_numbers<[1], [0], [0], [1], [0, 0, 1, 1], [], []>} : vector<1x16xf32>, vector<16x64xf32>, vector<1x64xf32> -> vector<1x64xf32>
    %513 = arith.addf %511, %512 : vector<1x64xf32>
    %514 = vector.extract_strided_slice %10 {offsets = [0, 0], sizes = [1, 64], strides = [1, 1]} : vector<8x64xf32> to vector<1x64xf32>
    %cst_188 = arith.constant dense<0.000000e+00> : vector<1x64xf32>
    %515 = tpu.matmul %508, %12, %cst_188 {dimension_numbers = #tpu.dot_dimension_numbers<[1], [0], [0], [1], [0, 0, 1, 1], [], []>} : vector<1x16xf32>, vector<16x64xf32>, vector<1x64xf32> -> vector<1x64xf32>
    %516 = arith.addf %514, %515 : vector<1x64xf32>
    %517 = vector.extract_strided_slice %513 {offsets = [0, 0], sizes = [1, 16], strides = [1, 1]} : vector<1x64xf32> to vector<1x16xf32>
    %cst_189 = arith.constant 5.000000e-01 : f32
    %518 = vector.broadcast %cst_189 : f32 to vector<1x16xf32>
    %519 = arith.mulf %518, %517 : vector<1x16xf32>
    %520 = math.tanh %519 : vector<1x16xf32>
    %cst_190 = arith.constant 5.000000e-01 : f32
    %521 = vector.broadcast %cst_190 : f32 to vector<1x16xf32>
    %522 = arith.mulf %521, %520 : vector<1x16xf32>
    %cst_191 = arith.constant 5.000000e-01 : f32
    %523 = vector.broadcast %cst_191 : f32 to vector<1x16xf32>
    %524 = arith.addf %522, %523 : vector<1x16xf32>
    %525 = vector.extract_strided_slice %513 {offsets = [0, 16], sizes = [1, 16], strides = [1, 1]} : vector<1x64xf32> to vector<1x16xf32>
    %cst_192 = arith.constant 5.000000e-01 : f32
    %526 = vector.broadcast %cst_192 : f32 to vector<1x16xf32>
    %527 = arith.mulf %526, %525 : vector<1x16xf32>
    %528 = math.tanh %527 : vector<1x16xf32>
    %cst_193 = arith.constant 5.000000e-01 : f32
    %529 = vector.broadcast %cst_193 : f32 to vector<1x16xf32>
    %530 = arith.mulf %529, %528 : vector<1x16xf32>
    %cst_194 = arith.constant 5.000000e-01 : f32
    %531 = vector.broadcast %cst_194 : f32 to vector<1x16xf32>
    %532 = arith.addf %530, %531 : vector<1x16xf32>
    %533 = vector.extract_strided_slice %513 {offsets = [0, 32], sizes = [1, 16], strides = [1, 1]} : vector<1x64xf32> to vector<1x16xf32>
    %534 = math.tanh %533 : vector<1x16xf32>
    %535 = vector.extract_strided_slice %513 {offsets = [0, 48], sizes = [1, 16], strides = [1, 1]} : vector<1x64xf32> to vector<1x16xf32>
    %cst_195 = arith.constant 5.000000e-01 : f32
    %536 = vector.broadcast %cst_195 : f32 to vector<1x16xf32>
    %537 = arith.mulf %536, %535 : vector<1x16xf32>
    %538 = math.tanh %537 : vector<1x16xf32>
    %cst_196 = arith.constant 5.000000e-01 : f32
    %539 = vector.broadcast %cst_196 : f32 to vector<1x16xf32>
    %540 = arith.mulf %539, %538 : vector<1x16xf32>
    %cst_197 = arith.constant 5.000000e-01 : f32
    %541 = vector.broadcast %cst_197 : f32 to vector<1x16xf32>
    %542 = arith.addf %540, %541 : vector<1x16xf32>
    %543 = arith.mulf %532, %475 : vector<1x16xf32>
    %544 = arith.mulf %524, %534 : vector<1x16xf32>
    %545 = arith.addf %543, %544 : vector<1x16xf32>
    %546 = math.tanh %545 : vector<1x16xf32>
    %547 = arith.mulf %542, %546 : vector<1x16xf32>
    %548 = vector.extract_strided_slice %516 {offsets = [0, 0], sizes = [1, 16], strides = [1, 1]} : vector<1x64xf32> to vector<1x16xf32>
    %cst_198 = arith.constant 5.000000e-01 : f32
    %549 = vector.broadcast %cst_198 : f32 to vector<1x16xf32>
    %550 = arith.mulf %549, %548 : vector<1x16xf32>
    %551 = math.tanh %550 : vector<1x16xf32>
    %cst_199 = arith.constant 5.000000e-01 : f32
    %552 = vector.broadcast %cst_199 : f32 to vector<1x16xf32>
    %553 = arith.mulf %552, %551 : vector<1x16xf32>
    %cst_200 = arith.constant 5.000000e-01 : f32
    %554 = vector.broadcast %cst_200 : f32 to vector<1x16xf32>
    %555 = arith.addf %553, %554 : vector<1x16xf32>
    %556 = vector.extract_strided_slice %516 {offsets = [0, 16], sizes = [1, 16], strides = [1, 1]} : vector<1x64xf32> to vector<1x16xf32>
    %cst_201 = arith.constant 5.000000e-01 : f32
    %557 = vector.broadcast %cst_201 : f32 to vector<1x16xf32>
    %558 = arith.mulf %557, %556 : vector<1x16xf32>
    %559 = math.tanh %558 : vector<1x16xf32>
    %cst_202 = arith.constant 5.000000e-01 : f32
    %560 = vector.broadcast %cst_202 : f32 to vector<1x16xf32>
    %561 = arith.mulf %560, %559 : vector<1x16xf32>
    %cst_203 = arith.constant 5.000000e-01 : f32
    %562 = vector.broadcast %cst_203 : f32 to vector<1x16xf32>
    %563 = arith.addf %561, %562 : vector<1x16xf32>
    %564 = vector.extract_strided_slice %516 {offsets = [0, 32], sizes = [1, 16], strides = [1, 1]} : vector<1x64xf32> to vector<1x16xf32>
    %565 = math.tanh %564 : vector<1x16xf32>
    %566 = vector.extract_strided_slice %516 {offsets = [0, 48], sizes = [1, 16], strides = [1, 1]} : vector<1x64xf32> to vector<1x16xf32>
    %cst_204 = arith.constant 5.000000e-01 : f32
    %567 = vector.broadcast %cst_204 : f32 to vector<1x16xf32>
    %568 = arith.mulf %567, %566 : vector<1x16xf32>
    %569 = math.tanh %568 : vector<1x16xf32>
    %cst_205 = arith.constant 5.000000e-01 : f32
    %570 = vector.broadcast %cst_205 : f32 to vector<1x16xf32>
    %571 = arith.mulf %570, %569 : vector<1x16xf32>
    %cst_206 = arith.constant 5.000000e-01 : f32
    %572 = vector.broadcast %cst_206 : f32 to vector<1x16xf32>
    %573 = arith.addf %571, %572 : vector<1x16xf32>
    %574 = arith.mulf %563, %506 : vector<1x16xf32>
    %575 = arith.mulf %555, %565 : vector<1x16xf32>
    %576 = arith.addf %574, %575 : vector<1x16xf32>
    %577 = math.tanh %576 : vector<1x16xf32>
    %578 = arith.mulf %573, %577 : vector<1x16xf32>
    %c7_207 = arith.constant 7 : index
    %c0_208 = arith.constant 0 : index
    %579 = vector.load %arg17[%c7_207, %c0_208] : memref<8x16xf32, #tpu.memory_space<vmem>>, vector<1x16xf32>
    tpu.vector_store %arg17[%c7_207, %c0_208], %547 {strides = array<i32>} : memref<8x16xf32, #tpu.memory_space<vmem>>, vector<1x16xf32>,
    %c0_209 = arith.constant 0 : index
    %c0_210 = arith.constant 0 : index
    %580 = vector.load %arg18[%c0_209, %c0_210] : memref<8x16xf32, #tpu.memory_space<vmem>>, vector<1x16xf32>
    tpu.vector_store %arg18[%c0_209, %c0_210], %578 {strides = array<i32>} : memref<8x16xf32, #tpu.memory_space<vmem>>, vector<1x16xf32>,
    %c0_211 = arith.constant 0 : index
    %c0_212 = arith.constant 0 : index
    %581 = vector.load %arg17[%c0_211, %c0_212] : memref<8x16xf32, #tpu.memory_space<vmem>>, vector<8x16xf32>
    %c0_213 = arith.constant 0 : index
    %c0_214 = arith.constant 0 : index
    %582 = vector.load %arg11[%c0_213, %c0_214] : memref<16x6xf32, #tpu.memory_space<vmem>>, vector<16x6xf32>
    %cst_215 = arith.constant dense<0.000000e+00> : vector<8x6xf32>
    %583 = tpu.matmul %581, %582, %cst_215 {dimension_numbers = #tpu.dot_dimension_numbers<[1], [0], [0], [1], [0, 0, 1, 1], [], []>} : vector<8x16xf32>, vector<16x6xf32>, vector<8x6xf32> -> vector<8x6xf32>
    %c0_216 = arith.constant 0 : index
    %c0_217 = arith.constant 0 : index
    %584 = vector.load %arg18[%c0_216, %c0_217] : memref<8x16xf32, #tpu.memory_space<vmem>>, vector<8x16xf32>
    %c0_218 = arith.constant 0 : index
    %c0_219 = arith.constant 0 : index
    %585 = vector.load %arg12[%c0_218, %c0_219] : memref<16x6xf32, #tpu.memory_space<vmem>>, vector<16x6xf32>
    %cst_220 = arith.constant dense<0.000000e+00> : vector<8x6xf32>
    %586 = tpu.matmul %584, %585, %cst_220 {dimension_numbers = #tpu.dot_dimension_numbers<[1], [0], [0], [1], [0, 0, 1, 1], [], []>} : vector<8x16xf32>, vector<16x6xf32>, vector<8x6xf32> -> vector<8x6xf32>
    %587 = arith.addf %583, %586 : vector<8x6xf32>
    %c0_221 = arith.constant 0 : index
    %c0_222 = arith.constant 0 : index
    %588 = vector.load %arg13[%c0_221, %c0_222] : memref<1x6xf32, #tpu.memory_space<vmem>>, vector<1x6xf32>
    %589 = vector.broadcast %588 : vector<1x6xf32> to vector<8x6xf32>
    %590 = arith.addf %587, %589 : vector<8x6xf32>
    %c0_223 = arith.constant 0 : index
    %c0_224 = arith.constant 0 : index
    %591 = vector.load %arg14[%c0_223, %c0_224] : memref<6x6xf32, #tpu.memory_space<vmem>>, vector<6x6xf32>
    %592 = tpu.iota {dimensions = array<i32: 0>} : vector<6x6xi32>
    %593 = tpu.iota {dimensions = array<i32: 1>} : vector<6x6xi32>
    %594 = tpu.iota {dimensions = array<i32: 1>} : vector<1x6xi32>
    %cst_225 = arith.constant -1.000000e+04 : f32
    %595 = vector.broadcast %cst_225 : f32 to vector<1x6xf32>
    %c4_i32 = arith.constant 4 : i32
    %596 = vector.broadcast %c4_i32 : i32 to vector<1x6xi32>
    %597 = arith.cmpi eq, %594, %596 : vector<1x6xi32>
    %cst_226 = arith.constant 0.000000e+00 : f32
    %598 = vector.broadcast %cst_226 : f32 to vector<1x6xf32>
    %599 = arith.select %597, %598, %595 : vector<1x6xi1>, vector<1x6xf32>
    %cst_227 = arith.constant 0.000000e+00 : f32
    %600 = vector.broadcast %cst_227 : f32 to vector<1x1xf32>
    %601 = vector.extract_strided_slice %590 {offsets = [0, 0], sizes = [1, 6], strides = [1, 1]} : vector<8x6xf32> to vector<1x6xf32>
    %602 = vector.broadcast %599 : vector<1x6xf32> to vector<6x6xf32>
    %603 = arith.addf %591, %602 : vector<6x6xf32>
    %cst_228 = arith.constant dense<0xFF800000> : vector<6xf32>
    %604 = vector.multi_reduction <maximumf>, %603, %cst_228 [1] : vector<6x6xf32> to vector<6xf32>
    %605 = vector.shape_cast %604 : vector<6xf32> to vector<6x1xf32>
    %606 = vector.broadcast %605 : vector<6x1xf32> to vector<6x6xf32>
    %607 = arith.subf %603, %606 : vector<6x6xf32>
    %608 = math.exp %607 : vector<6x6xf32>
    %cst_229 = arith.constant dense<0.000000e+00> : vector<6xf32>
    %609 = vector.multi_reduction <add>, %608, %cst_229 [1] : vector<6x6xf32> to vector<6xf32>
    %610 = vector.shape_cast %609 : vector<6xf32> to vector<6x1xf32>
    %611 = math.log %610 : vector<6x1xf32>
    %612 = arith.addf %605, %611 : vector<6x1xf32>
    %613 = arith.cmpi eq, %592, %593 : vector<6x6xi32>
    %cst_230 = arith.constant 0.000000e+00 : f32
    %614 = vector.shape_cast %612 : vector<6x1xf32> to vector<6x1xf32>
    %615 = vector.broadcast %614 : vector<6x1xf32> to vector<6x6xf32>
    %616 = vector.broadcast %cst_230 : f32 to vector<6x6xf32>
    %617 = arith.select %613, %615, %616 : vector<6x6xi1>, vector<6x6xf32>
    %cst_231 = arith.constant dense<0.000000e+00> : vector<6xf32>
    %618 = vector.multi_reduction <add>, %617, %cst_231 [0] : vector<6x6xf32> to vector<6xf32>
    %619 = vector.shape_cast %618 : vector<6xf32> to vector<1x6xf32>
    %620 = arith.addf %619, %601 : vector<1x6xf32>
    %c0_232 = arith.constant 0 : index
    %621 = memref.load %arg0[%c0_232] : memref<8xi32, #tpu.memory_space<smem>>
    %622 = arith.index_cast %621 : i32 to index
    %c4_233 = arith.constant 4 : index
    %623 = memref.load %arg1[%622, %c4_233] : memref<6x6xf32, #tpu.memory_space<smem>>
    %cst_234 = arith.constant 0.000000e+00 : f32
    %624 = arith.addf %cst_234, %623 : f32
    %625 = vector.broadcast %621 : i32 to vector<1x6xi32>
    %626 = arith.cmpi eq, %594, %625 : vector<1x6xi32>
    %cst_235 = arith.constant 0.000000e+00 : f32
    %627 = vector.broadcast %cst_235 : f32 to vector<1x6xf32>
    %628 = arith.select %626, %601, %627 : vector<1x6xi1>, vector<1x6xf32>
    %cst_236 = arith.constant dense<0.000000e+00> : vector<1xf32>
    %629 = vector.multi_reduction <add>, %628, %cst_236 [1] : vector<1x6xf32> to vector<1xf32>
    %630 = vector.shape_cast %629 : vector<1xf32> to vector<1x1xf32>
    %631 = arith.addf %600, %630 : vector<1x1xf32>
    %632 = vector.extract_strided_slice %590 {offsets = [1, 0], sizes = [1, 6], strides = [1, 1]} : vector<8x6xf32> to vector<1x6xf32>
    %633 = vector.broadcast %620 : vector<1x6xf32> to vector<6x6xf32>
    %634 = arith.addf %591, %633 : vector<6x6xf32>
    %cst_237 = arith.constant dense<0xFF800000> : vector<6xf32>
    %635 = vector.multi_reduction <maximumf>, %634, %cst_237 [1] : vector<6x6xf32> to vector<6xf32>
    %636 = vector.shape_cast %635 : vector<6xf32> to vector<6x1xf32>
    %637 = vector.broadcast %636 : vector<6x1xf32> to vector<6x6xf32>
    %638 = arith.subf %634, %637 : vector<6x6xf32>
    %639 = math.exp %638 : vector<6x6xf32>
    %cst_238 = arith.constant dense<0.000000e+00> : vector<6xf32>
    %640 = vector.multi_reduction <add>, %639, %cst_238 [1] : vector<6x6xf32> to vector<6xf32>
    %641 = vector.shape_cast %640 : vector<6xf32> to vector<6x1xf32>
    %642 = math.log %641 : vector<6x1xf32>
    %643 = arith.addf %636, %642 : vector<6x1xf32>
    %644 = arith.cmpi eq, %592, %593 : vector<6x6xi32>
    %cst_239 = arith.constant 0.000000e+00 : f32
    %645 = vector.shape_cast %643 : vector<6x1xf32> to vector<6x1xf32>
    %646 = vector.broadcast %645 : vector<6x1xf32> to vector<6x6xf32>
    %647 = vector.broadcast %cst_239 : f32 to vector<6x6xf32>
    %648 = arith.select %644, %646, %647 : vector<6x6xi1>, vector<6x6xf32>
    %cst_240 = arith.constant dense<0.000000e+00> : vector<6xf32>
    %649 = vector.multi_reduction <add>, %648, %cst_240 [0] : vector<6x6xf32> to vector<6xf32>
    %650 = vector.shape_cast %649 : vector<6xf32> to vector<1x6xf32>
    %651 = arith.addf %650, %632 : vector<1x6xf32>
    %c1_241 = arith.constant 1 : index
    %652 = memref.load %arg0[%c1_241] : memref<8xi32, #tpu.memory_space<smem>>
    %653 = arith.index_cast %652 : i32 to index
    %654 = arith.index_cast %621 : i32 to index
    %655 = memref.load %arg1[%653, %654] : memref<6x6xf32, #tpu.memory_space<smem>>
    %656 = arith.addf %624, %655 : f32
    %657 = vector.broadcast %652 : i32 to vector<1x6xi32>
    %658 = arith.cmpi eq, %594, %657 : vector<1x6xi32>
    %cst_242 = arith.constant 0.000000e+00 : f32
    %659 = vector.broadcast %cst_242 : f32 to vector<1x6xf32>
    %660 = arith.select %658, %632, %659 : vector<1x6xi1>, vector<1x6xf32>
    %cst_243 = arith.constant dense<0.000000e+00> : vector<1xf32>
    %661 = vector.multi_reduction <add>, %660, %cst_243 [1] : vector<1x6xf32> to vector<1xf32>
    %662 = vector.shape_cast %661 : vector<1xf32> to vector<1x1xf32>
    %663 = arith.addf %631, %662 : vector<1x1xf32>
    %664 = vector.extract_strided_slice %590 {offsets = [2, 0], sizes = [1, 6], strides = [1, 1]} : vector<8x6xf32> to vector<1x6xf32>
    %665 = vector.broadcast %651 : vector<1x6xf32> to vector<6x6xf32>
    %666 = arith.addf %591, %665 : vector<6x6xf32>
    %cst_244 = arith.constant dense<0xFF800000> : vector<6xf32>
    %667 = vector.multi_reduction <maximumf>, %666, %cst_244 [1] : vector<6x6xf32> to vector<6xf32>
    %668 = vector.shape_cast %667 : vector<6xf32> to vector<6x1xf32>
    %669 = vector.broadcast %668 : vector<6x1xf32> to vector<6x6xf32>
    %670 = arith.subf %666, %669 : vector<6x6xf32>
    %671 = math.exp %670 : vector<6x6xf32>
    %cst_245 = arith.constant dense<0.000000e+00> : vector<6xf32>
    %672 = vector.multi_reduction <add>, %671, %cst_245 [1] : vector<6x6xf32> to vector<6xf32>
    %673 = vector.shape_cast %672 : vector<6xf32> to vector<6x1xf32>
    %674 = math.log %673 : vector<6x1xf32>
    %675 = arith.addf %668, %674 : vector<6x1xf32>
    %676 = arith.cmpi eq, %592, %593 : vector<6x6xi32>
    %cst_246 = arith.constant 0.000000e+00 : f32
    %677 = vector.shape_cast %675 : vector<6x1xf32> to vector<6x1xf32>
    %678 = vector.broadcast %677 : vector<6x1xf32> to vector<6x6xf32>
    %679 = vector.broadcast %cst_246 : f32 to vector<6x6xf32>
    %680 = arith.select %676, %678, %679 : vector<6x6xi1>, vector<6x6xf32>
    %cst_247 = arith.constant dense<0.000000e+00> : vector<6xf32>
    %681 = vector.multi_reduction <add>, %680, %cst_247 [0] : vector<6x6xf32> to vector<6xf32>
    %682 = vector.shape_cast %681 : vector<6xf32> to vector<1x6xf32>
    %683 = arith.addf %682, %664 : vector<1x6xf32>
    %c2_248 = arith.constant 2 : index
    %684 = memref.load %arg0[%c2_248] : memref<8xi32, #tpu.memory_space<smem>>
    %685 = arith.index_cast %684 : i32 to index
    %686 = arith.index_cast %652 : i32 to index
    %687 = memref.load %arg1[%685, %686] : memref<6x6xf32, #tpu.memory_space<smem>>
    %688 = arith.addf %656, %687 : f32
    %689 = vector.broadcast %684 : i32 to vector<1x6xi32>
    %690 = arith.cmpi eq, %594, %689 : vector<1x6xi32>
    %cst_249 = arith.constant 0.000000e+00 : f32
    %691 = vector.broadcast %cst_249 : f32 to vector<1x6xf32>
    %692 = arith.select %690, %664, %691 : vector<1x6xi1>, vector<1x6xf32>
    %cst_250 = arith.constant dense<0.000000e+00> : vector<1xf32>
    %693 = vector.multi_reduction <add>, %692, %cst_250 [1] : vector<1x6xf32> to vector<1xf32>
    %694 = vector.shape_cast %693 : vector<1xf32> to vector<1x1xf32>
    %695 = arith.addf %663, %694 : vector<1x1xf32>
    %696 = vector.extract_strided_slice %590 {offsets = [3, 0], sizes = [1, 6], strides = [1, 1]} : vector<8x6xf32> to vector<1x6xf32>
    %697 = vector.broadcast %683 : vector<1x6xf32> to vector<6x6xf32>
    %698 = arith.addf %591, %697 : vector<6x6xf32>
    %cst_251 = arith.constant dense<0xFF800000> : vector<6xf32>
    %699 = vector.multi_reduction <maximumf>, %698, %cst_251 [1] : vector<6x6xf32> to vector<6xf32>
    %700 = vector.shape_cast %699 : vector<6xf32> to vector<6x1xf32>
    %701 = vector.broadcast %700 : vector<6x1xf32> to vector<6x6xf32>
    %702 = arith.subf %698, %701 : vector<6x6xf32>
    %703 = math.exp %702 : vector<6x6xf32>
    %cst_252 = arith.constant dense<0.000000e+00> : vector<6xf32>
    %704 = vector.multi_reduction <add>, %703, %cst_252 [1] : vector<6x6xf32> to vector<6xf32>
    %705 = vector.shape_cast %704 : vector<6xf32> to vector<6x1xf32>
    %706 = math.log %705 : vector<6x1xf32>
    %707 = arith.addf %700, %706 : vector<6x1xf32>
    %708 = arith.cmpi eq, %592, %593 : vector<6x6xi32>
    %cst_253 = arith.constant 0.000000e+00 : f32
    %709 = vector.shape_cast %707 : vector<6x1xf32> to vector<6x1xf32>
    %710 = vector.broadcast %709 : vector<6x1xf32> to vector<6x6xf32>
    %711 = vector.broadcast %cst_253 : f32 to vector<6x6xf32>
    %712 = arith.select %708, %710, %711 : vector<6x6xi1>, vector<6x6xf32>
    %cst_254 = arith.constant dense<0.000000e+00> : vector<6xf32>
    %713 = vector.multi_reduction <add>, %712, %cst_254 [0] : vector<6x6xf32> to vector<6xf32>
    %714 = vector.shape_cast %713 : vector<6xf32> to vector<1x6xf32>
    %715 = arith.addf %714, %696 : vector<1x6xf32>
    %c3_255 = arith.constant 3 : index
    %716 = memref.load %arg0[%c3_255] : memref<8xi32, #tpu.memory_space<smem>>
    %717 = arith.index_cast %716 : i32 to index
    %718 = arith.index_cast %684 : i32 to index
    %719 = memref.load %arg1[%717, %718] : memref<6x6xf32, #tpu.memory_space<smem>>
    %720 = arith.addf %688, %719 : f32
    %721 = vector.broadcast %716 : i32 to vector<1x6xi32>
    %722 = arith.cmpi eq, %594, %721 : vector<1x6xi32>
    %cst_256 = arith.constant 0.000000e+00 : f32
    %723 = vector.broadcast %cst_256 : f32 to vector<1x6xf32>
    %724 = arith.select %722, %696, %723 : vector<1x6xi1>, vector<1x6xf32>
    %cst_257 = arith.constant dense<0.000000e+00> : vector<1xf32>
    %725 = vector.multi_reduction <add>, %724, %cst_257 [1] : vector<1x6xf32> to vector<1xf32>
    %726 = vector.shape_cast %725 : vector<1xf32> to vector<1x1xf32>
    %727 = arith.addf %695, %726 : vector<1x1xf32>
    %728 = vector.extract_strided_slice %590 {offsets = [4, 0], sizes = [1, 6], strides = [1, 1]} : vector<8x6xf32> to vector<1x6xf32>
    %729 = vector.broadcast %715 : vector<1x6xf32> to vector<6x6xf32>
    %730 = arith.addf %591, %729 : vector<6x6xf32>
    %cst_258 = arith.constant dense<0xFF800000> : vector<6xf32>
    %731 = vector.multi_reduction <maximumf>, %730, %cst_258 [1] : vector<6x6xf32> to vector<6xf32>
    %732 = vector.shape_cast %731 : vector<6xf32> to vector<6x1xf32>
    %733 = vector.broadcast %732 : vector<6x1xf32> to vector<6x6xf32>
    %734 = arith.subf %730, %733 : vector<6x6xf32>
    %735 = math.exp %734 : vector<6x6xf32>
    %cst_259 = arith.constant dense<0.000000e+00> : vector<6xf32>
    %736 = vector.multi_reduction <add>, %735, %cst_259 [1] : vector<6x6xf32> to vector<6xf32>
    %737 = vector.shape_cast %736 : vector<6xf32> to vector<6x1xf32>
    %738 = math.log %737 : vector<6x1xf32>
    %739 = arith.addf %732, %738 : vector<6x1xf32>
    %740 = arith.cmpi eq, %592, %593 : vector<6x6xi32>
    %cst_260 = arith.constant 0.000000e+00 : f32
    %741 = vector.shape_cast %739 : vector<6x1xf32> to vector<6x1xf32>
    %742 = vector.broadcast %741 : vector<6x1xf32> to vector<6x6xf32>
    %743 = vector.broadcast %cst_260 : f32 to vector<6x6xf32>
    %744 = arith.select %740, %742, %743 : vector<6x6xi1>, vector<6x6xf32>
    %cst_261 = arith.constant dense<0.000000e+00> : vector<6xf32>
    %745 = vector.multi_reduction <add>, %744, %cst_261 [0] : vector<6x6xf32> to vector<6xf32>
    %746 = vector.shape_cast %745 : vector<6xf32> to vector<1x6xf32>
    %747 = arith.addf %746, %728 : vector<1x6xf32>
    %c4_262 = arith.constant 4 : index
    %748 = memref.load %arg0[%c4_262] : memref<8xi32, #tpu.memory_space<smem>>
    %749 = arith.index_cast %748 : i32 to index
    %750 = arith.index_cast %716 : i32 to index
    %751 = memref.load %arg1[%749, %750] : memref<6x6xf32, #tpu.memory_space<smem>>
    %752 = arith.addf %720, %751 : f32
    %753 = vector.broadcast %748 : i32 to vector<1x6xi32>
    %754 = arith.cmpi eq, %594, %753 : vector<1x6xi32>
    %cst_263 = arith.constant 0.000000e+00 : f32
    %755 = vector.broadcast %cst_263 : f32 to vector<1x6xf32>
    %756 = arith.select %754, %728, %755 : vector<1x6xi1>, vector<1x6xf32>
    %cst_264 = arith.constant dense<0.000000e+00> : vector<1xf32>
    %757 = vector.multi_reduction <add>, %756, %cst_264 [1] : vector<1x6xf32> to vector<1xf32>
    %758 = vector.shape_cast %757 : vector<1xf32> to vector<1x1xf32>
    %759 = arith.addf %727, %758 : vector<1x1xf32>
    %760 = vector.extract_strided_slice %590 {offsets = [5, 0], sizes = [1, 6], strides = [1, 1]} : vector<8x6xf32> to vector<1x6xf32>
    %761 = vector.broadcast %747 : vector<1x6xf32> to vector<6x6xf32>
    %762 = arith.addf %591, %761 : vector<6x6xf32>
    %cst_265 = arith.constant dense<0xFF800000> : vector<6xf32>
    %763 = vector.multi_reduction <maximumf>, %762, %cst_265 [1] : vector<6x6xf32> to vector<6xf32>
    %764 = vector.shape_cast %763 : vector<6xf32> to vector<6x1xf32>
    %765 = vector.broadcast %764 : vector<6x1xf32> to vector<6x6xf32>
    %766 = arith.subf %762, %765 : vector<6x6xf32>
    %767 = math.exp %766 : vector<6x6xf32>
    %cst_266 = arith.constant dense<0.000000e+00> : vector<6xf32>
    %768 = vector.multi_reduction <add>, %767, %cst_266 [1] : vector<6x6xf32> to vector<6xf32>
    %769 = vector.shape_cast %768 : vector<6xf32> to vector<6x1xf32>
    %770 = math.log %769 : vector<6x1xf32>
    %771 = arith.addf %764, %770 : vector<6x1xf32>
    %772 = arith.cmpi eq, %592, %593 : vector<6x6xi32>
    %cst_267 = arith.constant 0.000000e+00 : f32
    %773 = vector.shape_cast %771 : vector<6x1xf32> to vector<6x1xf32>
    %774 = vector.broadcast %773 : vector<6x1xf32> to vector<6x6xf32>
    %775 = vector.broadcast %cst_267 : f32 to vector<6x6xf32>
    %776 = arith.select %772, %774, %775 : vector<6x6xi1>, vector<6x6xf32>
    %cst_268 = arith.constant dense<0.000000e+00> : vector<6xf32>
    %777 = vector.multi_reduction <add>, %776, %cst_268 [0] : vector<6x6xf32> to vector<6xf32>
    %778 = vector.shape_cast %777 : vector<6xf32> to vector<1x6xf32>
    %779 = arith.addf %778, %760 : vector<1x6xf32>
    %c5_269 = arith.constant 5 : index
    %780 = memref.load %arg0[%c5_269] : memref<8xi32, #tpu.memory_space<smem>>
    %781 = arith.index_cast %780 : i32 to index
    %782 = arith.index_cast %748 : i32 to index
    %783 = memref.load %arg1[%781, %782] : memref<6x6xf32, #tpu.memory_space<smem>>
    %784 = arith.addf %752, %783 : f32
    %785 = vector.broadcast %780 : i32 to vector<1x6xi32>
    %786 = arith.cmpi eq, %594, %785 : vector<1x6xi32>
    %cst_270 = arith.constant 0.000000e+00 : f32
    %787 = vector.broadcast %cst_270 : f32 to vector<1x6xf32>
    %788 = arith.select %786, %760, %787 : vector<1x6xi1>, vector<1x6xf32>
    %cst_271 = arith.constant dense<0.000000e+00> : vector<1xf32>
    %789 = vector.multi_reduction <add>, %788, %cst_271 [1] : vector<1x6xf32> to vector<1xf32>
    %790 = vector.shape_cast %789 : vector<1xf32> to vector<1x1xf32>
    %791 = arith.addf %759, %790 : vector<1x1xf32>
    %792 = vector.extract_strided_slice %590 {offsets = [6, 0], sizes = [1, 6], strides = [1, 1]} : vector<8x6xf32> to vector<1x6xf32>
    %793 = vector.broadcast %779 : vector<1x6xf32> to vector<6x6xf32>
    %794 = arith.addf %591, %793 : vector<6x6xf32>
    %cst_272 = arith.constant dense<0xFF800000> : vector<6xf32>
    %795 = vector.multi_reduction <maximumf>, %794, %cst_272 [1] : vector<6x6xf32> to vector<6xf32>
    %796 = vector.shape_cast %795 : vector<6xf32> to vector<6x1xf32>
    %797 = vector.broadcast %796 : vector<6x1xf32> to vector<6x6xf32>
    %798 = arith.subf %794, %797 : vector<6x6xf32>
    %799 = math.exp %798 : vector<6x6xf32>
    %cst_273 = arith.constant dense<0.000000e+00> : vector<6xf32>
    %800 = vector.multi_reduction <add>, %799, %cst_273 [1] : vector<6x6xf32> to vector<6xf32>
    %801 = vector.shape_cast %800 : vector<6xf32> to vector<6x1xf32>
    %802 = math.log %801 : vector<6x1xf32>
    %803 = arith.addf %796, %802 : vector<6x1xf32>
    %804 = arith.cmpi eq, %592, %593 : vector<6x6xi32>
    %cst_274 = arith.constant 0.000000e+00 : f32
    %805 = vector.shape_cast %803 : vector<6x1xf32> to vector<6x1xf32>
    %806 = vector.broadcast %805 : vector<6x1xf32> to vector<6x6xf32>
    %807 = vector.broadcast %cst_274 : f32 to vector<6x6xf32>
    %808 = arith.select %804, %806, %807 : vector<6x6xi1>, vector<6x6xf32>
    %cst_275 = arith.constant dense<0.000000e+00> : vector<6xf32>
    %809 = vector.multi_reduction <add>, %808, %cst_275 [0] : vector<6x6xf32> to vector<6xf32>
    %810 = vector.shape_cast %809 : vector<6xf32> to vector<1x6xf32>
    %811 = arith.addf %810, %792 : vector<1x6xf32>
    %c6_276 = arith.constant 6 : index
    %812 = memref.load %arg0[%c6_276] : memref<8xi32, #tpu.memory_space<smem>>
    %813 = arith.index_cast %812 : i32 to index
    %814 = arith.index_cast %780 : i32 to index
    %815 = memref.load %arg1[%813, %814] : memref<6x6xf32, #tpu.memory_space<smem>>
    %816 = arith.addf %784, %815 : f32
    %817 = vector.broadcast %812 : i32 to vector<1x6xi32>
    %818 = arith.cmpi eq, %594, %817 : vector<1x6xi32>
    %cst_277 = arith.constant 0.000000e+00 : f32
    %819 = vector.broadcast %cst_277 : f32 to vector<1x6xf32>
    %820 = arith.select %818, %792, %819 : vector<1x6xi1>, vector<1x6xf32>
    %cst_278 = arith.constant dense<0.000000e+00> : vector<1xf32>
    %821 = vector.multi_reduction <add>, %820, %cst_278 [1] : vector<1x6xf32> to vector<1xf32>
    %822 = vector.shape_cast %821 : vector<1xf32> to vector<1x1xf32>
    %823 = arith.addf %791, %822 : vector<1x1xf32>
    %824 = vector.extract_strided_slice %590 {offsets = [7, 0], sizes = [1, 6], strides = [1, 1]} : vector<8x6xf32> to vector<1x6xf32>
    %825 = vector.broadcast %811 : vector<1x6xf32> to vector<6x6xf32>
    %826 = arith.addf %591, %825 : vector<6x6xf32>
    %cst_279 = arith.constant dense<0xFF800000> : vector<6xf32>
    %827 = vector.multi_reduction <maximumf>, %826, %cst_279 [1] : vector<6x6xf32> to vector<6xf32>
    %828 = vector.shape_cast %827 : vector<6xf32> to vector<6x1xf32>
    %829 = vector.broadcast %828 : vector<6x1xf32> to vector<6x6xf32>
    %830 = arith.subf %826, %829 : vector<6x6xf32>
    %831 = math.exp %830 : vector<6x6xf32>
    %cst_280 = arith.constant dense<0.000000e+00> : vector<6xf32>
    %832 = vector.multi_reduction <add>, %831, %cst_280 [1] : vector<6x6xf32> to vector<6xf32>
    %833 = vector.shape_cast %832 : vector<6xf32> to vector<6x1xf32>
    %834 = math.log %833 : vector<6x1xf32>
    %835 = arith.addf %828, %834 : vector<6x1xf32>
    %836 = arith.cmpi eq, %592, %593 : vector<6x6xi32>
    %cst_281 = arith.constant 0.000000e+00 : f32
    %837 = vector.shape_cast %835 : vector<6x1xf32> to vector<6x1xf32>
    %838 = vector.broadcast %837 : vector<6x1xf32> to vector<6x6xf32>
    %839 = vector.broadcast %cst_281 : f32 to vector<6x6xf32>
    %840 = arith.select %836, %838, %839 : vector<6x6xi1>, vector<6x6xf32>
    %cst_282 = arith.constant dense<0.000000e+00> : vector<6xf32>
    %841 = vector.multi_reduction <add>, %840, %cst_282 [0] : vector<6x6xf32> to vector<6xf32>
    %842 = vector.shape_cast %841 : vector<6xf32> to vector<1x6xf32>
    %843 = arith.addf %842, %824 : vector<1x6xf32>
    %c7_283 = arith.constant 7 : index
    %844 = memref.load %arg0[%c7_283] : memref<8xi32, #tpu.memory_space<smem>>
    %845 = arith.index_cast %844 : i32 to index
    %846 = arith.index_cast %812 : i32 to index
    %847 = memref.load %arg1[%845, %846] : memref<6x6xf32, #tpu.memory_space<smem>>
    %848 = arith.addf %816, %847 : f32
    %849 = vector.broadcast %844 : i32 to vector<1x6xi32>
    %850 = arith.cmpi eq, %594, %849 : vector<1x6xi32>
    %cst_284 = arith.constant 0.000000e+00 : f32
    %851 = vector.broadcast %cst_284 : f32 to vector<1x6xf32>
    %852 = arith.select %850, %824, %851 : vector<1x6xi1>, vector<1x6xf32>
    %cst_285 = arith.constant dense<0.000000e+00> : vector<1xf32>
    %853 = vector.multi_reduction <add>, %852, %cst_285 [1] : vector<1x6xf32> to vector<1xf32>
    %854 = vector.shape_cast %853 : vector<1xf32> to vector<1x1xf32>
    %855 = arith.addf %823, %854 : vector<1x1xf32>
    %856 = vector.extract_strided_slice %591 {offsets = [5, 0], sizes = [1, 6], strides = [1, 1]} : vector<6x6xf32> to vector<1x6xf32>
    %857 = arith.addf %843, %856 : vector<1x6xf32>
    %cst_286 = arith.constant dense<0xFF800000> : vector<1xf32>
    %858 = vector.multi_reduction <maximumf>, %857, %cst_286 [1] : vector<1x6xf32> to vector<1xf32>
    %859 = vector.shape_cast %858 : vector<1xf32> to vector<1x1xf32>
    %860 = vector.broadcast %859 : vector<1x1xf32> to vector<1x6xf32>
    %861 = arith.subf %857, %860 : vector<1x6xf32>
    %862 = math.exp %861 : vector<1x6xf32>
    %cst_287 = arith.constant dense<0.000000e+00> : vector<1xf32>
    %863 = vector.multi_reduction <add>, %862, %cst_287 [1] : vector<1x6xf32> to vector<1xf32>
    %864 = vector.shape_cast %863 : vector<1xf32> to vector<1x1xf32>
    %865 = math.log %864 : vector<1x1xf32>
    %866 = arith.addf %859, %865 : vector<1x1xf32>
    %c0_288 = arith.constant 0 : index
    %c0_289 = arith.constant 0 : index
    %867 = vector.load %arg15[%c0_288, %c0_289] : memref<1x1xf32, #tpu.memory_space<vmem>>, vector<1x1xf32>
    tpu.vector_store %arg15[%c0_288, %c0_289], %866 {strides = array<i32>} : memref<1x1xf32, #tpu.memory_space<vmem>>, vector<1x1xf32>,
    %c5_290 = arith.constant 5 : index
    %868 = arith.index_cast %844 : i32 to index
    %869 = memref.load %arg1[%c5_290, %868] : memref<6x6xf32, #tpu.memory_space<smem>>
    %870 = arith.addf %848, %869 : f32
    %871 = vector.broadcast %870 : f32 to vector<1x1xf32>
    %872 = arith.addf %855, %871 : vector<1x1xf32>
    %c0_291 = arith.constant 0 : index
    %c0_292 = arith.constant 0 : index
    %873 = vector.load %arg16[%c0_291, %c0_292] : memref<1x1xf32, #tpu.memory_space<vmem>>, vector<1x1xf32>
    tpu.vector_store %arg16[%c0_291, %c0_292], %872 {strides = array<i32>} : memref<1x1xf32, #tpu.memory_space<vmem>>, vector<1x1xf32>,
    return
  }
}

</mosaic_0001>

<bundles_post_ra>
// kernel: tpu_custom_call.1
= control target key start
LH: loop header
LB: loop body
LE: loop exit
PB: predicated region body
PF: predicated region fallthrough
CT: control target
= control target key end

     0   :  { %s3940_s0 = inlined_call_operand.hbm [shape: s32[8], index: 0, kind: input, shape index: {}]   ;;  %s3941_s1 = inlined_call_operand.hbm [shape: f32[6,6], index: 1, kind: input, shape index: {}]   ;;  %s3942_s2 = inlined_call_operand.hbm [shape: f32[8,16], index: 2, kind: input, shape index: {}]   ;;  %s3943_s3 = inlined_call_operand.vmem [shape: f32[16,64], index: 3, kind: input, shape index: {}]   ;;  %s3944_s4 = inlined_call_operand.vmem [shape: f32[16,64], index: 4, kind: input, shape index: {}]   ;;  %s3945_s5 = inlined_call_operand.vmem [shape: f32[1,64], index: 5, kind: input, shape index: {}]   ;;  %s3946_s6 = inlined_call_operand.vmem [shape: f32[16,64], index: 6, kind: input, shape index: {}]   ;;  %s3947_s7 = inlined_call_operand.vmem [shape: f32[16,64], index: 7, kind: input, shape index: {}]   ;;  %s3948_s8 = inlined_call_operand.hbm [shape: f32[1,64], index: 8, kind: input, shape index: {}]   ;;  %s3949_s9 = inlined_call_operand.hbm [shape: f32[2,1,16], index: 9, kind: input, shape index: {}]   ;;  %s3950_s10 = inlined_call_operand.hbm [shape: f32[2,1,16], index: 10, kind: input, shape index: {}]   ;;  %s3951_s11 = inlined_call_operand.vmem [shape: f32[16,6], index: 11, kind: input, shape index: {}]   ;;  %s3952_s12 = inlined_call_operand.vmem [shape: f32[16,6], index: 12, kind: input, shape index: {}]   ;;  %s3953_s13 = inlined_call_operand.vmem [shape: f32[1,6], index: 13, kind: input, shape index: {}]   ;;  %s3954_s14 = inlined_call_operand.vmem [shape: f32[6,6], index: 14, kind: input, shape index: {}]   ;;  %s3955_s15 = inlined_call_operand.hbm [shape: f32[1,1], index: 15, kind: output, shape index: {0}]   ;;  %s3956_s16 = inlined_call_operand.hbm [shape: f32[1,1], index: 16, kind: output, shape index: {1}]  }
   0x1   :  { %3958 = sst [smem:[#allocation26_spill]] %s3940_s0 }
   0x2   :  { %22 = vsyncpa [#allocation7], 0 }
   0x3   :  { %23 = vsyncpa [#allocation9], 0 }
   0x4   :  { %24 = vsyncpa [#allocation5], 0 }
   0x5   :  { %25 = vsyncpa [#allocation12], 0 }
   0x6   :  { %26 = vsyncpa [#allocation15], 0 }
   0x7   :  { %27 = vsyncpa [#allocation6], 0 }
   0x8   :  { %28 = vsyncpa [#allocation18], 0  ;;  %s3263_s21 = smov [#allocation11]   ;;  %s3097_s25 = scalar_lea.hbm %s3948_s8, 16 }
   0x9   :  { %s71_s22 = sshll.u32 %s3263_s21, 4  ;;  %p3098_p0 = scmp.ne.s32.totalorder %s3948_s8, %s3097_s25  ;;  %s72_s22 = int_to_ptr.vmem [resolvable:$true] %s71_s22 }
   0xa   :  { %p3101_p1 = scmp.lt.u32.totalorder %s3097_s25, %s3948_s8 }
   0xc   :  { %p3103_p2 = pnand %p3101_p1, %p3098_p0 }
   0xe   :  { %3106 = shalt.err (!%p3103_p2)
}
   0xf   :  { %s3107_s30 = scalar_lea.vmem %s72_s22, 16  ;;  %s3111_s0 = scalar_lea.vmem %s72_s22, 32 }
  0x10   :  { %p3108_p3 = scmp.ne.s32.totalorder %s72_s22, %s3107_s30  ;;  %p3112_p4 = scmp.lt.s32.totalorder %s72_s22, %s72_s22 }
  0x11   :  { %p3113_p5 = scmp.lt.s32.totalorder %s3111_s0, %s3107_s30 }
  0x13   :  { %p3114_p6 = por %p3113_p5, %p3112_p4 }
  0x15   :  { %p3115_p7 = pnand %p3114_p6, %p3108_p3 }
  0x17   :  { %3118 = shalt.err (!%p3115_p7)
}
  0x18   :  { %74 = dma.hbm_to_vmem [thread:$0]  %s3948_s8, 16, %s72_s22, [#allocation12]  }
  0x19   :  { %s3959_s21 = sld [smem:[#allocation26_spill]] }
  0x1f   :  { %s3119_s23 = scalar_lea.hbm %s3959_s21, 16 }
  0x20   :  { %p3120_p8 = scmp.ne.s32.totalorder %s3959_s21, %s3119_s23  ;;  %p3123_p9 = scmp.lt.u32.totalorder %s3119_s23, %s3959_s21 }
  0x22   :  { %p3125_p10 = pnand %p3123_p9, %p3120_p8 }
  0x24   :  { %3128 = shalt.err (!%p3125_p10)
}
  0x25   :  { %s3264_s28 = smov [#allocation4]   ;;  %s3129_s0 = scalar_lea.hbm %s3941_s1, 128 }
  0x26   :  { %36 = dma.hbm_to_smem %s3959_s21, 16, %s3264_s28, [#allocation7]  }
  0x27   :  { %p3130_p11 = scmp.ne.s32.totalorder %s3941_s1, %s3129_s0  ;;  %p3133_p12 = scmp.lt.u32.totalorder %s3129_s0, %s3941_s1 }
  0x29   :  { %p3135_p13 = pnand %p3133_p12, %p3130_p11 }
  0x2b   :  { %3138 = shalt.err (!%p3135_p13)
}
  0x2c   :  { %s3265_s23 = smov [#allocation8]   ;;  %s3266_s21 = smov [#allocation10]  }
  0x2d   :  { %44 = dma.hbm_to_smem %s3941_s1, 128, %s3265_s23, [#allocation9]  }
  0x2e   :  { %s51_s26 = sshll.u32 %s3266_s21, 4  ;;  %s3267_s27 = smov [#allocation13]   ;;  %s52_s26 = int_to_ptr.vmem [resolvable:$true] %s51_s26 }
  0x2f   :  { %s80_s28 = sshll.u32 %s3267_s27, 4  ;;  %s3139_s8 = scalar_lea.hbm %s3942_s2, 128  ;;  %s81_s28 = int_to_ptr.vmem [resolvable:$true] %s80_s28 }
  0x30   :  { %p3140_p0 = scmp.ne.s32.totalorder %s3942_s2, %s3139_s8  ;;  %p3143_p1 = scmp.lt.u32.totalorder %s3139_s8, %s3942_s2 }
  0x32   :  { %p3145_p2 = pnand %p3143_p1, %p3140_p0 }
  0x34   :  { %3148 = shalt.err (!%p3145_p2)
}
  0x35   :  { %s3149_s1 = scalar_lea.vmem %s52_s26, 128  ;;  %p3154_p4 = scmp.lt.s32.totalorder %s52_s26, %s52_s26 }
  0x36   :  { %p3150_p3 = scmp.ne.s32.totalorder %s52_s26, %s3149_s1  ;;  %p3155_p5 = scmp.lt.s32.totalorder %s3149_s1, %s3149_s1 }
  0x38   :  { %p3156_p6 = por %p3155_p5, %p3154_p4 }
  0x3a   :  { %p3157_p7 = pnand %p3156_p6, %p3150_p3 }
  0x3c   :  { %3160 = shalt.err (!%p3157_p7)
}
  0x3d   :  { %54 = dma.hbm_to_vmem [thread:$0]  %s3942_s2, 128, %s52_s26, [#allocation5]  }
  0x3e   :  { %s3161_s25 = scalar_lea.hbm %s3949_s9, 32 }
  0x3f   :  { %p3162_p8 = scmp.ne.s32.totalorder %s3949_s9, %s3161_s25  ;;  %p3165_p9 = scmp.lt.u32.totalorder %s3161_s25, %s3949_s9 }
  0x41   :  { %p3167_p10 = pnand %p3165_p9, %p3162_p8 }
  0x43   :  { %3170 = shalt.err (!%p3167_p10)
}
  0x44   :  { %s3171_s8 = scalar_lea.vmem %s81_s28, 32  ;;  %p3176_p12 = scmp.lt.s32.totalorder %s81_s28, %s81_s28 }
  0x45   :  { %p3172_p11 = scmp.ne.s32.totalorder %s81_s28, %s3171_s8  ;;  %p3177_p13 = scmp.lt.s32.totalorder %s3171_s8, %s3171_s8 }
  0x47   :  { %p3178_p0 = por %p3177_p13, %p3176_p12 }
  0x49   :  { %p3179_p1 = pnand %p3178_p0, %p3172_p11 }
  0x4b   :  { %3182 = shalt.err (!%p3179_p1)
}
  0x4c   :  { %s3268_s2 = smov 16   ;;  %s3269_s26 = smov 1  }
  0x4d   :  { %86 = dma.hbm_to_vmem [thread:$0]  %s3949_s9, 32, %s81_s28, [#allocation12], %s3268_s2, %s3268_s2, %s3269_s26  }
  0x4e   :  { %s3270_s0 = smov [#allocation14]   ;;  %s3183_s20 = scalar_lea.hbm %s3950_s10, 32 }
  0x4f   :  { %s92_s18 = sshll.u32 %s3270_s0, 4  ;;  %p3184_p2 = scmp.ne.s32.totalorder %s3950_s10, %s3183_s20  ;;  %s93_s18 = int_to_ptr.vmem [resolvable:$true] %s92_s18 }
  0x50   :  { %p3187_p3 = scmp.lt.u32.totalorder %s3183_s20, %s3950_s10 }
  0x52   :  { %p3189_p4 = pnand %p3187_p3, %p3184_p2 }
  0x54   :  { %3192 = shalt.err (!%p3189_p4)
}
  0x55   :  { %s3193_s27 = scalar_lea.vmem %s93_s18, 32  ;;  %p3198_p6 = scmp.lt.s32.totalorder %s93_s18, %s93_s18 }
  0x56   :  { %p3194_p5 = scmp.ne.s32.totalorder %s93_s18, %s3193_s27  ;;  %p3199_p7 = scmp.lt.s32.totalorder %s3193_s27, %s3193_s27 }
  0x58   :  { %p3200_p8 = por %p3199_p7, %p3198_p6 }
  0x5a   :  { %p3201_p9 = pnand %p3200_p8, %p3194_p5 }
  0x5c   :  { %3204 = shalt.err (!%p3201_p9)
}
  0x5d   :  { %98 = dma.hbm_to_vmem [thread:$0]  %s3950_s10, 32, %s93_s18, [#allocation15], %s3268_s2, %s3268_s2, %s3269_s26  }
  0x5e   :  { %3249 = dma.done.wait [#allocation7], 16  }
  0x5f   :  { %3250 = vsyncadd [#allocation7], 4294967280 }
  0x60   :  { %3251 = dma.done.wait [#allocation9], 128  }
  0x61   :  { %3252 = vsyncadd [#allocation9], 4294967168 }
  0x62   :  { %3253 = dma.done.wait [#allocation5], 128  }
  0x63   :  { %3254 = vsyncadd [#allocation5], 4294967168 }
  0x64   :  { %3255 = dma.done.wait [#allocation12], 48  }
  0x65   :  { %3256 = vsyncadd [#allocation12], 4294967248 }
  0x66   :  { %3257 = dma.done.wait [#allocation15], 32  }
  0x67   :  { %3258 = vsyncadd [#allocation15], 4294967264 }
  0x68   :  { %125 = sfence }
  0x69   :  { %v127_v0 = vld [vmem:[%s3943_s3] sm:$0xff]  ;;  %v128_v1 = vld [vmem:[%s3943_s3 + $0x8] sm:$0xff]  ;;  %v3271_v3 = vmov 0.0|0.0   ;;  %vm3272_vm0 = vmmov 0   ;;  %v3273_v7 = vmov 0.0   ;;  %v126_v12 = vld [vmem:[#allocation10] sm:$0xff] }
  0x6a   :  { %v210_v2 = vld [vmem:[%s3946_s6] sm:$0xff]  ;;  %2888 = vmatprep.subr.bf16.mxu0 %v3271_v3  ;;  %v2889_v4 = vpack.c.bf16 %v128_v1, %v127_v0  ;;  %2891 = vmatprep.subr.bf16.mxu1 %v3271_v3  ;;  %v211_v5 = vld [vmem:[%s3946_s6 + $0x8] sm:$0xff]  ;;  %vm136_vm1 = vcmask 130048   ;;  %v2651_v14 = vld [vmem:[#allocation14] ss:$0 sm:$0xff]  ;;  %s3275_s25 = smov 32  }
  0x6b   :  { %v289_v6 = vld [vmem:[%s3944_s4] sm:$0xff]  ;;  %2752 = vmatprep.mubr.msk.f32.mxu0 %vm3272_vm0, %v3273_v7  ;;  %v2892_v8 = vpack.c.bf16 %v211_v5, %v210_v2  ;;  %2759 = vmatprep.mubr.msk.f32.mxu1 %vm3272_vm0, %v3273_v7  ;;  %v290_v9 = vld [vmem:[%s3944_s4 + $0x8] sm:$0xff]  ;;  %v2652_v16 = vld [vmem:[#allocation14 + $0x1] ss:$0 sm:$0xff]  ;;  %s3276_s21 = smov 80   ;;  %vm514_vm2 = vcmask 122880  }
  0x6c   :  { %v291_v10 = vld [vmem:[%s3947_s7] sm:$0xff]  ;;  %v292_v11 = vld [vmem:[%s3947_s7 + $0x8] sm:$0xff]  ;;  %2890 = vmatpush3.bf16.msra.mxu0 %v2889_v4  ;;  %v3471_v13 = vpack.c.bf16 %v290_v9, %v289_v6  ;;  %460 = vrot.lane.b32.xlu1 %v2651_v14, %s3268_s2  ;;  %v293_v17 = vld [vmem:[#allocation13] sm:$0x1]  ;;  %vm520_vm3 = vcmask 130055   ;;  %vm731_vm4 = vcmask 123905  }
  0x6d   :  { %2893 = vmatpush3.bf16.msra.mxu1 %v2892_v8  ;;  %2894 = vmatprep.subr.bf16.mxu0 %v3271_v3  ;;  %v3474_v15 = vpack.c.bf16 %v292_v11, %v291_v10  ;;  %v296_v18 = vld [vmem:[#allocation13 + $0x1] sm:$0x1]  ;;  %v2645_v19 = vld [vmem:[%s3945_s5] ss:$0 sm:$0xff]  ;;  %v2647_v22 = vld [vmem:[#allocation11] ss:$0 sm:$0xff] }
  0x6e   :  { %2897 = vmatprep.subr.bf16.mxu1 %v3271_v3  ;;  %s3274_s5 = smov 96   ;;  %vm737_vm5 = vcmask 129030   ;;  %vm951_vm6 = vcmask 124930   ;;  %vm957_vm7 = vcmask 128005   ;;  %vm1171_vm8 = vcmask 125955   ;;  %s3832_s26 = sld [smem:[#allocation4 + $0x2]] }
  0x6f   :  { %2753 = vmatmul.mubr.msk.f32.vlgmr.msra.gmra.mrb[0].mxu0 %vm136_vm1, %v126_v12  ;;  %vm1177_vm9 = vcmask 126980   ;;  %vm2216_vm11 = vcmask 46080   ;;  %s3835_s17 = sld [smem:[#allocation4 + $0x3]]  ;;  %s3839_s0 = sld [smem:[#allocation4 + $0x5]]  ;;  %vm2291_vm14 = vcmask 41985  }
  0x70   :  { %2896 = vmatpush3.bf16.msra.mxu0 %v3471_v13  ;;  %2760 = vmatmul.mubr.msk.f32.vlgmr.msra.gmra.mrb[0].mxu1 %vm136_vm1, %v126_v12  ;;  %s3845_s18 = sld [smem:[#allocation4 + $0x7]]  ;;  %s3860_s1 = sld [smem:[#allocation4]] }
  0x71   :  { %2766 = vmatprep.mubr.msk.f32.mxu0 %vm3272_vm0, %v3273_v7  ;;  %2899 = vmatpush3.bf16.msra.mxu1 %v3474_v15  ;;  %s3871_s3 = sld [smem:[#allocation4 + $0x4]]  ;;  %s3873_s19 = sld [smem:[#allocation4 + $0x6]] }
  0x72   :  { %2773 = vmatprep.mubr.msk.f32.mxu1 %vm3272_vm0, %v3273_v7  ;;  %490 = vrot.lane.b32.xlu1 %v2652_v16, %s3268_s2 }
  0x73   :  { %2767 = vmatmul.mubr.msk.f32.vlgmr.msra.gmra.mrb[2].mxu0 %vm136_vm1, %v293_v17  ;;  %2900 = vmatprep.subr.bf16.mxu0 %v3271_v3 }
  0x74   :  { %2774 = vmatmul.mubr.msk.f32.vlgmr.msra.gmra.mrb[2].mxu1 %vm136_vm1, %v296_v18  ;;  %2902 = vmatpush3.bf16.msra.mxu0 %v3471_v13 }
  0x75   :  { %2780 = vmatprep.mubr.msk.f32.mxu0 %vm3272_vm0, %v3273_v7  ;;  %2903 = vmatprep.subr.bf16.mxu1 %v3271_v3  ;;  %s2420_s22 = sshra.s32 %s3835_s17, 7 }
  0x76   :  { %2905 = vmatpush3.bf16.msra.mxu1 %v3474_v15  ;;  %2787 = vmatprep.mubr.msk.f32.mxu1 %vm3272_vm0, %v3273_v7  ;;  %s2279_s20 = sshra.s32 %s3860_s1, 7  ;;  %s2670_s6 = sshll.u32 %s3860_s1, 7 }
  0x77   :  { %2906 = vmatprep.subr.bf16.mxu0 %v3271_v3  ;;  %2909 = vmatprep.subr.bf16.mxu1 %v3271_v3  ;;  %s2284_s4 = sand.u32 127, %s3860_s1  ;;  %s2422_s10 = sadd.s32 %s3871_s3, %s2420_s22 }
  0xde   :  { %v461_v48 = vpop.permute.xlu1 %460 }
  0xe4   :  { %v491_v50 = vpop.permute.xlu1 %490 }
 0x142   :  { %v206_v20 = vpop.f32.mrb[0].mxu0 }
 0x143   :  { %v2754_v21 = vpop.f32.mrb[1].mxu0  ;;  %v285_v23 = vpop.f32.mrb[0].mxu1  ;;  %v3502_v25 = vadd.f32 %v2645_v19, %v206_v20 }
 0x144   :  { %v2761_v24 = vpop.f32.mrb[1].mxu1  ;;  %v3504_v26 = vadd.f32 %v2647_v22, %v285_v23 }
 0x146   :  { %v368_v27 = vpop.f32.mrb[2].mxu0 }
 0x147   :  { %v372_v28 = vadd.f32 %v368_v27, %v3502_v25  ;;  %v2768_v29 = vpop.f32.mrb[3].mxu0  ;;  %v442_v30 = vpop.f32.mrb[2].mxu1 }
 0x148   :  { %v447_v31 = vrot.slane %v442_v30, 1  ;;  %v2775_v32 = vpop.f32.mrb[3].mxu1 }
 0x149   :  { %2965 = vtanh.f32 %v372_v28  ;;  %v450_v36 = vmul.f32 0.5, %v372_v28 }
 0x14a   :  { %v449_v33 = vadd.f32 %v447_v31, %v3504_v26 }
 0x14c   :  { %2967 = vtanh.f32 %v449_v33  ;;  %v480_v37 = vmul.f32 0.5, %v449_v33 }
 0x14d   :  { %2969 = vtanh.f32 %v450_v36 }
 0x14e   :  { %2971 = vtanh.f32 %v480_v37 }
 0x153   :  { %v2966_v34 = vpop.eup %2965 }
 0x154   :  { %465 = vrot.lane.b32.xlu0 %v2966_v34, %s3274_s5 }
 0x156   :  { %v2968_v35 = vpop.eup %2967 }
 0x157   :  { %v2970_v38 = vpop.eup %2969 }
 0x158   :  { %495 = vrot.lane.b32.xlu0 %v2968_v35, %s3274_s5  ;;  %v452_v39 = vmul.f32 0.5, %v2970_v38  ;;  %v2972_v40 = vpop.eup %2971 }
 0x159   :  { %v482_v42 = vmul.f32 0.5, %v2972_v40 }
 0x15a   :  { %v453_v41 = vadd.f32 0.5, %v452_v39 }
 0x15b   :  { %v483_v45 = vadd.f32 0.5, %v482_v42 }
 0x15c   :  { %v463_v49 = vmul.f32 %v461_v48, %v453_v41 }
 0x15d   :  { %v493_v53 = vmul.f32 %v491_v50, %v483_v45 }
 0x1c6   :  { %v466_v43 = vpop.permute.xlu0 %465 }
 0x1c7   :  { %v468_v44 = vmul.f32 %v466_v43, %v453_v41 }
 0x1c9   :  { %470 = vrot.lane.b32.xlu0 %v468_v44, %s3268_s2 }
 0x1ca   :  { %v496_v46 = vpop.permute.xlu0 %495 }
 0x1cb   :  { %v498_v47 = vmul.f32 %v496_v46, %v483_v45 }
 0x1cd   :  { %500 = vrot.lane.b32.xlu1 %v498_v47, %s3268_s2 }
 0x23b   :  { %v471_v51 = vpop.permute.xlu0 %470 }
 0x23c   :  { %v3512_v52 = vadd.f32 %v471_v51, %v463_v49 }
 0x23e   :  { %2973 = vtanh.f32 %v3512_v52  ;;  %v683_v29 = vrot.slane %v3512_v52, 7 }
 0x23f   :  { %v501_v54 = vpop.permute.xlu1 %500 }
 0x240   :  { %v3515_v55 = vadd.f32 %v501_v54, %v493_v53 }
 0x242   :  { %2975 = vtanh.f32 %v3515_v55  ;;  %v708_v33 = vrot.slane %v3515_v55, 1 }
 0x248   :  { %v2974_v56 = vpop.eup %2973 }
 0x249   :  { %476 = vrot.lane.b32.xlu0 %v2974_v56, %s3275_s25 }
 0x24c   :  { %v2976_v57 = vpop.eup %2975 }
 0x24d   :  { %506 = vrot.lane.b32.xlu1 %v2976_v57, %s3275_s25 }
 0x2bb   :  { %v477_v58 = vpop.permute.xlu0 %476 }
 0x2bc   :  { %v479_v59 = vmul.f32 %v477_v58, %v453_v41 }
 0x2be   :  { %511 = vrot.lane.b32.xlu0 %v479_v59, %s3276_s21 }
 0x2bf   :  { %v507_v60 = vpop.permute.xlu1 %506 }
 0x2c0   :  { %v3521_v61 = vmul.f32 %v507_v60, %v483_v45 }
 0x2c2   :  { %v598_v62 = vrot.slane %v3521_v61, 7 }
 0x2c4   :  { %599 = vrot.lane.b32.xlu1 %v598_v62, %s3276_s21 }
 0x330   :  { %v512_v63 = vpop.permute.xlu0 %511 }
 0x331   :  { %2781 = vmatmul.mubr.msk.f32.vlgmr.msra.gmra.mrb[4].mxu0 %vm136_vm1, %v512_v63  ;;  %515 = vst.msk [vmem:[#allocation2] sm:$0x1] %vm514_vm2, %v512_v63 }
 0x332   :  { %2908 = vmatpush3.bf16.msra.mxu0 %v3471_v13  ;;  %2794 = vmatprep.mubr.msk.f32.mxu0 %vm3272_vm0, %v3273_v7 }
 0x333   :  { %2912 = vmatprep.subr.bf16.mxu0 %v3271_v3 }
 0x336   :  { %v600_v0 = vpop.permute.xlu1 %599 }
 0x337   :  { %2788 = vmatmul.mubr.msk.f32.vlgmr.msra.gmra.mrb[4].mxu1 %vm136_vm1, %v600_v0 }
 0x338   :  { %2911 = vmatpush3.bf16.msra.mxu1 %v3474_v15  ;;  %2801 = vmatprep.mubr.msk.f32.mxu1 %vm3272_vm0, %v3273_v7 }
 0x339   :  { %2915 = vmatprep.subr.bf16.mxu1 %v3271_v3 }
 0x404   :  { %v590_v1 = vpop.f32.mrb[4].mxu0 }
 0x405   :  { %v595_v2 = vrot.slane %v590_v1, 7  ;;  %v2782_v4 = vpop.f32.mrb[5].mxu0 }
 0x407   :  { %v597_v5 = vadd.f32 %v595_v2, %v3502_v25 }
 0x409   :  { %2977 = vtanh.f32 %v597_v5  ;;  %v677_v14 = vmul.f32 0.5, %v597_v5 }
 0x40a   :  { %v669_v6 = vpop.f32.mrb[4].mxu1 }
 0x40b   :  { %v674_v8 = vrot.slane %v669_v6, 2  ;;  %v2789_v9 = vpop.f32.mrb[5].mxu1 }
 0x40d   :  { %v676_v10 = vadd.f32 %v674_v8, %v3504_v26 }
 0x40f   :  { %2979 = vtanh.f32 %v676_v10  ;;  %v702_v16 = vmul.f32 0.5, %v676_v10 }
 0x410   :  { %2981 = vtanh.f32 %v677_v14 }
 0x411   :  { %2983 = vtanh.f32 %v702_v16 }
 0x413   :  { %v2978_v11 = vpop.eup %2977 }
 0x414   :  { %687 = vrot.lane.b32.xlu0 %v2978_v11, %s3274_s5 }
 0x419   :  { %v2980_v12 = vpop.eup %2979 }
 0x41a   :  { %712 = vrot.lane.b32.xlu1 %v2980_v12, %s3274_s5  ;;  %v2982_v17 = vpop.eup %2981 }
 0x41b   :  { %v679_v18 = vmul.f32 0.5, %v2982_v17  ;;  %v2984_v19 = vpop.eup %2983 }
 0x41c   :  { %v704_v23 = vmul.f32 0.5, %v2984_v19 }
 0x41d   :  { %v680_v20 = vadd.f32 0.5, %v679_v18 }
 0x41e   :  { %v705_v24 = vadd.f32 0.5, %v704_v23 }
 0x41f   :  { %v685_v30 = vmul.f32 %v683_v29, %v680_v20 }
 0x420   :  { %v710_v34 = vmul.f32 %v708_v33, %v705_v24 }
 0x486   :  { %v688_v21 = vpop.permute.xlu0 %687 }
 0x487   :  { %v690_v22 = vmul.f32 %v688_v21, %v680_v20 }
 0x489   :  { %692 = vrot.lane.b32.xlu0 %v690_v22, %s3268_s2 }
 0x48c   :  { %v713_v27 = vpop.permute.xlu1 %712 }
 0x48d   :  { %v715_v28 = vmul.f32 %v713_v27, %v705_v24 }
 0x48f   :  { %717 = vrot.lane.b32.xlu1 %v715_v28, %s3268_s2 }
 0x4fb   :  { %v693_v31 = vpop.permute.xlu0 %692 }
 0x4fc   :  { %v695_v32 = vadd.f32 %v693_v31, %v685_v30 }
 0x4fe   :  { %2985 = vtanh.f32 %v695_v32  ;;  %v903_v8 = vrot.slane %v695_v32, 7 }
 0x501   :  { %v718_v35 = vpop.permute.xlu1 %717 }
 0x502   :  { %v720_v36 = vadd.f32 %v718_v35, %v710_v34 }
 0x504   :  { %2987 = vtanh.f32 %v720_v36  ;;  %v928_v12 = vrot.slane %v720_v36, 1 }
 0x508   :  { %v2986_v37 = vpop.eup %2985 }
 0x509   :  { %698 = vrot.lane.b32.xlu0 %v2986_v37, %s3275_s25 }
 0x50e   :  { %v2988_v38 = vpop.eup %2987 }
 0x50f   :  { %723 = vrot.lane.b32.xlu1 %v2988_v38, %s3275_s25 }
 0x57b   :  { %v699_v39 = vpop.permute.xlu0 %698 }
 0x57c   :  { %v3546_v40 = vmul.f32 %v699_v39, %v680_v20 }
 0x57e   :  { %v739_v41 = vrot.slane %v3546_v40, 1 }
 0x580   :  { %740 = vrot.lane.b32.xlu0 %v739_v41, %s3276_s21 }
 0x581   :  { %v724_v42 = vpop.permute.xlu1 %723 }
 0x582   :  { %v3550_v43 = vmul.f32 %v724_v42, %v705_v24 }
 0x584   :  { %v818_v44 = vrot.slane %v3550_v43, 6 }
 0x586   :  { %819 = vrot.lane.b32.xlu1 %v818_v44, %s3276_s21 }
 0x5f2   :  { %v741_v45 = vpop.permute.xlu0 %740 }
 0x5f3   :  { %2795 = vmatmul.mubr.msk.f32.vlgmr.msra.gmra.mrb[6].mxu0 %vm136_vm1, %v741_v45 }
 0x5f4   :  { %2914 = vmatpush3.bf16.msra.mxu0 %v3471_v13  ;;  %2808 = vmatprep.mubr.msk.f32.mxu0 %vm3272_vm0, %v3273_v7 }
 0x5f5   :  { %2918 = vmatprep.subr.bf16.mxu0 %v3271_v3 }
 0x5f8   :  { %v820_v46 = vpop.permute.xlu1 %819 }
 0x5f9   :  { %2802 = vmatmul.mubr.msk.f32.vlgmr.msra.gmra.mrb[6].mxu1 %vm136_vm1, %v820_v46 }
 0x5fa   :  { %2917 = vmatpush3.bf16.msra.mxu1 %v3474_v15  ;;  %2815 = vmatprep.mubr.msk.f32.mxu1 %vm3272_vm0, %v3273_v7 }
 0x5fb   :  { %2921 = vmatprep.subr.bf16.mxu1 %v3271_v3 }
 0x6c6   :  { %v810_v47 = vpop.f32.mrb[6].mxu0 }
 0x6c7   :  { %v815_v48 = vrot.slane %v810_v47, 6  ;;  %v2796_v49 = vpop.f32.mrb[7].mxu0 }
 0x6c9   :  { %v817_v50 = vadd.f32 %v815_v48, %v3502_v25 }
 0x6cb   :  { %2989 = vtanh.f32 %v817_v50  ;;  %v897_v57 = vmul.f32 0.5, %v817_v50 }
 0x6cc   :  { %v889_v51 = vpop.f32.mrb[6].mxu1 }
 0x6cd   :  { %v894_v52 = vrot.slane %v889_v51, 3  ;;  %v2803_v53 = vpop.f32.mrb[7].mxu1 }
 0x6cf   :  { %v896_v54 = vadd.f32 %v894_v52, %v3504_v26 }
 0x6d1   :  { %2991 = vtanh.f32 %v896_v54  ;;  %v922_v58 = vmul.f32 0.5, %v896_v54 }
 0x6d2   :  { %2993 = vtanh.f32 %v897_v57 }
 0x6d3   :  { %2995 = vtanh.f32 %v922_v58 }
 0x6d5   :  { %v2990_v55 = vpop.eup %2989 }
 0x6d6   :  { %907 = vrot.lane.b32.xlu0 %v2990_v55, %s3274_s5 }
 0x6db   :  { %v2992_v56 = vpop.eup %2991 }
 0x6dc   :  { %932 = vrot.lane.b32.xlu1 %v2992_v56, %s3274_s5  ;;  %v2994_v59 = vpop.eup %2993 }
 0x6dd   :  { %v899_v60 = vmul.f32 0.5, %v2994_v59  ;;  %v2996_v62 = vpop.eup %2995 }
 0x6de   :  { %v924_v2 = vmul.f32 0.5, %v2996_v62 }
 0x6df   :  { %v900_v63 = vadd.f32 0.5, %v899_v60 }
 0x6e0   :  { %v925_v4 = vadd.f32 0.5, %v924_v2 }
 0x6e1   :  { %v905_v9 = vmul.f32 %v903_v8, %v900_v63 }
 0x6e2   :  { %v930_v14 = vmul.f32 %v928_v12, %v925_v4 }
 0x748   :  { %v908_v0 = vpop.permute.xlu0 %907 }
 0x749   :  { %v910_v1 = vmul.f32 %v908_v0, %v900_v63 }
 0x74b   :  { %912 = vrot.lane.b32.xlu0 %v910_v1, %s3268_s2 }
 0x74e   :  { %v933_v5 = vpop.permute.xlu1 %932 }
 0x74f   :  { %v935_v6 = vmul.f32 %v933_v5, %v925_v4 }
 0x751   :  { %937 = vrot.lane.b32.xlu1 %v935_v6, %s3268_s2 }
 0x7bd   :  { %v913_v10 = vpop.permute.xlu0 %912 }
 0x7be   :  { %v915_v11 = vadd.f32 %v913_v10, %v905_v9 }
 0x7c0   :  { %2997 = vtanh.f32 %v915_v11  ;;  %v1123_v54 = vrot.slane %v915_v11, 7 }
 0x7c3   :  { %v938_v16 = vpop.permute.xlu1 %937 }
 0x7c4   :  { %v940_v17 = vadd.f32 %v938_v16, %v930_v14 }
 0x7c6   :  { %2999 = vtanh.f32 %v940_v17  ;;  %v1148_v58 = vrot.slane %v940_v17, 1 }
 0x7ca   :  { %v2998_v18 = vpop.eup %2997 }
 0x7cb   :  { %918 = vrot.lane.b32.xlu0 %v2998_v18, %s3275_s25 }
 0x7d0   :  { %v3000_v19 = vpop.eup %2999 }
 0x7d1   :  { %943 = vrot.lane.b32.xlu1 %v3000_v19, %s3275_s25 }
 0x83d   :  { %v919_v20 = vpop.permute.xlu0 %918 }
 0x83e   :  { %v3572_v21 = vmul.f32 %v919_v20, %v900_v63 }
 0x840   :  { %v959_v22 = vrot.slane %v3572_v21, 2 }
 0x842   :  { %960 = vrot.lane.b32.xlu0 %v959_v22, %s3276_s21 }
 0x843   :  { %v944_v23 = vpop.permute.xlu1 %943 }
 0x844   :  { %v3576_v24 = vmul.f32 %v944_v23, %v925_v4 }
 0x846   :  { %v1038_v27 = vrot.slane %v3576_v24, 5 }
 0x848   :  { %1039 = vrot.lane.b32.xlu1 %v1038_v27, %s3276_s21 }
 0x8b4   :  { %v961_v28 = vpop.permute.xlu0 %960 }
 0x8b5   :  { %2809 = vmatmul.mubr.msk.f32.vlgmr.msra.gmra.mrb[8].mxu0 %vm136_vm1, %v961_v28 }
 0x8b6   :  { %2920 = vmatpush3.bf16.msra.mxu0 %v3471_v13  ;;  %2822 = vmatprep.mubr.msk.f32.mxu0 %vm3272_vm0, %v3273_v7 }
 0x8b7   :  { %2924 = vmatprep.subr.bf16.mxu0 %v3271_v3 }
 0x8ba   :  { %v1040_v29 = vpop.permute.xlu1 %1039 }
 0x8bb   :  { %2816 = vmatmul.mubr.msk.f32.vlgmr.msra.gmra.mrb[8].mxu1 %vm136_vm1, %v1040_v29 }
 0x8bc   :  { %2923 = vmatpush3.bf16.msra.mxu1 %v3474_v15  ;;  %2829 = vmatprep.mubr.msk.f32.mxu1 %vm3272_vm0, %v3273_v7 }
 0x8bd   :  { %2927 = vmatprep.subr.bf16.mxu1 %v3271_v3 }
 0x988   :  { %v1030_v30 = vpop.f32.mrb[8].mxu0 }
 0x989   :  { %v1035_v31 = vrot.slane %v1030_v30, 5  ;;  %v2810_v32 = vpop.f32.mrb[9].mxu0 }
 0x98b   :  { %v1037_v33 = vadd.f32 %v1035_v31, %v3502_v25 }
 0x98d   :  { %3001 = vtanh.f32 %v1037_v33  ;;  %v1117_v41 = vmul.f32 0.5, %v1037_v33 }
 0x98e   :  { %v1109_v34 = vpop.f32.mrb[8].mxu1 }
 0x98f   :  { %v1114_v35 = vrot.slane %v1109_v34, 4  ;;  %v2817_v36 = vpop.f32.mrb[9].mxu1 }
 0x991   :  { %v1116_v37 = vadd.f32 %v1114_v35, %v3504_v26 }
 0x993   :  { %3003 = vtanh.f32 %v1116_v37  ;;  %v1142_v42 = vmul.f32 0.5, %v1116_v37 }
 0x994   :  { %3005 = vtanh.f32 %v1117_v41 }
 0x995   :  { %3007 = vtanh.f32 %v1142_v42 }
 0x997   :  { %v3002_v38 = vpop.eup %3001 }
 0x998   :  { %1127 = vrot.lane.b32.xlu0 %v3002_v38, %s3274_s5 }
 0x99d   :  { %v3004_v39 = vpop.eup %3003 }
 0x99e   :  { %1152 = vrot.lane.b32.xlu1 %v3004_v39, %s3274_s5  ;;  %v3006_v44 = vpop.eup %3005 }
 0x99f   :  { %v1119_v45 = vmul.f32 0.5, %v3006_v44  ;;  %v3008_v46 = vpop.eup %3007 }
 0x9a0   :  { %v1144_v50 = vmul.f32 0.5, %v3008_v46 }
 0x9a1   :  { %v1120_v47 = vadd.f32 0.5, %v1119_v45 }
 0x9a2   :  { %v1145_v51 = vadd.f32 0.5, %v1144_v50 }
 0x9a3   :  { %v1125_v55 = vmul.f32 %v1123_v54, %v1120_v47 }
 0x9a4   :  { %v1150_v59 = vmul.f32 %v1148_v58, %v1145_v51 }
 0xa0a   :  { %v1128_v48 = vpop.permute.xlu0 %1127 }
 0xa0b   :  { %v1130_v49 = vmul.f32 %v1128_v48, %v1120_v47 }
 0xa0d   :  { %1132 = vrot.lane.b32.xlu0 %v1130_v49, %s3268_s2 }
 0xa10   :  { %v1153_v52 = vpop.permute.xlu1 %1152 }
 0xa11   :  { %v1155_v53 = vmul.f32 %v1153_v52, %v1145_v51 }
 0xa13   :  { %1157 = vrot.lane.b32.xlu1 %v1155_v53, %s3268_s2 }
 0xa7f   :  { %v1133_v56 = vpop.permute.xlu0 %1132 }
 0xa80   :  { %v1135_v57 = vadd.f32 %v1133_v56, %v1125_v55 }
 0xa82   :  { %3009 = vtanh.f32 %v1135_v57  ;;  %v1343_v39 = vrot.slane %v1135_v57, 7 }
 0xa85   :  { %v1158_v60 = vpop.permute.xlu1 %1157 }
 0xa86   :  { %v1160_v62 = vadd.f32 %v1158_v60, %v1150_v59 }
 0xa88   :  { %3011 = vtanh.f32 %v1160_v62  ;;  %v1368_v45 = vrot.slane %v1160_v62, 1 }
 0xa8c   :  { %v3010_v63 = vpop.eup %3009 }
 0xa8d   :  { %1138 = vrot.lane.b32.xlu0 %v3010_v63, %s3275_s25 }
 0xa92   :  { %v3012_v0 = vpop.eup %3011 }
 0xa93   :  { %1163 = vrot.lane.b32.xlu1 %v3012_v0, %s3275_s25 }
 0xaff   :  { %v1139_v1 = vpop.permute.xlu0 %1138 }
 0xb00   :  { %v3598_v2 = vmul.f32 %v1139_v1, %v1120_v47 }
 0xb02   :  { %v1179_v4 = vrot.slane %v3598_v2, 3 }
 0xb04   :  { %1180 = vrot.lane.b32.xlu0 %v1179_v4, %s3276_s21 }
 0xb05   :  { %v1164_v5 = vpop.permute.xlu1 %1163 }
 0xb06   :  { %v3602_v6 = vmul.f32 %v1164_v5, %v1145_v51 }
 0xb08   :  { %v1258_v8 = vrot.slane %v3602_v6, 4 }
 0xb0a   :  { %1259 = vrot.lane.b32.xlu1 %v1258_v8, %s3276_s21 }
 0xb76   :  { %v1181_v9 = vpop.permute.xlu0 %1180 }
 0xb77   :  { %2823 = vmatmul.mubr.msk.f32.vlgmr.msra.gmra.mrb[10].mxu0 %vm136_vm1, %v1181_v9 }
 0xb78   :  { %2926 = vmatpush3.bf16.msra.mxu0 %v3471_v13  ;;  %2836 = vmatprep.mubr.msk.f32.mxu0 %vm3272_vm0, %v3273_v7 }
 0xb79   :  { %2930 = vmatprep.subr.bf16.mxu0 %v3271_v3 }
 0xb7c   :  { %v1260_v10 = vpop.permute.xlu1 %1259 }
 0xb7d   :  { %2830 = vmatmul.mubr.msk.f32.vlgmr.msra.gmra.mrb[10].mxu1 %vm136_vm1, %v1260_v10 }
 0xb7e   :  { %2929 = vmatpush3.bf16.msra.mxu1 %v3474_v15  ;;  %2843 = vmatprep.mubr.msk.f32.mxu1 %vm3272_vm0, %v3273_v7 }
 0xb7f   :  { %2933 = vmatprep.subr.bf16.mxu1 %v3271_v3 }
 0xc4a   :  { %v1250_v11 = vpop.f32.mrb[10].mxu0 }
 0xc4b   :  { %v1255_v12 = vrot.slane %v1250_v11, 4  ;;  %v2824_v14 = vpop.f32.mrb[11].mxu0 }
 0xc4d   :  { %v1257_v16 = vadd.f32 %v1255_v12, %v3502_v25 }
 0xc4f   :  { %3013 = vtanh.f32 %v1257_v16  ;;  %v1337_v27 = vmul.f32 0.5, %v1257_v16 }
 0xc50   :  { %v1329_v17 = vpop.f32.mrb[10].mxu1 }
 0xc51   :  { %v1334_v18 = vrot.slane %v1329_v17, 5  ;;  %v2831_v19 = vpop.f32.mrb[11].mxu1 }
 0xc53   :  { %v1336_v20 = vadd.f32 %v1334_v18, %v3504_v26 }
 0xc55   :  { %3015 = vtanh.f32 %v1336_v20  ;;  %v1362_v28 = vmul.f32 0.5, %v1336_v20 }
 0xc56   :  { %3017 = vtanh.f32 %v1337_v27 }
 0xc57   :  { %3019 = vtanh.f32 %v1362_v28 }
 0xc59   :  { %v3014_v22 = vpop.eup %3013 }
 0xc5a   :  { %1347 = vrot.lane.b32.xlu0 %v3014_v22, %s3274_s5 }
 0xc5f   :  { %v3016_v23 = vpop.eup %3015 }
 0xc60   :  { %1372 = vrot.lane.b32.xlu1 %v3016_v23, %s3274_s5  ;;  %v3018_v29 = vpop.eup %3017 }
 0xc61   :  { %v1339_v30 = vmul.f32 0.5, %v3018_v29  ;;  %v3020_v31 = vpop.eup %3019 }
 0xc62   :  { %v1364_v35 = vmul.f32 0.5, %v3020_v31 }
 0xc63   :  { %v1340_v32 = vadd.f32 0.5, %v1339_v30 }
 0xc64   :  { %v1365_v36 = vadd.f32 0.5, %v1364_v35 }
 0xc65   :  { %v1345_v41 = vmul.f32 %v1343_v39, %v1340_v32 }
 0xc66   :  { %v1370_v46 = vmul.f32 %v1368_v45, %v1365_v36 }
 0xccc   :  { %v1348_v33 = vpop.permute.xlu0 %1347 }
 0xccd   :  { %v1350_v34 = vmul.f32 %v1348_v33, %v1340_v32 }
 0xccf   :  { %1352 = vrot.lane.b32.xlu0 %v1350_v34, %s3268_s2 }
 0xcd2   :  { %v1373_v37 = vpop.permute.xlu1 %1372 }
 0xcd3   :  { %v1375_v38 = vmul.f32 %v1373_v37, %v1365_v36 }
 0xcd5   :  { %1377 = vrot.lane.b32.xlu1 %v1375_v38, %s3268_s2 }
 0xd41   :  { %v1353_v42 = vpop.permute.xlu0 %1352 }
 0xd42   :  { %v1355_v44 = vadd.f32 %v1353_v42, %v1345_v41 }
 0xd44   :  { %3021 = vtanh.f32 %v1355_v44  ;;  %v1561_v28 = vrot.slane %v1355_v44, 7 }
 0xd47   :  { %v1378_v47 = vpop.permute.xlu1 %1377 }
 0xd48   :  { %v1380_v48 = vadd.f32 %v1378_v47, %v1370_v46 }
 0xd4a   :  { %3023 = vtanh.f32 %v1380_v48 }
 0xd4e   :  { %v3022_v49 = vpop.eup %3021 }
 0xd4f   :  { %1358 = vrot.lane.b32.xlu0 %v3022_v49, %s3275_s25 }
 0xd54   :  { %v3024_v50 = vpop.eup %3023 }
 0xd55   :  { %1383 = vrot.lane.b32.xlu1 %v3024_v50, %s3275_s25 }
 0xdc1   :  { %v1359_v51 = vpop.permute.xlu0 %1358 }
 0xdc2   :  { %v3624_v52 = vmul.f32 %v1359_v51, %v1340_v32  ;;  %v1586_v32 = vrot.slane %v1380_v48, 1 }
 0xdc4   :  { %v1397_v53 = vrot.slane %v3624_v52, 4 }
 0xdc6   :  { %1398 = vrot.lane.b32.xlu0 %v1397_v53, %s3276_s21 }
 0xdc7   :  { %v1384_v54 = vpop.permute.xlu1 %1383 }
 0xdc8   :  { %v3628_v55 = vmul.f32 %v1384_v54, %v1365_v36 }
 0xdca   :  { %v1476_v56 = vrot.slane %v3628_v55, 3 }
 0xdcc   :  { %1477 = vrot.lane.b32.xlu1 %v1476_v56, %s3276_s21 }
 0xe38   :  { %v1399_v57 = vpop.permute.xlu0 %1398 }
 0xe39   :  { %2837 = vmatmul.mubr.msk.f32.vlgmr.msra.gmra.mrb[12].mxu0 %vm136_vm1, %v1399_v57 }
 0xe3a   :  { %2932 = vmatpush3.bf16.msra.mxu0 %v3471_v13  ;;  %2850 = vmatprep.mubr.msk.f32.mxu0 %vm3272_vm0, %v3273_v7 }
 0xe3b   :  { %2936 = vmatprep.subr.bf16.mxu0 %v3271_v3 }
 0xe3e   :  { %v1478_v58 = vpop.permute.xlu1 %1477 }
 0xe3f   :  { %2844 = vmatmul.mubr.msk.f32.vlgmr.msra.gmra.mrb[12].mxu1 %vm136_vm1, %v1478_v58 }
 0xe40   :  { %2935 = vmatpush3.bf16.msra.mxu1 %v3474_v15  ;;  %2857 = vmatprep.mubr.msk.f32.mxu1 %vm3272_vm0, %v3273_v7 }
 0xe41   :  { %2939 = vmatprep.subr.bf16.mxu1 %v3271_v3 }
 0xf0c   :  { %v1468_v59 = vpop.f32.mrb[12].mxu0 }
 0xf0d   :  { %v1473_v60 = vrot.slane %v1468_v59, 3  ;;  %v2838_v62 = vpop.f32.mrb[13].mxu0 }
 0xf0f   :  { %v1475_v63 = vadd.f32 %v1473_v60, %v3502_v25 }
 0xf11   :  { %3025 = vtanh.f32 %v1475_v63  ;;  %v1555_v10 = vmul.f32 0.5, %v1475_v63 }
 0xf12   :  { %v1547_v0 = vpop.f32.mrb[12].mxu1 }
 0xf13   :  { %v1552_v1 = vrot.slane %v1547_v0, 6  ;;  %v2845_v4 = vpop.f32.mrb[13].mxu1 }
 0xf15   :  { %v1554_v5 = vadd.f32 %v1552_v1, %v3504_v26 }
 0xf17   :  { %3027 = vtanh.f32 %v1554_v5  ;;  %v1580_v11 = vmul.f32 0.5, %v1554_v5 }
 0xf18   :  { %3029 = vtanh.f32 %v1555_v10 }
 0xf19   :  { %3031 = vtanh.f32 %v1580_v11 }
 0xf1b   :  { %v3026_v8 = vpop.eup %3025 }
 0xf1c   :  { %1565 = vrot.lane.b32.xlu0 %v3026_v8, %s3274_s5 }
 0xf21   :  { %v3028_v9 = vpop.eup %3027 }
 0xf22   :  { %1590 = vrot.lane.b32.xlu1 %v3028_v9, %s3274_s5  ;;  %v3030_v12 = vpop.eup %3029 }
 0xf23   :  { %v1557_v14 = vmul.f32 0.5, %v3030_v12  ;;  %v3032_v16 = vpop.eup %3031 }
 0xf24   :  { %v1582_v20 = vmul.f32 0.5, %v3032_v16 }
 0xf25   :  { %v1558_v17 = vadd.f32 0.5, %v1557_v14 }
 0xf26   :  { %v1583_v22 = vadd.f32 0.5, %v1582_v20 }
 0xf27   :  { %v1563_v29 = vmul.f32 %v1561_v28, %v1558_v17 }
 0xf28   :  { %v1588_v33 = vmul.f32 %v1586_v32, %v1583_v22 }
 0xf8e   :  { %v1566_v18 = vpop.permute.xlu0 %1565 }
 0xf8f   :  { %v1568_v19 = vmul.f32 %v1566_v18, %v1558_v17 }
 0xf91   :  { %1570 = vrot.lane.b32.xlu0 %v1568_v19, %s3268_s2 }
 0xf94   :  { %v1591_v23 = vpop.permute.xlu1 %1590 }
 0xf95   :  { %v1593_v27 = vmul.f32 %v1591_v23, %v1583_v22 }
 0xf97   :  { %1595 = vrot.lane.b32.xlu1 %v1593_v27, %s3268_s2 }
0x1003   :  { %v1571_v30 = vpop.permute.xlu0 %1570 }
0x1004   :  { %v1573_v31 = vadd.f32 %v1571_v30, %v1563_v29 }
0x1006   :  { %3033 = vtanh.f32 %v1573_v31  ;;  %v1779_v10 = vrot.slane %v1573_v31, 7 }
0x1009   :  { %v1596_v34 = vpop.permute.xlu1 %1595 }
0x100a   :  { %v1598_v35 = vadd.f32 %v1596_v34, %v1588_v33 }
0x100c   :  { %3035 = vtanh.f32 %v1598_v35  ;;  %v1804_v16 = vrot.slane %v1598_v35, 1 }
0x1010   :  { %v3034_v36 = vpop.eup %3033 }
0x1011   :  { %1576 = vrot.lane.b32.xlu0 %v3034_v36, %s3275_s25 }
0x1016   :  { %v3036_v37 = vpop.eup %3035 }
0x1017   :  { %1601 = vrot.lane.b32.xlu1 %v3036_v37, %s3275_s25 }
0x1083   :  { %v1577_v38 = vpop.permute.xlu0 %1576 }
0x1084   :  { %v3650_v39 = vmul.f32 %v1577_v38, %v1558_v17 }
0x1086   :  { %v1615_v41 = vrot.slane %v3650_v39, 5 }
0x1088   :  { %1616 = vrot.lane.b32.xlu0 %v1615_v41, %s3276_s21 }
0x1089   :  { %v1602_v42 = vpop.permute.xlu1 %1601 }
0x108a   :  { %v3654_v44 = vmul.f32 %v1602_v42, %v1583_v22 }
0x108c   :  { %v1694_v45 = vrot.slane %v3654_v44, 2 }
0x108e   :  { %1695 = vrot.lane.b32.xlu1 %v1694_v45, %s3276_s21 }
0x10fa   :  { %v1617_v46 = vpop.permute.xlu0 %1616 }
0x10fb   :  { %2851 = vmatmul.mubr.msk.f32.vlgmr.msra.gmra.mrb[14].mxu0 %vm136_vm1, %v1617_v46 }
0x10fc   :  { %2938 = vmatpush3.bf16.msra.mxu0 %v3471_v13  ;;  %2864 = vmatprep.mubr.msk.f32.mxu0 %vm3272_vm0, %v3273_v7 }
0x10fd   :  { %2942 = vmatprep.subr.bf16.mxu0 %v3271_v3 }
0x1100   :  { %v1696_v47 = vpop.permute.xlu1 %1695 }
0x1101   :  { %2858 = vmatmul.mubr.msk.f32.vlgmr.msra.gmra.mrb[14].mxu1 %vm136_vm1, %v1696_v47 }
0x1102   :  { %2941 = vmatpush3.bf16.msra.mxu1 %v3474_v15  ;;  %2871 = vmatprep.mubr.msk.f32.mxu1 %vm3272_vm0, %v3273_v7 }
0x1103   :  { %2945 = vmatprep.subr.bf16.mxu1 %v3271_v3 }
0x11ce   :  { %v1686_v48 = vpop.f32.mrb[14].mxu0 }
0x11cf   :  { %v1691_v49 = vrot.slane %v1686_v48, 2  ;;  %v2852_v50 = vpop.f32.mrb[15].mxu0 }
0x11d1   :  { %v1693_v13 = vadd.f32 %v1691_v49, %v3502_v25 }
0x11d3   :  { %3037 = vtanh.f32 %v1693_v13  ;;  %v1773_v58 = vmul.f32 0.5, %v1693_v13 }
0x11d4   :  { %v1765_v51 = vpop.f32.mrb[14].mxu1 }
0x11d5   :  { %v1770_v53 = vrot.slane %v1765_v51, 7  ;;  %v2859_v54 = vpop.f32.mrb[15].mxu1 }
0x11d7   :  { %v1772_v56 = vadd.f32 %v1770_v53, %v3504_v26 }
0x11d9   :  { %3039 = vtanh.f32 %v1772_v56  ;;  %v1798_v3 = vmul.f32 0.5, %v1772_v56 }
0x11da   :  { %3041 = vtanh.f32 %v1773_v58 }
0x11db   :  { %3043 = vtanh.f32 %v1798_v3 }
0x11dd   :  { %v3038_v57 = vpop.eup %3037 }
0x11de   :  { %1783 = vrot.lane.b32.xlu0 %v3038_v57, %s3274_s5 }
0x11e3   :  { %v3040_v15 = vpop.eup %3039 }
0x11e4   :  { %1808 = vrot.lane.b32.xlu1 %v3040_v15, %s3274_s5  ;;  %v3042_v59 = vpop.eup %3041 }
0x11e5   :  { %v1775_v60 = vmul.f32 0.5, %v3042_v59  ;;  %v3044_v62 = vpop.eup %3043 }
0x11e6   :  { %v1800_v4 = vmul.f32 0.5, %v3044_v62 }
0x11e7   :  { %v1776_v63 = vadd.f32 0.5, %v1775_v60 }
0x11e8   :  { %v1801_v5 = vadd.f32 0.5, %v1800_v4 }
0x11e9   :  { %v1781_v11 = vmul.f32 %v1779_v10, %v1776_v63 }
0x11ea   :  { %v1806_v17 = vmul.f32 %v1804_v16, %v1801_v5 }
0x1250   :  { %v1784_v0 = vpop.permute.xlu0 %1783 }
0x1251   :  { %v1786_v1 = vmul.f32 %v1784_v0, %v1776_v63 }
0x1253   :  { %1788 = vrot.lane.b32.xlu0 %v1786_v1, %s3268_s2 }
0x1256   :  { %v1809_v8 = vpop.permute.xlu1 %1808 }
0x1257   :  { %v1811_v9 = vmul.f32 %v1809_v8, %v1801_v5 }
0x1259   :  { %1813 = vrot.lane.b32.xlu1 %v1811_v9, %s3268_s2 }
0x12c5   :  { %v1789_v12 = vpop.permute.xlu0 %1788 }
0x12c6   :  { %v1791_v14 = vadd.f32 %v1789_v12, %v1781_v11  ;;  %v2209_v12 = vlaneseq }
0x12c8   :  { %3045 = vtanh.f32 %v1791_v14  ;;  %v1994_v57 = vrot.slane %v1791_v14, 7 }
0x12cb   :  { %v1814_v18 = vpop.permute.xlu1 %1813 }
0x12cc   :  { %v1816_v19 = vadd.f32 %v1814_v18, %v1806_v17  ;;  %v3743_v17 = vand.u32 127, %v2209_v12 }
0x12ce   :  { %3047 = vtanh.f32 %v1816_v19  ;;  %v2019_v3 = vrot.slane %v1816_v19, 1  ;;  %vm2213_vm10 = vcmp.eq.s32.totalorder %v3743_v17, 4 }
0x12d2   :  { %v3046_v20 = vpop.eup %3045 }
0x12d3   :  { %1794 = vrot.lane.b32.xlu0 %v3046_v20, %s3275_s25 }
0x12d8   :  { %v3048_v22 = vpop.eup %3047 }
0x12d9   :  { %1819 = vrot.lane.b32.xlu1 %v3048_v22, %s3275_s25 }
0x1345   :  { %v1795_v23 = vpop.permute.xlu0 %1794 }
0x1346   :  { %v3676_v27 = vmul.f32 %v1795_v23, %v1776_v63  ;;  %v3753_v23 = vld [vmem:[%s3954_s14] sm:$0x3f] }
0x1348   :  { %v1833_v28 = vrot.slane %v3676_v27, 6 }
0x134a   :  { %1834 = vrot.lane.b32.xlu0 %v1833_v28, %s3276_s21 }
0x134b   :  { %v1820_v29 = vpop.permute.xlu1 %1819 }
0x134c   :  { %v3680_v30 = vmul.f32 %v1820_v29, %v1801_v5 }
0x134e   :  { %v1912_v31 = vrot.slane %v3680_v30, 1 }
0x1350   :  { %1913 = vrot.lane.b32.xlu1 %v1912_v31, %s3276_s21 }
0x13bc   :  { %v1835_v32 = vpop.permute.xlu0 %1834 }
0x13bd   :  { %2865 = vmatmul.mubr.msk.f32.vlgmr.msra.gmra.mrb[16].mxu0 %vm136_vm1, %v1835_v32 }
0x13be   :  { %2878 = vmatprep.mubr.msk.f32.mxu0 %vm3272_vm0, %v3273_v7 }
0x13c2   :  { %v1914_v33 = vpop.permute.xlu1 %1913 }
0x13c3   :  { %2872 = vmatmul.mubr.msk.f32.vlgmr.msra.gmra.mrb[16].mxu1 %vm136_vm1, %v1914_v33 }
0x13c4   :  { %2885 = vmatprep.mubr.msk.f32.mxu1 %vm3272_vm0, %v3273_v7  ;;  %vm2338_vm0 = vcmask 43010  }
0x1490   :  { %v1904_v34 = vpop.f32.mrb[16].mxu0 }
0x1491   :  { %v1909_v35 = vrot.slane %v1904_v34, 1  ;;  %v2866_v36 = vpop.f32.mrb[17].mxu0 }
0x1493   :  { %v1911_v37 = vadd.f32 %v1909_v35, %v3502_v25 }
0x1495   :  { %3049 = vtanh.f32 %v1911_v37  ;;  %v1988_v47 = vmul.f32 0.5, %v1911_v37 }
0x1496   :  { %v1983_v38 = vpop.f32.mrb[16].mxu1 }
0x1497   :  { %v1987_v41 = vadd.f32 %v1983_v38, %v3504_v26  ;;  %v2873_v42 = vpop.f32.mrb[17].mxu1 }
0x1499   :  { %3051 = vtanh.f32 %v1987_v41  ;;  %v2013_v7 = vmul.f32 0.5, %v1987_v41 }
0x149a   :  { %3053 = vtanh.f32 %v1988_v47 }
0x149b   :  { %3055 = vtanh.f32 %v2013_v7 }
0x149f   :  { %v3050_v45 = vpop.eup %3049 }
0x14a0   :  { %1998 = vrot.lane.b32.xlu0 %v3050_v45, %s3274_s5 }
0x14a3   :  { %v3052_v46 = vpop.eup %3051 }
0x14a4   :  { %2023 = vrot.lane.b32.xlu1 %v3052_v46, %s3274_s5  ;;  %v3054_v48 = vpop.eup %3053  ;;  %s2241_s5 = sadd.s32 4, %s2670_s6  ;;  %s2678_s6 = sshll.u32 %s2422_s10, 7 }
0x14a5   :  { %v1990_v49 = vmul.f32 0.5, %v3054_v48  ;;  %v3056_v50 = vpop.eup %3055  ;;  %s2242_s27 = sld [smem:[#allocation8 + %s2241_s5]] }
0x14a6   :  { %v2015_v13 = vmul.f32 0.5, %v3056_v50 }
0x14a7   :  { %v1991_v25 = vadd.f32 0.5, %v1990_v49  ;;  %v3762_v49 = vshrl.u32 %v2209_v12, 7 }
0x14a8   :  { %v2016_v26 = vadd.f32 0.5, %v2015_v13 }
0x14a9   :  { %v1996_v15 = vmul.f32 %v1994_v57, %v1991_v25  ;;  %vm3766_vm12 = vcmp.eq.s32.totalorder %v3762_v49, %v3743_v17 }
0x14aa   :  { %v2021_v60 = vmul.f32 %v2019_v3, %v2016_v26 }
0x1512   :  { %v1999_v51 = vpop.permute.xlu0 %1998 }
0x1513   :  { %v2001_v53 = vmul.f32 %v1999_v51, %v1991_v25 }
0x1515   :  { %2003 = vrot.lane.b32.xlu0 %v2001_v53, %s3268_s2 }
0x1516   :  { %v2024_v54 = vpop.permute.xlu1 %2023 }
0x1517   :  { %v2026_v56 = vmul.f32 %v2024_v54, %v2016_v26 }
0x1519   :  { %2028 = vrot.lane.b32.xlu1 %v2026_v56, %s3268_s2  ;;  %s2373_s2 = sshra.s32 %s3832_s26, 7 }
0x151a   :  { %s2375_s30 = sadd.s32 %s3835_s17, %s2373_s2 }
0x1587   :  { %v2004_v58 = vpop.permute.xlu0 %2003 }
0x1588   :  { %v2006_v59 = vadd.f32 %v2004_v58, %v1996_v15  ;;  %v2669_v58 = vld [vmem:[%s3953_s13] ss:$0 sm:$0xff]  ;;  %s3830_s13 = sld [smem:[#allocation4 + $0x1]] }
0x158a   :  { %3057 = vtanh.f32 %v2006_v59 }
0x158b   :  { %v2029_v62 = vpop.permute.xlu1 %2028 }
0x158c   :  { %v2031_v63 = vadd.f32 %v2029_v62, %v2021_v60  ;;  %v2254_v62 = vsub.s32 0, %v3762_v49 }
0x158e   :  { %3059 = vtanh.f32 %v2031_v63  ;;  %s2281_s23 = sadd.s32 %s3830_s13, %s2279_s20  ;;  %s2326_s7 = sshra.s32 %s3830_s13, 7 }
0x158f   :  { %s2672_s24 = sshll.u32 %s2281_s23, 7  ;;  %s2331_s29 = sand.u32 127, %s3830_s13 }
0x1590   :  { %s2467_s20 = sshra.s32 %s3871_s3, 7 }
0x1594   :  { %v3058_v0 = vpop.eup %3057 }
0x1595   :  { %2009 = vrot.lane.b32.xlu0 %v3058_v0, %s3275_s25 }
0x1598   :  { %v3060_v1 = vpop.eup %3059 }
0x1599   :  { %2034 = vrot.lane.b32.xlu1 %v3060_v1, %s3275_s25  ;;  %517 = vrot.lane.b32.xlu0 %v3521_v61, %s3276_s21  ;;  %v2049_v61 = vld [vmem:[%s3951_s11] sm:$0xff]  ;;  %s2285_s25 = sadd.s32 %s2672_s24, %s2284_s4  ;;  %s2425_s24 = sand.u32 127, %s3835_s17 }
0x159a   :  { %s2286_s9 = sld [smem:[#allocation8 + %s2285_s25]]  ;;  %s2426_s5 = sadd.s32 %s2678_s6, %s2425_s24 }
0x159b   :  { %s2604_s24 = sand.u32 127, %s3845_s18 }
0x159d   :  { %728 = vrot.lane.b32.xlu1 %v3546_v40, %s3276_s21  ;;  %734 = vrot.lane.b32.xlu0 %v3550_v43, %s3276_s21  ;;  %v2050_v40 = vld [vmem:[%s3951_s11 + $0x8] sm:$0xff]  ;;  %s2676_s11 = sshll.u32 %s2375_s30, 7 }
0x159e   :  { %v2946_v43 = vpack.c.bf16 %v2050_v40, %v2049_v61 }
0x15a0   :  { %2947 = vmatpush3.bf16.msra.mxu1 %v2946_v43  ;;  %s2287_s23 = sadd.f32 %s2286_s9, %s2242_s27  ;;  %s2519_s27 = sand.u32 127, %s3839_s0 }
0x15a1   :  { %948 = vrot.lane.b32.xlu1 %v3572_v21, %s3276_s21  ;;  %954 = vrot.lane.b32.xlu0 %v3576_v24, %s3276_s21  ;;  %v2052_v21 = vld [vmem:[%s3952_s12] sm:$0xff]  ;;  %v2053_v24 = vld [vmem:[%s3952_s12 + $0x8] sm:$0xff]  ;;  %s2378_s12 = sand.u32 127, %s3832_s26 }
0x15a5   :  { %1168 = vrot.lane.b32.xlu1 %v3598_v2, %s3276_s21  ;;  %1174 = vrot.lane.b32.xlu0 %v3602_v6, %s3276_s21  ;;  %v2943_v2 = vpack.c.bf16 %v2053_v24, %v2052_v21 }
0x15a7   :  { %2944 = vmatpush3.bf16.msra.mxu0 %v2943_v2 }
0x15a9   :  { %1388 = vrot.lane.b32.xlu1 %v3624_v52, %s3276_s21  ;;  %1393 = vrot.lane.b32.xlu0 %v3628_v55, %s3276_s21 }
0x15ad   :  { %1606 = vrot.lane.b32.xlu1 %v3650_v39, %s3276_s21  ;;  %1611 = vrot.lane.b32.xlu0 %v3654_v44, %s3276_s21 }
0x15b1   :  { %1824 = vrot.lane.b32.xlu1 %v3676_v27, %s3276_s21  ;;  %1829 = vrot.lane.b32.xlu0 %v3680_v30, %s3276_s21  ;;  %v3277_v27 = vmov -10000.0  }
0x15b2   :  { %v2214_v28 = vsel %vm2213_vm10, 0.0, %v3277_v27  ;;  %vm2432_vm10 = vcmask 45060  }
0x15b3   :  { %v2215_v29 = vadd.f32 %v2214_v28, %v3753_v23 }
0x15b5   :  { %v2217_v30 = vsel %vm2216_vm11, %v2215_v29, -inf }
0x1607   :  { %v2010_v6 = vpop.permute.xlu0 %2009 }
0x1608   :  { %v2012_v52 = vmul.f32 %v2010_v6, %v1991_v25 }
0x160a   :  { %2039 = vrot.lane.b32.xlu1 %v2012_v52, %s3276_s21 }
0x160b   :  { %v2035_v55 = vpop.permute.xlu1 %2034  ;;  %v518_v39 = vpop.permute.xlu0 %517 }
0x160c   :  { %v2037_v44 = vmul.f32 %v2035_v55, %v2016_v26  ;;  %521 = vst.msk [vmem:[#allocation3] sm:$0x80] %vm520_vm3, %v518_v39 }
0x160e   :  { %2044 = vrot.lane.b32.xlu0 %v2037_v44, %s3276_s21  ;;  %s2328_s21 = sadd.s32 %s3832_s26, %s2326_s7  ;;  %s2469_s7 = sadd.s32 %s3839_s0, %s2467_s20 }
0x160f   :  { %v729_v4 = vpop.permute.xlu1 %728  ;;  %v735_v5 = vpop.permute.xlu0 %734  ;;  %s2674_s28 = sshll.u32 %s2328_s21, 7  ;;  %s2680_s25 = sshll.u32 %s2469_s7, 7 }
0x1610   :  { %732 = vst.msk [vmem:[#allocation2] sm:$0x2] %vm731_vm4, %v729_v4  ;;  %s2332_s8 = sadd.s32 %s2674_s28, %s2331_s29  ;;  %s2472_s21 = sand.u32 127, %s3871_s3 }
0x1611   :  { %738 = vst.msk [vmem:[#allocation3] sm:$0x40] %vm737_vm5, %v735_v5  ;;  %s2333_s14 = sld [smem:[#allocation8 + %s2332_s8]]  ;;  %s2561_s29 = sshra.s32 %s3873_s19, 7 }
0x1612   :  { %s2427_s28 = sld [smem:[#allocation8 + %s2426_s5]]  ;;  %s2473_s30 = sadd.s32 %s2680_s25, %s2472_s21 }
0x1613   :  { %v949_v8 = vpop.permute.xlu1 %948  ;;  %v955_v9 = vpop.permute.xlu0 %954  ;;  %s2474_s22 = sld [smem:[#allocation8 + %s2473_s30]]  ;;  %s3278_s25 = smov [#allocation16]  }
0x1614   :  { %952 = vst.msk [vmem:[#allocation2] sm:$0x4] %vm951_vm6, %v949_v8  ;;  %s2618_s21 = sshll.u32 %s3278_s25, 4  ;;  %s2619_s21 = int_to_ptr.vmem [resolvable:$true] %s2618_s21 }
0x1615   :  { %958 = vst.msk [vmem:[#allocation3] sm:$0x20] %vm957_vm7, %v955_v9  ;;  %p3210_p11 = scmp.lt.s32.totalorder %s2619_s21, %s2619_s21 }
0x1617   :  { %v1169_v10 = vpop.permute.xlu1 %1168  ;;  %v1175_v11 = vpop.permute.xlu0 %1174  ;;  %s2334_s2 = sadd.f32 %s2333_s14, %s2287_s23 }
0x1618   :  { %1172 = vst.msk [vmem:[#allocation2] sm:$0x8] %vm1171_vm8, %v1169_v10 }
0x1619   :  { %1178 = vst.msk [vmem:[#allocation3] sm:$0x10] %vm1177_vm9, %v1175_v11 }
0x161b   :  { %v1389_v14 = vpop.permute.xlu1 %1388  ;;  %v1394_v16 = vpop.permute.xlu0 %1393 }
0x161c   :  { %1391 = vst.msk [vmem:[#allocation2] sm:$0x10] %vm1177_vm9, %v1389_v14  ;;  %v2301_v14 = vsub.s32 1, %v3762_v49 }
0x161d   :  { %1396 = vst.msk [vmem:[#allocation3] sm:$0x8] %vm1171_vm8, %v1394_v16  ;;  %vm2247_vm8 = vcmask 40960  }
0x161f   :  { %v1607_v18 = vpop.permute.xlu1 %1606  ;;  %v1612_v19 = vpop.permute.xlu0 %1611 }
0x1620   :  { %1609 = vst.msk [vmem:[#allocation2] sm:$0x20] %vm957_vm7, %v1607_v18 }
0x1621   :  { %1614 = vst.msk [vmem:[#allocation3] sm:$0x4] %vm951_vm6, %v1612_v19  ;;  %vm2573_vm6 = vcmask 48135  }
0x1623   :  { %v1825_v20 = vpop.permute.xlu1 %1824  ;;  %v1830_v22 = vpop.permute.xlu0 %1829 }
0x1624   :  { %1827 = vst.msk [vmem:[#allocation2] sm:$0x40] %vm737_vm5, %v1825_v20 }
0x1625   :  { %1832 = vst.msk [vmem:[#allocation3] sm:$0x2] %vm731_vm4, %v1830_v22  ;;  %vm2479_vm4 = vcmask 46085  }
0x162e   :  { %2218 = vmax.xlane.f32.xlu1 %v2217_v30 }
0x167c   :  { %v2040_v31 = vpop.permute.xlu1 %2039 }
0x167d   :  { %2042 = vst.msk [vmem:[#allocation2] sm:$0x80] %vm520_vm3, %v2040_v31 }
0x1680   :  { %v2045_v32 = vpop.permute.xlu0 %2044 }
0x1681   :  { %2047 = vst.msk [vmem:[#allocation3] sm:$0x1] %vm514_vm2, %v2045_v32  ;;  %vm2385_vm2 = vcmask 44035  }
0x1684   :  { %v2048_v33 = vld [vmem:[#allocation2] sm:$0xff] }
0x1685   :  { %2886 = vmatmul.mubr.msk.f32.vlgmr.msra.gmra.mrb[18].mxu1 %vm136_vm1, %v2048_v33 }
0x1688   :  { %v2051_v34 = vld [vmem:[#allocation3] sm:$0xff] }
0x1689   :  { %2879 = vmatmul.mubr.msk.f32.vlgmr.msra.gmra.mrb[18].mxu0 %vm136_vm1, %v2051_v34 }
0x16bb   :  { %v2219_v35 = vpop.xlane.xlu1 %2218 }
0x16bc   :  { %v2220_v36 = vsub.f32 %v2215_v29, %v2219_v35 }
0x16be   :  { %v2221_v37 = vmul.f32 1.442695, %v2220_v36 }
0x16c0   :  { %3061 = vpow2.f32 %v2221_v37 }
0x16ca   :  { %v3062_v38 = vpop.eup %3061 }
0x16cb   :  { %v2223_v41 = vsel %vm2216_vm11, %v3062_v38, 0.0 }
0x16cc   :  { %2224 = vadd.xlane.f32.xlu0 %v2223_v41 }
0x1758   :  { %v2196_v42 = vpop.f32.mrb[18].mxu1 }
0x1759   :  { %v2887_v45 = vpop.f32.mrb[19].mxu1  ;;  %v2225_v46 = vpop.xlane.xlu0 %2224 }
0x175a   :  { %3063 = vlog2.f32 %v2225_v46 }
0x175c   :  { %v2123_v47 = vpop.f32.mrb[18].mxu0 }
0x175d   :  { %v2197_v7 = vadd.f32 %v2196_v42, %v2123_v47  ;;  %v2880_v48 = vpop.f32.mrb[19].mxu0  ;;  %v2348_v47 = vsub.s32 2, %v3762_v49 }
0x175f   :  { %v3776_v59 = vadd.f32 %v2669_v58, %v2197_v7 }
0x1764   :  { %v3064_v50 = vpop.eup %3063 }
0x1765   :  { %v2227_v25 = vmul.f32 0.6931472, %v3064_v50 }
0x1767   :  { %v2228_v51 = vadd.f32 %v2227_v25, %v2219_v35 }
0x1769   :  { %v2230_v53 = vsel %vm3766_vm12, %v2228_v51, 0.0 }
0x176a   :  { %v2231_v26 = vsel %vm2216_vm11, %v2230_v53, 0.0 }
0x176b   :  { %v2232_v54 = vrot.slane %v2231_v26, 4 }
0x176d   :  { %v2233_v56 = vadd.f32 %v2232_v54, %v2231_v26 }
0x176f   :  { %v2234_v57 = vrot.slane %v2233_v56, 2 }
0x1771   :  { %v2235_v15 = vadd.f32 %v2234_v57, %v2233_v56 }
0x1773   :  { %v2236_v3 = vrot.slane %v2235_v15, 1 }
0x1775   :  { %v2237_v60 = vadd.f32 %v2236_v3, %v2235_v15 }
0x1777   :  { %v2238_v63 = vadd.f32 %v2237_v60, %v3776_v59 }
0x1779   :  { %v2255_v0 = vrot.slane %v2238_v63, %v2254_v62 }
0x177b   :  { %v2256_v1 = vadd.f32 %v2255_v0, %v3753_v23 }
0x177d   :  { %v2257_v61 = vsel %vm2216_vm11, %v2256_v1, -inf }
0x177e   :  { %2258 = vmax.xlane.f32.xlu0 %v2257_v61 }
0x180b   :  { %v2259_v40 = vpop.xlane.xlu0 %2258 }
0x180c   :  { %v2260_v43 = vsub.f32 %v2256_v1, %v2259_v40 }
0x180e   :  { %v2261_v21 = vmul.f32 1.442695, %v2260_v43 }
0x1810   :  { %3065 = vpow2.f32 %v2261_v21  ;;  %v2395_v21 = vsub.s32 3, %v3762_v49 }
0x181a   :  { %v3066_v24 = vpop.eup %3065 }
0x181b   :  { %v2263_v2 = vsel %vm2216_vm11, %v3066_v24, 0.0 }
0x181c   :  { %2264 = vadd.xlane.f32.xlu1 %v2263_v2 }
0x18a9   :  { %v2265_v6 = vpop.xlane.xlu1 %2264 }
0x18aa   :  { %3067 = vlog2.f32 %v2265_v6 }
0x18b4   :  { %v3068_v52 = vpop.eup %3067 }
0x18b5   :  { %v2267_v55 = vmul.f32 0.6931472, %v3068_v52 }
0x18b7   :  { %v2268_v39 = vadd.f32 %v2267_v55, %v2259_v40 }
0x18b9   :  { %v2269_v44 = vsel %vm3766_vm12, %v2268_v39, 0.0 }
0x18ba   :  { %v2270_v4 = vsel %vm2216_vm11, %v2269_v44, 0.0 }
0x18bb   :  { %v2271_v5 = vrot.slane %v2270_v4, 4 }
0x18bd   :  { %v2272_v8 = vadd.f32 %v2271_v5, %v2270_v4 }
0x18bf   :  { %v2273_v9 = vrot.slane %v2272_v8, 2 }
0x18c1   :  { %v2274_v10 = vadd.f32 %v2273_v9, %v2272_v8 }
0x18c3   :  { %v2275_v11 = vrot.slane %v2274_v10, 1 }
0x18c5   :  { %v2276_v12 = vadd.f32 %v2275_v11, %v2274_v10 }
0x18c7   :  { %v2277_v16 = vadd.f32 %v2276_v12, %v3776_v59 }
0x18c9   :  { %v2302_v18 = vrot.slane %v2277_v16, %v2301_v14 }
0x18cb   :  { %v2303_v19 = vadd.f32 %v2302_v18, %v3753_v23 }
0x18cd   :  { %v2304_v20 = vsel %vm2216_vm11, %v2303_v19, -inf }
0x18ce   :  { %2305 = vmax.xlane.f32.xlu0 %v2304_v20 }
0x195b   :  { %v2306_v22 = vpop.xlane.xlu0 %2305 }
0x195c   :  { %v2307_v27 = vsub.f32 %v2303_v19, %v2306_v22 }
0x195e   :  { %v2308_v28 = vmul.f32 1.442695, %v2307_v27 }
0x1960   :  { %3069 = vpow2.f32 %v2308_v28  ;;  %v2442_v28 = vsub.s32 4, %v3762_v49 }
0x196a   :  { %v3070_v29 = vpop.eup %3069 }
0x196b   :  { %v2310_v30 = vsel %vm2216_vm11, %v3070_v29, 0.0 }
0x196c   :  { %2311 = vadd.xlane.f32.xlu1 %v2310_v30 }
0x19f9   :  { %v2312_v31 = vpop.xlane.xlu1 %2311 }
0x19fa   :  { %3071 = vlog2.f32 %v2312_v31 }
0x1a04   :  { %v3072_v32 = vpop.eup %3071 }
0x1a05   :  { %v2314_v33 = vmul.f32 0.6931472, %v3072_v32 }
0x1a07   :  { %v2315_v34 = vadd.f32 %v2314_v33, %v2306_v22 }
0x1a09   :  { %v2316_v35 = vsel %vm3766_vm12, %v2315_v34, 0.0 }
0x1a0a   :  { %v2317_v36 = vsel %vm2216_vm11, %v2316_v35, 0.0 }
0x1a0b   :  { %v2318_v37 = vrot.slane %v2317_v36, 4 }
0x1a0d   :  { %v2319_v38 = vadd.f32 %v2318_v37, %v2317_v36 }
0x1a0f   :  { %v2320_v41 = vrot.slane %v2319_v38, 2 }
0x1a11   :  { %v2321_v42 = vadd.f32 %v2320_v41, %v2319_v38 }
0x1a13   :  { %v2322_v45 = vrot.slane %v2321_v42, 1 }
0x1a15   :  { %v2323_v46 = vadd.f32 %v2322_v45, %v2321_v42 }
0x1a17   :  { %v2324_v7 = vadd.f32 %v2323_v46, %v3776_v59 }
0x1a19   :  { %v2349_v48 = vrot.slane %v2324_v7, %v2348_v47 }
0x1a1b   :  { %v2350_v50 = vadd.f32 %v2349_v48, %v3753_v23 }
0x1a1d   :  { %v2351_v25 = vsel %vm2216_vm11, %v2350_v50, -inf }
0x1a1e   :  { %2352 = vmax.xlane.f32.xlu0 %v2351_v25 }
0x1aab   :  { %v2353_v51 = vpop.xlane.xlu0 %2352 }
0x1aac   :  { %v2354_v53 = vsub.f32 %v2350_v50, %v2353_v51 }
0x1aae   :  { %v2355_v26 = vmul.f32 1.442695, %v2354_v53 }
0x1ab0   :  { %3073 = vpow2.f32 %v2355_v26  ;;  %v2489_v26 = vsub.s32 5, %v3762_v49 }
0x1aba   :  { %v3074_v54 = vpop.eup %3073 }
0x1abb   :  { %v2357_v56 = vsel %vm2216_vm11, %v3074_v54, 0.0 }
0x1abc   :  { %2358 = vadd.xlane.f32.xlu1 %v2357_v56 }
0x1b49   :  { %v2359_v57 = vpop.xlane.xlu1 %2358 }
0x1b4a   :  { %3075 = vlog2.f32 %v2359_v57 }
0x1b54   :  { %v3076_v15 = vpop.eup %3075 }
0x1b55   :  { %v2361_v58 = vmul.f32 0.6931472, %v3076_v15 }
0x1b57   :  { %v2362_v3 = vadd.f32 %v2361_v58, %v2353_v51 }
0x1b59   :  { %v2363_v60 = vsel %vm3766_vm12, %v2362_v3, 0.0 }
0x1b5a   :  { %v2364_v62 = vsel %vm2216_vm11, %v2363_v60, 0.0 }
0x1b5b   :  { %v2365_v63 = vrot.slane %v2364_v62, 4 }
0x1b5d   :  { %v2366_v0 = vadd.f32 %v2365_v63, %v2364_v62 }
0x1b5f   :  { %v2367_v1 = vrot.slane %v2366_v0, 2 }
0x1b61   :  { %v2368_v61 = vadd.f32 %v2367_v1, %v2366_v0 }
0x1b63   :  { %v2369_v40 = vrot.slane %v2368_v61, 1 }
0x1b65   :  { %v2370_v43 = vadd.f32 %v2369_v40, %v2368_v61 }
0x1b67   :  { %v2371_v24 = vadd.f32 %v2370_v43, %v3776_v59 }
0x1b69   :  { %v2396_v2 = vrot.slane %v2371_v24, %v2395_v21 }
0x1b6b   :  { %v2397_v6 = vadd.f32 %v2396_v2, %v3753_v23 }
0x1b6d   :  { %v2398_v52 = vsel %vm2216_vm11, %v2397_v6, -inf }
0x1b6e   :  { %2399 = vmax.xlane.f32.xlu0 %v2398_v52 }
0x1bfb   :  { %v2400_v55 = vpop.xlane.xlu0 %2399 }
0x1bfc   :  { %v2401_v39 = vsub.f32 %v2397_v6, %v2400_v55 }
0x1bfe   :  { %v2402_v44 = vmul.f32 1.442695, %v2401_v39 }
0x1c00   :  { %3077 = vpow2.f32 %v2402_v44  ;;  %v2536_v44 = vsub.s32 6, %v3762_v49 }
0x1c0a   :  { %v3078_v4 = vpop.eup %3077 }
0x1c0b   :  { %v2404_v5 = vsel %vm2216_vm11, %v3078_v4, 0.0 }
0x1c0c   :  { %2405 = vadd.xlane.f32.xlu1 %v2404_v5 }
0x1c99   :  { %v2406_v8 = vpop.xlane.xlu1 %2405 }
0x1c9a   :  { %3079 = vlog2.f32 %v2406_v8 }
0x1ca4   :  { %v3080_v9 = vpop.eup %3079 }
0x1ca5   :  { %v2408_v10 = vmul.f32 0.6931472, %v3080_v9 }
0x1ca7   :  { %v2409_v11 = vadd.f32 %v2408_v10, %v2400_v55 }
0x1ca9   :  { %v2410_v12 = vsel %vm3766_vm12, %v2409_v11, 0.0 }
0x1caa   :  { %v2411_v14 = vsel %vm2216_vm11, %v2410_v12, 0.0 }
0x1cab   :  { %v2412_v16 = vrot.slane %v2411_v14, 4 }
0x1cad   :  { %v2413_v18 = vadd.f32 %v2412_v16, %v2411_v14  ;;  %v2288_v14 = vstv %s3830_s13  ;;  %v2335_v16 = vstv %s3832_s26  ;;  %s2514_s13 = sshra.s32 %s3839_s0, 7 }
0x1cae   :  { %vm2289_vm13 = vcmp.eq.s32.totalorder %v3743_v17, %v2288_v14  ;;  %vm2336_vm15 = vcmp.eq.s32.totalorder %v3743_v17, %v2335_v16  ;;  %s2516_s26 = sadd.s32 %s3873_s19, %s2514_s13 }
0x1caf   :  { %v2414_v19 = vrot.slane %v2413_v18, 2  ;;  %s2682_s8 = sshll.u32 %s2516_s26, 7 }
0x1cb1   :  { %v2415_v20 = vadd.f32 %v2414_v19, %v2413_v18  ;;  %v2290_v19 = vsel %vm2289_vm13, %v3776_v59, 0.0  ;;  %vm2597_vm13 = vcmask 7175  }
0x1cb3   :  { %v2416_v22 = vrot.slane %v2415_v20, 1 }
0x1cb5   :  { %v2417_v27 = vadd.f32 %v2416_v22, %v2415_v20  ;;  %v2382_v20 = vstv %s3835_s17  ;;  %v2292_v22 = vsel %vm2291_vm14, %v2290_v19, 0.0  ;;  %s2563_s17 = sadd.s32 %s3845_s18, %s2561_s29  ;;  %vm2610_vm14 = vcmask 0   ;;  %s3209_s29 = scalar_lea.vmem %s2619_s21, 32 }
0x1cb6   :  { %vm2383_vm1 = vcmp.eq.s32.totalorder %v3743_v17, %v2382_v20  ;;  %s2684_s10 = sshll.u32 %s2563_s17, 7 }
0x1cb7   :  { %v2418_v29 = vadd.f32 %v2417_v27, %v3776_v59  ;;  %v2337_v27 = vsel %vm2336_vm15, %v3776_v59, 0.0 }
0x1cb9   :  { %v2443_v30 = vrot.slane %v2418_v29, %v2442_v28  ;;  %v2476_v28 = vstv %s3839_s0  ;;  %v2339_v29 = vsel %vm2338_vm0, %v2337_v27, 0.0 }
0x1cba   :  { %vm2477_vm3 = vcmp.eq.s32.totalorder %v3743_v17, %v2476_v28 }
0x1cbb   :  { %v2444_v31 = vadd.f32 %v2443_v30, %v3753_v23  ;;  %v2384_v30 = vsel %vm2383_vm1, %v3776_v59, 0.0 }
0x1cbd   :  { %v2445_v32 = vsel %vm2216_vm11, %v2444_v31, -inf }
0x1cbe   :  { %2446 = vmax.xlane.f32.xlu0 %v2445_v32  ;;  %v2386_v32 = vsel %vm2385_vm2, %v2384_v30, 0.0 }
0x1d4b   :  { %v2447_v33 = vpop.xlane.xlu0 %2446 }
0x1d4c   :  { %v2448_v34 = vsub.f32 %v2444_v31, %v2447_v33  ;;  %v2570_v31 = vstv %s3845_s18 }
0x1d4d   :  { %vm2571_vm5 = vcmp.eq.s32.totalorder %v3743_v17, %v2570_v31 }
0x1d4e   :  { %v2449_v35 = vmul.f32 1.442695, %v2448_v34 }
0x1d50   :  { %3081 = vpow2.f32 %v2449_v35  ;;  %v2572_v35 = vsel %vm2571_vm5, %v3776_v59, 0.0 }
0x1d5a   :  { %v3082_v36 = vpop.eup %3081 }
0x1d5b   :  { %v2451_v37 = vsel %vm2216_vm11, %v3082_v36, 0.0  ;;  %v2574_v36 = vsel %vm2573_vm6, %v2572_v35, 0.0 }
0x1d5c   :  { %2452 = vadd.xlane.f32.xlu1 %v2451_v37 }
0x1de9   :  { %v2453_v38 = vpop.xlane.xlu1 %2452 }
0x1dea   :  { %3083 = vlog2.f32 %v2453_v38 }
0x1df4   :  { %v3084_v41 = vpop.eup %3083 }
0x1df5   :  { %v2455_v42 = vmul.f32 0.6931472, %v3084_v41 }
0x1df7   :  { %v2456_v45 = vadd.f32 %v2455_v42, %v2447_v33  ;;  %v2478_v33 = vsel %vm2477_vm3, %v3776_v59, 0.0 }
0x1df8   :  { %v2480_v34 = vsel %vm2479_vm4, %v2478_v33, 0.0 }
0x1df9   :  { %v2457_v46 = vsel %vm3766_vm12, %v2456_v45, 0.0 }
0x1dfa   :  { %v2458_v47 = vsel %vm2216_vm11, %v2457_v46, 0.0 }
0x1dfb   :  { %v2459_v7 = vrot.slane %v2458_v47, 4 }
0x1dfd   :  { %v2460_v48 = vadd.f32 %v2459_v7, %v2458_v47 }
0x1dff   :  { %v2461_v50 = vrot.slane %v2460_v48, 2 }
0x1e01   :  { %v2462_v25 = vadd.f32 %v2461_v50, %v2460_v48 }
0x1e03   :  { %v2463_v51 = vrot.slane %v2462_v25, 1 }
0x1e05   :  { %v2464_v53 = vadd.f32 %v2463_v51, %v2462_v25 }
0x1e07   :  { %v2465_v54 = vadd.f32 %v2464_v53, %v3776_v59  ;;  %v2582_v53 = vrot.slane %v3753_v23, 6 }
0x1e09   :  { %v2490_v56 = vrot.slane %v2465_v54, %v2489_v26  ;;  %v2244_v26 = vstv %s3860_s1  ;;  %s2379_s1 = sadd.s32 %s2676_s11, %s2378_s12  ;;  %s2599_s11 = sshra.s32 %s3845_s18, 7 }
0x1e0a   :  { %vm2245_vm7 = vcmp.eq.s32.totalorder %v3743_v17, %v2244_v26  ;;  %s2380_s4 = sld [smem:[#allocation8 + %s2379_s1]]  ;;  %s2520_s12 = sadd.s32 %s2682_s8, %s2519_s27 }
0x1e0b   :  { %v2491_v57 = vadd.f32 %v2490_v56, %v3753_v23  ;;  %s2566_s1 = sand.u32 127, %s3873_s19  ;;  %s2686_s20 = sshll.u32 %s2599_s11, 7 }
0x1e0c   :  { %s2521_s6 = sld [smem:[#allocation8 + %s2520_s12]]  ;;  %s2567_s14 = sadd.s32 %s2684_s10, %s2566_s1 }
0x1e0d   :  { %v2492_v15 = vsel %vm2216_vm11, %v2491_v57, -inf  ;;  %s2687_s23 = sadd.s32 640, %s2686_s20  ;;  %s2568_s13 = sld [smem:[#allocation8 + %s2567_s14]] }
0x1e0e   :  { %2493 = vmax.xlane.f32.xlu0 %v2492_v15  ;;  %s2605_s0 = sadd.s32 %s2687_s23, %s2604_s24 }
0x1e0f   :  { %s2606_s5 = sld [smem:[#allocation8 + %s2605_s0]] }
0x1e10   :  { %s2381_s9 = sadd.f32 %s2380_s4, %s2334_s2  ;;  %s3279_s2 = smov [#allocation17]  }
0x1e11   :  { %s2628_s26 = sshll.u32 %s3279_s2, 4  ;;  %s3907_s26 = int_to_ptr.vmem [resolvable:$true] %s2628_s26 }
0x1e9b   :  { %v2494_v58 = vpop.xlane.xlu0 %2493 }
0x1e9c   :  { %v2495_v3 = vsub.f32 %v2491_v57, %v2494_v58  ;;  %v2246_v57 = vsel %vm2245_vm7, %v3776_v59, 0.0 }
0x1e9d   :  { %v2248_v15 = vsel %vm2247_vm8, %v2246_v57, 0.0 }
0x1e9e   :  { %v2496_v60 = vmul.f32 1.442695, %v2495_v3 }
0x1ea0   :  { %3085 = vpow2.f32 %v2496_v60 }
0x1eaa   :  { %v3086_v62 = vpop.eup %3085 }
0x1eab   :  { %v2498_v63 = vsel %vm2216_vm11, %v3086_v62, 0.0 }
0x1eac   :  { %2499 = vadd.xlane.f32.xlu1 %v2498_v63  ;;  %v2523_v63 = vstv %s3873_s19 }
0x1f39   :  { %v2500_v0 = vpop.xlane.xlu1 %2499 }
0x1f3a   :  { %3087 = vlog2.f32 %v2500_v0 }
0x1f44   :  { %v3088_v1 = vpop.eup %3087 }
0x1f45   :  { %v2502_v61 = vmul.f32 0.6931472, %v3088_v1 }
0x1f47   :  { %v2503_v40 = vadd.f32 %v2502_v61, %v2494_v58 }
0x1f49   :  { %v2504_v43 = vsel %vm3766_vm12, %v2503_v40, 0.0 }
0x1f4a   :  { %v2505_v21 = vsel %vm2216_vm11, %v2504_v43, 0.0 }
0x1f4b   :  { %v2506_v24 = vrot.slane %v2505_v21, 4 }
0x1f4d   :  { %v2507_v2 = vadd.f32 %v2506_v24, %v2505_v21 }
0x1f4f   :  { %v2508_v6 = vrot.slane %v2507_v2, 2 }
0x1f51   :  { %v2509_v52 = vadd.f32 %v2508_v6, %v2507_v2 }
0x1f53   :  { %v2510_v55 = vrot.slane %v2509_v52, 1 }
0x1f55   :  { %v2511_v39 = vadd.f32 %v2510_v55, %v2509_v52 }
0x1f57   :  { %v2512_v4 = vadd.f32 %v2511_v39, %v3776_v59 }
0x1f59   :  { %v2537_v5 = vrot.slane %v2512_v4, %v2536_v44 }
0x1f5b   :  { %v2538_v8 = vadd.f32 %v2537_v5, %v3753_v23  ;;  %v2429_v23 = vstv %s3871_s3  ;;  %s2428_s3 = sadd.f32 %s2427_s28, %s2381_s9  ;;  %s3205_s28 = scalar_lea.vmem %s2619_s21, 16 }
0x1f5c   :  { %vm2430_vm9 = vcmp.eq.s32.totalorder %v3743_v17, %v2429_v23  ;;  %p3206_p10 = scmp.ne.s32.totalorder %s2619_s21, %s3205_s28  ;;  %p3211_p12 = scmp.lt.s32.totalorder %s3209_s29, %s3205_s28 }
0x1f5d   :  { %v2539_v9 = vsel %vm2216_vm11, %v2538_v8, -inf  ;;  %v2431_v1 = vsel %vm2430_vm9, %v3776_v59, 0.0  ;;  %s2475_s7 = sadd.f32 %s2474_s22, %s2428_s3 }
0x1f5e   :  { %2540 = vmax.xlane.f32.xlu0 %v2539_v9  ;;  %v2433_v61 = vsel %vm2432_vm10, %v2431_v1, 0.0  ;;  %p3212_p13 = por %p3211_p12, %p3210_p11 }
0x1f5f   :  { %s2522_s4 = sadd.f32 %s2521_s6, %s2475_s7 }
0x1f60   :  { %p3213_p0 = pnand %p3212_p13, %p3206_p10 }
0x1f61   :  { %s2569_s19 = sadd.f32 %s2568_s13, %s2522_s4 }
0x1f63   :  { %s2607_s18 = sadd.f32 %s2606_s5, %s2569_s19 }
0x1f65   :  { %v2608_v27 = vstv %s2607_s18 }
0x1feb   :  { %v2541_v10 = vpop.xlane.xlu0 %2540 }
0x1fec   :  { %v2542_v11 = vsub.f32 %v2538_v8, %v2541_v10 }
0x1fee   :  { %v2543_v12 = vmul.f32 1.442695, %v2542_v11 }
0x1ff0   :  { %3089 = vpow2.f32 %v2543_v12 }
0x1ffa   :  { %v3090_v49 = vpop.eup %3089 }
0x1ffb   :  { %v2545_v18 = vsel %vm2216_vm11, %v3090_v49, 0.0 }
0x1ffc   :  { %2546 = vadd.xlane.f32.xlu1 %v2545_v18 }
0x2000   :  { %2293 = vadd.xlane.f32.xlu1 %v2292_v22 }
0x2004   :  { %2340 = vadd.xlane.f32.xlu1 %v2339_v29 }
0x2008   :  { %2387 = vadd.xlane.f32.xlu1 %v2386_v32 }
0x200c   :  { %2481 = vadd.xlane.f32.xlu1 %v2480_v34 }
0x2010   :  { %2575 = vadd.xlane.f32.xlu1 %v2574_v36 }
0x2089   :  { %v2547_v37 = vpop.xlane.xlu1 %2546 }
0x208a   :  { %3091 = vlog2.f32 %v2547_v37 }
0x2094   :  { %v3092_v38 = vpop.eup %3091 }
0x2095   :  { %v2549_v41 = vmul.f32 0.6931472, %v3092_v38 }
0x2097   :  { %v2550_v42 = vadd.f32 %v2549_v41, %v2541_v10 }
0x2099   :  { %v2551_v45 = vsel %vm3766_vm12, %v2550_v42, 0.0  ;;  %vm2526_vm12 = vcmask 47110  }
0x209a   :  { %v2552_v46 = vsel %vm2216_vm11, %v2551_v45, 0.0  ;;  %vm2524_vm11 = vcmp.eq.s32.totalorder %v3743_v17, %v2523_v63  ;;  %v2294_v17 = vpop.xlane.xlu1 %2293 }
0x209b   :  { %v2553_v47 = vrot.slane %v2552_v46, 4  ;;  %v2525_v40 = vsel %vm2524_vm11, %v3776_v59, 0.0  ;;  %v2296_v24 = vrot.slane %v2294_v17, 1 }
0x209c   :  { %v2527_v43 = vsel %vm2526_vm12, %v2525_v40, 0.0 }
0x209d   :  { %v2554_v7 = vadd.f32 %v2553_v47, %v2552_v46 }
0x209f   :  { %v2555_v48 = vrot.slane %v2554_v7, 2 }
0x20a1   :  { %v2556_v50 = vadd.f32 %v2555_v48, %v2554_v7 }
0x20a3   :  { %v2557_v25 = vrot.slane %v2556_v50, 1 }
0x20a5   :  { %v2558_v51 = vadd.f32 %v2557_v25, %v2556_v50 }
0x20a7   :  { %v2559_v54 = vadd.f32 %v2558_v51, %v3776_v59  ;;  %v2341_v59 = vpop.xlane.xlu1 %2340 }
0x20a8   :  { %v2343_v52 = vrot.slane %v2341_v59, 2 }
0x20a9   :  { %v2584_v56 = vadd.f32 %v2582_v53, %v2559_v54 }
0x20ab   :  { %v2585_v13 = vsel %vm2573_vm6, %v2584_v56, -inf  ;;  %v2388_v2 = vpop.xlane.xlu1 %2387 }
0x20ac   :  { %2586 = vmax.xlane.f32.xlu0 %v2585_v13  ;;  %v2390_v4 = vrot.slane %v2388_v2, 3 }
0x20af   :  { %v2482_v44 = vpop.xlane.xlu1 %2481 }
0x20b0   :  { %2249 = vadd.xlane.f32.xlu0 %v2248_v15  ;;  %v2484_v10 = vrot.slane %v2482_v44, 5 }
0x20b3   :  { %v2576_v12 = vpop.xlane.xlu1 %2575 }
0x20b4   :  { %v2578_v19 = vrot.slane %v2576_v12, 7 }
0x2139   :  { %v3868_v58 = vpop.xlane.xlu0 %2586 }
0x213a   :  { %v2588_v3 = vsub.f32 %v2584_v56, %v3868_v58 }
0x213c   :  { %v2589_v60 = vmul.f32 1.442695, %v2588_v3 }
0x213d   :  { %v2250_v21 = vpop.xlane.xlu0 %2249 }
0x213e   :  { %3093 = vpow2.f32 %v2589_v60  ;;  %v2298_v6 = vadd.f32 %v2296_v24, %v2250_v21 }
0x2140   :  { %v2345_v39 = vadd.f32 %v2343_v52, %v2298_v6 }
0x2142   :  { %v2392_v8 = vadd.f32 %v2390_v4, %v2345_v39 }
0x2148   :  { %v3094_v62 = vpop.eup %3093 }
0x2149   :  { %v2591_v0 = vsel %vm2573_vm6, %v3094_v62, 0.0 }
0x214a   :  { %2592 = vadd.xlane.f32.xlu0 %v2591_v0 }
0x214e   :  { %2434 = vadd.xlane.f32.xlu0 %v2433_v61 }
0x2152   :  { %2528 = vadd.xlane.f32.xlu0 %v2527_v43 }
0x21d7   :  { %v2593_v55 = vpop.xlane.xlu0 %2592 }
0x21d8   :  { %3095 = vlog2.f32 %v2593_v55 }
0x21db   :  { %v2435_v5 = vpop.xlane.xlu0 %2434 }
0x21dc   :  { %v2437_v9 = vrot.slane %v2435_v5, 4 }
0x21de   :  { %v2439_v11 = vadd.f32 %v2437_v9, %v2392_v8 }
0x21df   :  { %v2529_v14 = vpop.xlane.xlu0 %2528 }
0x21e0   :  { %v2486_v49 = vadd.f32 %v2484_v10, %v2439_v11  ;;  %v2531_v16 = vrot.slane %v2529_v14, 6 }
0x21e2   :  { %v3096_v18 = vpop.eup %3095  ;;  %v2533_v20 = vadd.f32 %v2531_v16, %v2486_v49 }
0x21e3   :  { %v2595_v22 = vmul.f32 0.6931472, %v3096_v18 }
0x21e4   :  { %v2580_v28 = vadd.f32 %v2578_v19, %v2533_v20 }
0x21e5   :  { %v2596_v29 = vadd.f32 %v2595_v22, %v3868_v58 }
0x21e6   :  { %v2609_v30 = vadd.f32 %v2608_v27, %v2580_v28 }
0x21e7   :  { %2598 = vst.msk [vmem:[#allocation16 - $0x7] sm:$0x80] %vm2597_vm13, %v2596_v29 }
0x21e8   :  { %3216 = shalt.err (!%p3213_p0)
}
0x21e9   :  { %s3217_s27 = scalar_lea.hbm %s3955_s15, 16 }
0x21ea   :  { %p3218_p1 = scmp.ne.s32.totalorder %s3955_s15, %s3217_s27  ;;  %p3221_p2 = scmp.lt.u32.totalorder %s3217_s27, %s3955_s15 }
0x21ec   :  { %p3223_p3 = pnand %p3221_p2, %p3218_p1 }
0x21ee   :  { %3226 = shalt.err (!%p3223_p3)
}
0x21ef   :  { %2621 = dma.vmem_to_hbm [thread:$0]  %s2619_s21, 16, %s3955_s15, [#allocation6]   ;;  %2611 = vst.msk [vmem:[#allocation17] sm:$0x1] %vm2610_vm14, %v2609_v30 }
0x21f0   :  { %s3227_s1 = scalar_lea.vmem %s3907_s26, 16  ;;  %s3231_s20 = scalar_lea.vmem %s3907_s26, 32 }
0x21f1   :  { %p3228_p4 = scmp.ne.s32.totalorder %s3907_s26, %s3227_s1  ;;  %p3232_p5 = scmp.lt.s32.totalorder %s3907_s26, %s3907_s26 }
0x21f2   :  { %p3233_p6 = scmp.lt.s32.totalorder %s3231_s20, %s3227_s1 }
0x21f4   :  { %p3234_p7 = por %p3233_p6, %p3232_p5 }
0x21f6   :  { %p3235_p8 = pnand %p3234_p7, %p3228_p4 }
0x21f8   :  { %3238 = shalt.err (!%p3235_p8)
}
0x21f9   :  { %s3239_s14 = scalar_lea.hbm %s3956_s16, 16 }
0x21fa   :  { %p3240_p9 = scmp.ne.s32.totalorder %s3956_s16, %s3239_s14  ;;  %p3243_p10 = scmp.lt.u32.totalorder %s3239_s14, %s3956_s16 }
0x21fc   :  { %p3245_p11 = pnand %p3243_p10, %p3240_p9 }
0x21fe   :  { %3248 = shalt.err (!%p3245_p11)
}
0x21ff   :  { %2631 = dma.vmem_to_hbm [thread:$0]  %s3907_s26, 16, %s3956_s16, [#allocation18]  }
0x2200   :  { %3259 = dma.done.wait [#allocation6], 16  }
0x2201   :  { %3260 = vsyncadd [#allocation6], 4294967280 }
0x2202   :  { %3261 = dma.done.wait [#allocation18], 16  }
0x2203   :  { %3262 = vsyncadd [#allocation18], 4294967280 }
0x2204   :  { %2638 = vsyncpa [#allocation5], 1 }
0x2205   :  { %2639 = vsyncpa [#allocation12], 1 }
0x2206   :  { %2640 = vsyncpa [#allocation15], 1 }
0x2207   :  { %2641 = vsyncpa [#allocation6], 1 }
0x2208   :  { %2642 = vsyncpa [#allocation18], 1 }
0x2209   :  { %2643 = vsyncpa [#allocation7], 1 }
0x220a   :  { %2644 = vsyncpa [#allocation9], 1 }

</bundles_post_ra>
